<compile_context>
chip_gen: v6e
topology: v6e:2x2x1
jax: 0.10.0
libtpu: 0.0.40
codegen_flags: <defaults>
</compile_context>

<pallas_src>
import functools
import math

import jax
import jax.numpy as jnp
import numpy as np
from jax.experimental import pallas as pl
from jax.experimental.pallas import tpu as pltpu

BASE_FEATURES = 5
SCREEN_W = 40
SCREEN_H = 36
S2D_H = SCREEN_H // 2          # 18  (space-to-depth grid height)
S2D_W = SCREEN_W // 2          # 20  (space-to-depth grid width)
NPOS = S2D_H * S2D_W           # 360 positions per batch element
C1_OUT = 8
C2_OUT = 16
FC1_HID = 64
PAD_COLS = 48                  # >= max conv2 shift (2*20 + 2 = 42)
CONV2_VALID_H = 15             # valid conv2 output rows (i < 15)
CONV2_VALID_W = 17             # valid conv2 output cols (j < 17)


# ----------------------------- fused Pallas kernel ---------------------------
def _fused_forward_kernel(xb_ref, ximg_ref, wb_ref, bb_ref, wc1_ref, bc1_ref,
                          wc2_ref, bc2_ref, w1b_ref, w1i_ref, b1_ref,
                          w2_ref, b2_ref, o_ref, h1_scr, *, batch):
    f32 = jnp.float32
    ncol = batch * NPOS

    # ---- base_fc + ReLU : (B,5) @ (5,16) ------------------------------------
    base = jnp.dot(xb_ref[...], wb_ref[...], preferred_element_type=f32)
    base = jnp.maximum(base + bb_ref[...], 0.0)                      # (B, 16)

    # ---- conv1 (1->8, k=3, s=2) as 4 shifted matmuls on the s2d image -------
    # layout: rows = channels / phases, cols = b*360 + ii*20 + jj
    acc1 = jnp.zeros((C1_OUT, ncol), f32)
    for t, (dh, dw) in enumerate(((0, 0), (0, 1), (1, 0), (1, 1))):
        s = dh * S2D_W + dw
        w_tap = wc1_ref[t * C1_OUT:(t + 1) * C1_OUT, :]              # (8, 4)
        acc1 = acc1 + jnp.dot(w_tap, ximg_ref[:, s:s + ncol],
                              preferred_element_type=f32)
    h1 = jnp.maximum(acc1 + bc1_ref[...], 0.0)                       # (8, ncol)
    # park h1 in a zero-tail-padded VMEM scratch so conv2 taps are plain slices
    h1_scr[:, 0:ncol] = h1
    h1_scr[:, ncol:ncol + PAD_COLS] = jnp.zeros((C1_OUT, PAD_COLS), f32)

    # ---- conv2 (8->16, k=3, s=1) as 9 shifted matmuls ------------------------
    acc2 = jnp.zeros((C2_OUT, ncol), f32)
    for kh in range(3):
        for kw in range(3):
            t = kh * 3 + kw
            s = kh * S2D_W + kw
            w_tap = wc2_ref[t * C2_OUT:(t + 1) * C2_OUT, :]          # (16, 8)
            acc2 = acc2 + jnp.dot(w_tap, h1_scr[:, s:s + ncol],
                                  preferred_element_type=f32)
    h2 = jnp.maximum(acc2 + bc2_ref[...], 0.0)                       # (16, ncol)

    # ---- fc1 (+ReLU) and fc2, kept fully in VMEM -----------------------------
    # fc1 image part: rows of W1i are ordered (out_channel, grid position) and
    # zeroed at invalid positions, so any garbage conv values contribute 0.
    base_fc1 = jnp.dot(base, w1b_ref[...], preferred_element_type=f32)   # (B, 64)
    for b in range(batch):
        acc = base_fc1[b:b + 1, :]                                   # (1, 64)
        for oc in range(C2_OUT):
            row = h2[oc:oc + 1, b * NPOS:(b + 1) * NPOS].astype(jnp.bfloat16)
            acc = acc + jnp.dot(row, w1i_ref[oc * NPOS:(oc + 1) * NPOS, :],
                                preferred_element_type=f32)
        h3 = jnp.maximum(acc + b1_ref[...], 0.0)                     # (1, 64)
        q = jnp.dot(h3, w2_ref[...], preferred_element_type=f32) + b2_ref[...]
        o_ref[b:b + 1, :] = q.astype(o_ref.dtype)


# --------------------------------- wrapper -----------------------------------
@jax.jit
def pinball_dqn_forward(x, kp):
    B = x.shape[0]
    ncol = B * NPOS
    out_dim = kp["W2T"].shape[1]

    xb = x[:, :BASE_FEATURES]
    # space-to-depth of the 36x40 image: (B,18,2,20,2) -> (B,18,20,2,2) -> flat
    img = x[:, BASE_FEATURES:].reshape(B, S2D_H, 2, S2D_W, 2)
    s2d = jnp.transpose(img, (0, 1, 3, 2, 4)).reshape(B * NPOS, 4)
    ximg = jnp.pad(s2d.T, ((0, 0), (0, PAD_COLS)))                   # (4, ncol+48)

    return pl.pallas_call(
        functools.partial(_fused_forward_kernel, batch=B),
        out_shape=jax.ShapeDtypeStruct((B, out_dim), jnp.float32),
        scratch_shapes=[pltpu.VMEM((C1_OUT, ncol + PAD_COLS), jnp.float32)],
    )(xb, ximg, kp["WbT"], kp["bb"], kp["Wc1_lhs"], kp["bc1"],
      kp["Wc2_lhs"], kp["bc2"], kp["W1bT"], kp["W1i"], kp["b1"],
      kp["W2T"], kp["b2"])


# ---------------------- deterministic synthetic parameters -------------------
def init_torch_params(key, output_size):
    """Parameters in the original PyTorch layouts."""
    ks = jax.random.split(key, 10)

    def uni(k, shape, fan_in):
        bound = 1.0 / math.sqrt(fan_in)
        return jax.random.uniform(k, shape, jnp.float32, -bound, bound)

    conv_out = CONV2_VALID_H * CONV2_VALID_W * C2_OUT                # 4080
    return {
        "Wc1": uni(ks[0], (8, 1, 3, 3), 9), "bc1": uni(ks[1], (8,), 9),
        "Wc2": uni(ks[2], (16, 8, 3, 3), 72), "bc2": uni(ks[3], (16,), 72),
        "Wb": uni(ks[4], (16, BASE_FEATURES), BASE_FEATURES),
        "bb": uni(ks[5], (16,), BASE_FEATURES),
        "W1": uni(ks[6], (FC1_HID, conv_out + 16), conv_out + 16),
        "b1": uni(ks[7], (FC1_HID,), conv_out + 16),
        "W2": uni(ks[8], (output_size, FC1_HID), FC1_HID),
        "b2": uni(ks[9], (output_size,), FC1_HID),
    }


def to_kernel_params(p):
    """One-time host-side re-layout of the PyTorch weights for the fused kernel."""
    Wc1 = np.asarray(p["Wc1"], np.float32)
    Wc2 = np.asarray(p["Wc2"], np.float32)

    # conv1 folded into space-to-depth form: 4 taps (dh,dw), each (out_c=8, phase=4)
    wc1 = np.zeros((4, C1_OUT, 4), np.float32)
    for kh in range(3):
        for kw in range(3):
            dh, dw = kh // 2, kw // 2
            ph = (kh % 2) * 2 + (kw % 2)
            wc1[dh * 2 + dw, :, ph] = Wc1[:, 0, kh, kw]
    wc1_lhs = jnp.asarray(wc1.reshape(4 * C1_OUT, 4))

    # conv2: 9 taps, each (out_c=16, in_c=8), stacked tap-major along rows
    wc2_lhs = jnp.asarray(np.transpose(Wc2, (2, 3, 0, 1)).reshape(9 * C2_OUT, 8))

    # fc1: split base/image part, fold the PyTorch NCHW flatten + valid-window
    # selection into a (oc, full-grid-pos)-ordered weight with zero rows at
    # invalid positions.
    W1_t = np.asarray(p["W1"], np.float32).T                         # (4096, 64)
    w1b = jnp.asarray(W1_t[:16])                                     # (16, 64)
    w1img = W1_t[16:].reshape(C2_OUT, CONV2_VALID_H, CONV2_VALID_W, FC1_HID)
    w1i = np.zeros((C2_OUT, S2D_H, S2D_W, FC1_HID), np.float32)
    w1i[:, :CONV2_VALID_H, :CONV2_VALID_W, :] = w1img
    w1i = jnp.asarray(w1i.reshape(C2_OUT * NPOS, FC1_HID)).astype(jnp.bfloat16)

    return {
        "WbT": p["Wb"].T, "bb": p["bb"].reshape(1, 16),
        "Wc1_lhs": wc1_lhs, "bc1": p["bc1"].reshape(C1_OUT, 1),
        "Wc2_lhs": wc2_lhs, "bc2": p["bc2"].reshape(C2_OUT, 1),
        "W1bT": w1b, "W1i": w1i, "b1": p["b1"].reshape(1, FC1_HID),
        "W2T": p["W2"].T, "b2": p["b2"].reshape(1, -1),
    }


# --------------------------------- reference ----------------------------------
def reference_forward(x, p):
    """Pure-JAX re-implementation of the PyTorch module (NCHW semantics)."""
    B = x.shape[0]
    base = jax.nn.relu(x[:, :BASE_FEATURES] @ p["Wb"].T + p["bb"])
    img = x[:, BASE_FEATURES:].reshape(B, SCREEN_H, SCREEN_W, 1)
    h1 = jax.lax.conv_general_dilated(
        img, jnp.transpose(p["Wc1"], (2, 3, 1, 0)), (2, 2), "VALID",
        dimension_numbers=("NHWC", "HWIO", "NHWC"))
    h1 = jax.nn.relu(h1 + p["bc1"])
    h2 = jax.lax.conv_general_dilated(
        h1, jnp.transpose(p["Wc2"], (2, 3, 1, 0)), (1, 1), "VALID",
        dimension_numbers=("NHWC", "HWIO", "NHWC"))
    h2 = jax.nn.relu(h2 + p["bc2"])
    img_feat = jnp.transpose(h2, (0, 3, 1, 2)).reshape(B, -1)        # PyTorch .view
    comb = jnp.concatenate([base, img_feat], axis=1)
    h3 = jax.nn.relu(comb @ p["W1"].T + p["b1"])
    return h3 @ p["W2"].T + p["b2"]


if __name__ == "__main__":
    input_size = BASE_FEATURES + SCREEN_H * SCREEN_W                 # 1445
    output_size = 6
    batch = 2

    key = jax.random.PRNGKey(0)
    kx, kparam = jax.random.split(key)
    x = jax.random.normal(kx, (batch, input_size), jnp.float32)

    torch_params = init_torch_params(kparam, output_size)
    kernel_params = to_kernel_params(torch_params)

    out = pinball_dqn_forward(x, kernel_params)
    out = jax.block_until_ready(out)

    ref = reference_forward(x, torch_params)
    assert out.shape == (batch, output_size)
    max_err = float(jnp.max(jnp.abs(out - ref)))
    assert max_err < 2e-2, f"mismatch vs reference, max abs err {max_err}"
    print("KERNEL_OK")
</pallas_src>

<mosaic_0001>
module attributes {stable_mosaic.version = 11 : i64} {
  func.func @_fused_forward_kernel(%arg0: memref<2x5xf32, #tpu.memory_space<vmem>>, %arg1: memref<4x768xf32, #tpu.memory_space<vmem>>, %arg2: memref<5x16xf32, #tpu.memory_space<vmem>>, %arg3: memref<1x16xf32, #tpu.memory_space<vmem>>, %arg4: memref<32x4xf32, #tpu.memory_space<vmem>>, %arg5: memref<8x1xf32, #tpu.memory_space<vmem>>, %arg6: memref<144x8xf32, #tpu.memory_space<vmem>>, %arg7: memref<16x1xf32, #tpu.memory_space<vmem>>, %arg8: memref<16x64xf32, #tpu.memory_space<vmem>>, %arg9: memref<5760x64xbf16, #tpu.memory_space<vmem>>, %arg10: memref<1x64xf32, #tpu.memory_space<vmem>>, %arg11: memref<64x6xf32, #tpu.memory_space<vmem>>, %arg12: memref<1x6xf32, #tpu.memory_space<vmem>>, %arg13: memref<2x6xf32, #tpu.memory_space<vmem>>, %arg14: memref<8x768xf32, #tpu.memory_space<vmem>>) attributes {dimension_semantics = [], scalar_prefetch = 0 : i64, scratch_operands = 1 : i64, tpu.core_type = #tpu.core_type<tc>} {
    %c0 = arith.constant 0 : index
    %c0_0 = arith.constant 0 : index
    %0 = vector.load %arg0[%c0, %c0_0] : memref<2x5xf32, #tpu.memory_space<vmem>>, vector<2x5xf32>
    %c0_1 = arith.constant 0 : index
    %c0_2 = arith.constant 0 : index
    %1 = vector.load %arg2[%c0_1, %c0_2] : memref<5x16xf32, #tpu.memory_space<vmem>>, vector<5x16xf32>
    %cst = arith.constant dense<0.000000e+00> : vector<2x16xf32>
    %2 = tpu.matmul %0, %1, %cst {dimension_numbers = #tpu.dot_dimension_numbers<[1], [0], [0], [1], [0, 0, 1, 1], [], []>} : vector<2x5xf32>, vector<5x16xf32>, vector<2x16xf32> -> vector<2x16xf32>
    %c0_3 = arith.constant 0 : index
    %c0_4 = arith.constant 0 : index
    %3 = vector.load %arg3[%c0_3, %c0_4] : memref<1x16xf32, #tpu.memory_space<vmem>>, vector<1x16xf32>
    %4 = vector.broadcast %3 : vector<1x16xf32> to vector<2x16xf32>
    %5 = arith.addf %2, %4 : vector<2x16xf32>
    %cst_5 = arith.constant 0.000000e+00 : f32
    %6 = vector.broadcast %cst_5 : f32 to vector<2x16xf32>
    %7 = arith.maximumf %5, %6 : vector<2x16xf32>
    %cst_6 = arith.constant 0.000000e+00 : f32
    %8 = vector.broadcast %cst_6 : f32 to vector<8x720xf32>
    %c0_7 = arith.constant 0 : index
    %c0_8 = arith.constant 0 : index
    %9 = vector.load %arg4[%c0_7, %c0_8] : memref<32x4xf32, #tpu.memory_space<vmem>>, vector<8x4xf32>
    %c0_9 = arith.constant 0 : index
    %c0_10 = arith.constant 0 : index
    %10 = vector.load %arg1[%c0_9, %c0_10] : memref<4x768xf32, #tpu.memory_space<vmem>>, vector<4x720xf32>
    %cst_11 = arith.constant dense<0.000000e+00> : vector<8x720xf32>
    %11 = tpu.matmul %9, %10, %cst_11 {dimension_numbers = #tpu.dot_dimension_numbers<[1], [0], [0], [1], [0, 0, 1, 1], [], []>} : vector<8x4xf32>, vector<4x720xf32>, vector<8x720xf32> -> vector<8x720xf32>
    %12 = arith.addf %8, %11 : vector<8x720xf32>
    %c8 = arith.constant 8 : index
    %c0_12 = arith.constant 0 : index
    %13 = vector.load %arg4[%c8, %c0_12] : memref<32x4xf32, #tpu.memory_space<vmem>>, vector<8x4xf32>
    %c0_13 = arith.constant 0 : index
    %c1 = arith.constant 1 : index
    %14 = vector.load %arg1[%c0_13, %c1] : memref<4x768xf32, #tpu.memory_space<vmem>>, vector<4x720xf32>
    %cst_14 = arith.constant dense<0.000000e+00> : vector<8x720xf32>
    %15 = tpu.matmul %13, %14, %cst_14 {dimension_numbers = #tpu.dot_dimension_numbers<[1], [0], [0], [1], [0, 0, 1, 1], [], []>} : vector<8x4xf32>, vector<4x720xf32>, vector<8x720xf32> -> vector<8x720xf32>
    %16 = arith.addf %12, %15 : vector<8x720xf32>
    %c16 = arith.constant 16 : index
    %c0_15 = arith.constant 0 : index
    %17 = vector.load %arg4[%c16, %c0_15] : memref<32x4xf32, #tpu.memory_space<vmem>>, vector<8x4xf32>
    %c0_16 = arith.constant 0 : index
    %c20 = arith.constant 20 : index
    %18 = vector.load %arg1[%c0_16, %c20] : memref<4x768xf32, #tpu.memory_space<vmem>>, vector<4x720xf32>
    %cst_17 = arith.constant dense<0.000000e+00> : vector<8x720xf32>
    %19 = tpu.matmul %17, %18, %cst_17 {dimension_numbers = #tpu.dot_dimension_numbers<[1], [0], [0], [1], [0, 0, 1, 1], [], []>} : vector<8x4xf32>, vector<4x720xf32>, vector<8x720xf32> -> vector<8x720xf32>
    %20 = arith.addf %16, %19 : vector<8x720xf32>
    %c24 = arith.constant 24 : index
    %c0_18 = arith.constant 0 : index
    %21 = vector.load %arg4[%c24, %c0_18] : memref<32x4xf32, #tpu.memory_space<vmem>>, vector<8x4xf32>
    %c0_19 = arith.constant 0 : index
    %c21 = arith.constant 21 : index
    %22 = vector.load %arg1[%c0_19, %c21] : memref<4x768xf32, #tpu.memory_space<vmem>>, vector<4x720xf32>
    %cst_20 = arith.constant dense<0.000000e+00> : vector<8x720xf32>
    %23 = tpu.matmul %21, %22, %cst_20 {dimension_numbers = #tpu.dot_dimension_numbers<[1], [0], [0], [1], [0, 0, 1, 1], [], []>} : vector<8x4xf32>, vector<4x720xf32>, vector<8x720xf32> -> vector<8x720xf32>
    %24 = arith.addf %20, %23 : vector<8x720xf32>
    %c0_21 = arith.constant 0 : index
    %c0_22 = arith.constant 0 : index
    %25 = vector.load %arg5[%c0_21, %c0_22] : memref<8x1xf32, #tpu.memory_space<vmem>>, vector<8x1xf32>
    %26 = vector.broadcast %25 : vector<8x1xf32> to vector<8x720xf32>
    %27 = arith.addf %24, %26 : vector<8x720xf32>
    %cst_23 = arith.constant 0.000000e+00 : f32
    %28 = vector.broadcast %cst_23 : f32 to vector<8x720xf32>
    %29 = arith.maximumf %27, %28 : vector<8x720xf32>
    %c0_24 = arith.constant 0 : index
    %c0_25 = arith.constant 0 : index
    %30 = vector.load %arg14[%c0_24, %c0_25] : memref<8x768xf32, #tpu.memory_space<vmem>>, vector<8x720xf32>
    tpu.vector_store %arg14[%c0_24, %c0_25], %29 {strides = array<i32>} : memref<8x768xf32, #tpu.memory_space<vmem>>, vector<8x720xf32>,
    %cst_26 = arith.constant 0.000000e+00 : f32
    %31 = vector.broadcast %cst_26 : f32 to vector<8x48xf32>
    %c0_27 = arith.constant 0 : index
    %c720 = arith.constant 720 : index
    %32 = vector.load %arg14[%c0_27, %c720] : memref<8x768xf32, #tpu.memory_space<vmem>>, vector<8x48xf32>
    tpu.vector_store %arg14[%c0_27, %c720], %31 {strides = array<i32>} : memref<8x768xf32, #tpu.memory_space<vmem>>, vector<8x48xf32>,
    %cst_28 = arith.constant 0.000000e+00 : f32
    %33 = vector.broadcast %cst_28 : f32 to vector<16x720xf32>
    %c0_29 = arith.constant 0 : index
    %c0_30 = arith.constant 0 : index
    %34 = vector.load %arg6[%c0_29, %c0_30] : memref<144x8xf32, #tpu.memory_space<vmem>>, vector<16x8xf32>
    %c0_31 = arith.constant 0 : index
    %c0_32 = arith.constant 0 : index
    %35 = vector.load %arg14[%c0_31, %c0_32] : memref<8x768xf32, #tpu.memory_space<vmem>>, vector<8x720xf32>
    %cst_33 = arith.constant dense<0.000000e+00> : vector<16x720xf32>
    %36 = tpu.matmul %34, %35, %cst_33 {dimension_numbers = #tpu.dot_dimension_numbers<[1], [0], [0], [1], [0, 0, 1, 1], [], []>} : vector<16x8xf32>, vector<8x720xf32>, vector<16x720xf32> -> vector<16x720xf32>
    %37 = arith.addf %33, %36 : vector<16x720xf32>
    %c16_34 = arith.constant 16 : index
    %c0_35 = arith.constant 0 : index
    %38 = vector.load %arg6[%c16_34, %c0_35] : memref<144x8xf32, #tpu.memory_space<vmem>>, vector<16x8xf32>
    %c0_36 = arith.constant 0 : index
    %c1_37 = arith.constant 1 : index
    %39 = vector.load %arg14[%c0_36, %c1_37] : memref<8x768xf32, #tpu.memory_space<vmem>>, vector<8x720xf32>
    %cst_38 = arith.constant dense<0.000000e+00> : vector<16x720xf32>
    %40 = tpu.matmul %38, %39, %cst_38 {dimension_numbers = #tpu.dot_dimension_numbers<[1], [0], [0], [1], [0, 0, 1, 1], [], []>} : vector<16x8xf32>, vector<8x720xf32>, vector<16x720xf32> -> vector<16x720xf32>
    %41 = arith.addf %37, %40 : vector<16x720xf32>
    %c32 = arith.constant 32 : index
    %c0_39 = arith.constant 0 : index
    %42 = vector.load %arg6[%c32, %c0_39] : memref<144x8xf32, #tpu.memory_space<vmem>>, vector<16x8xf32>
    %c0_40 = arith.constant 0 : index
    %c2 = arith.constant 2 : index
    %43 = vector.load %arg14[%c0_40, %c2] : memref<8x768xf32, #tpu.memory_space<vmem>>, vector<8x720xf32>
    %cst_41 = arith.constant dense<0.000000e+00> : vector<16x720xf32>
    %44 = tpu.matmul %42, %43, %cst_41 {dimension_numbers = #tpu.dot_dimension_numbers<[1], [0], [0], [1], [0, 0, 1, 1], [], []>} : vector<16x8xf32>, vector<8x720xf32>, vector<16x720xf32> -> vector<16x720xf32>
    %45 = arith.addf %41, %44 : vector<16x720xf32>
    %c48 = arith.constant 48 : index
    %c0_42 = arith.constant 0 : index
    %46 = vector.load %arg6[%c48, %c0_42] : memref<144x8xf32, #tpu.memory_space<vmem>>, vector<16x8xf32>
    %c0_43 = arith.constant 0 : index
    %c20_44 = arith.constant 20 : index
    %47 = vector.load %arg14[%c0_43, %c20_44] : memref<8x768xf32, #tpu.memory_space<vmem>>, vector<8x720xf32>
    %cst_45 = arith.constant dense<0.000000e+00> : vector<16x720xf32>
    %48 = tpu.matmul %46, %47, %cst_45 {dimension_numbers = #tpu.dot_dimension_numbers<[1], [0], [0], [1], [0, 0, 1, 1], [], []>} : vector<16x8xf32>, vector<8x720xf32>, vector<16x720xf32> -> vector<16x720xf32>
    %49 = arith.addf %45, %48 : vector<16x720xf32>
    %c64 = arith.constant 64 : index
    %c0_46 = arith.constant 0 : index
    %50 = vector.load %arg6[%c64, %c0_46] : memref<144x8xf32, #tpu.memory_space<vmem>>, vector<16x8xf32>
    %c0_47 = arith.constant 0 : index
    %c21_48 = arith.constant 21 : index
    %51 = vector.load %arg14[%c0_47, %c21_48] : memref<8x768xf32, #tpu.memory_space<vmem>>, vector<8x720xf32>
    %cst_49 = arith.constant dense<0.000000e+00> : vector<16x720xf32>
    %52 = tpu.matmul %50, %51, %cst_49 {dimension_numbers = #tpu.dot_dimension_numbers<[1], [0], [0], [1], [0, 0, 1, 1], [], []>} : vector<16x8xf32>, vector<8x720xf32>, vector<16x720xf32> -> vector<16x720xf32>
    %53 = arith.addf %49, %52 : vector<16x720xf32>
    %c80 = arith.constant 80 : index
    %c0_50 = arith.constant 0 : index
    %54 = vector.load %arg6[%c80, %c0_50] : memref<144x8xf32, #tpu.memory_space<vmem>>, vector<16x8xf32>
    %c0_51 = arith.constant 0 : index
    %c22 = arith.constant 22 : index
    %55 = vector.load %arg14[%c0_51, %c22] : memref<8x768xf32, #tpu.memory_space<vmem>>, vector<8x720xf32>
    %cst_52 = arith.constant dense<0.000000e+00> : vector<16x720xf32>
    %56 = tpu.matmul %54, %55, %cst_52 {dimension_numbers = #tpu.dot_dimension_numbers<[1], [0], [0], [1], [0, 0, 1, 1], [], []>} : vector<16x8xf32>, vector<8x720xf32>, vector<16x720xf32> -> vector<16x720xf32>
    %57 = arith.addf %53, %56 : vector<16x720xf32>
    %c96 = arith.constant 96 : index
    %c0_53 = arith.constant 0 : index
    %58 = vector.load %arg6[%c96, %c0_53] : memref<144x8xf32, #tpu.memory_space<vmem>>, vector<16x8xf32>
    %c0_54 = arith.constant 0 : index
    %c40 = arith.constant 40 : index
    %59 = vector.load %arg14[%c0_54, %c40] : memref<8x768xf32, #tpu.memory_space<vmem>>, vector<8x720xf32>
    %cst_55 = arith.constant dense<0.000000e+00> : vector<16x720xf32>
    %60 = tpu.matmul %58, %59, %cst_55 {dimension_numbers = #tpu.dot_dimension_numbers<[1], [0], [0], [1], [0, 0, 1, 1], [], []>} : vector<16x8xf32>, vector<8x720xf32>, vector<16x720xf32> -> vector<16x720xf32>
    %61 = arith.addf %57, %60 : vector<16x720xf32>
    %c112 = arith.constant 112 : index
    %c0_56 = arith.constant 0 : index
    %62 = vector.load %arg6[%c112, %c0_56] : memref<144x8xf32, #tpu.memory_space<vmem>>, vector<16x8xf32>
    %c0_57 = arith.constant 0 : index
    %c41 = arith.constant 41 : index
    %63 = vector.load %arg14[%c0_57, %c41] : memref<8x768xf32, #tpu.memory_space<vmem>>, vector<8x720xf32>
    %cst_58 = arith.constant dense<0.000000e+00> : vector<16x720xf32>
    %64 = tpu.matmul %62, %63, %cst_58 {dimension_numbers = #tpu.dot_dimension_numbers<[1], [0], [0], [1], [0, 0, 1, 1], [], []>} : vector<16x8xf32>, vector<8x720xf32>, vector<16x720xf32> -> vector<16x720xf32>
    %65 = arith.addf %61, %64 : vector<16x720xf32>
    %c128 = arith.constant 128 : index
    %c0_59 = arith.constant 0 : index
    %66 = vector.load %arg6[%c128, %c0_59] : memref<144x8xf32, #tpu.memory_space<vmem>>, vector<16x8xf32>
    %c0_60 = arith.constant 0 : index
    %c42 = arith.constant 42 : index
    %67 = vector.load %arg14[%c0_60, %c42] : memref<8x768xf32, #tpu.memory_space<vmem>>, vector<8x720xf32>
    %cst_61 = arith.constant dense<0.000000e+00> : vector<16x720xf32>
    %68 = tpu.matmul %66, %67, %cst_61 {dimension_numbers = #tpu.dot_dimension_numbers<[1], [0], [0], [1], [0, 0, 1, 1], [], []>} : vector<16x8xf32>, vector<8x720xf32>, vector<16x720xf32> -> vector<16x720xf32>
    %69 = arith.addf %65, %68 : vector<16x720xf32>
    %c0_62 = arith.constant 0 : index
    %c0_63 = arith.constant 0 : index
    %70 = vector.load %arg7[%c0_62, %c0_63] : memref<16x1xf32, #tpu.memory_space<vmem>>, vector<16x1xf32>
    %71 = vector.broadcast %70 : vector<16x1xf32> to vector<16x720xf32>
    %72 = arith.addf %69, %71 : vector<16x720xf32>
    %cst_64 = arith.constant 0.000000e+00 : f32
    %73 = vector.broadcast %cst_64 : f32 to vector<16x720xf32>
    %74 = arith.maximumf %72, %73 : vector<16x720xf32>
    %c0_65 = arith.constant 0 : index
    %c0_66 = arith.constant 0 : index
    %75 = vector.load %arg8[%c0_65, %c0_66] : memref<16x64xf32, #tpu.memory_space<vmem>>, vector<16x64xf32>
    %cst_67 = arith.constant dense<0.000000e+00> : vector<2x64xf32>
    %76 = tpu.matmul %7, %75, %cst_67 {dimension_numbers = #tpu.dot_dimension_numbers<[1], [0], [0], [1], [0, 0, 1, 1], [], []>} : vector<2x16xf32>, vector<16x64xf32>, vector<2x64xf32> -> vector<2x64xf32>
    %77 = vector.extract_strided_slice %76 {offsets = [0, 0], sizes = [1, 64], strides = [1, 1]} : vector<2x64xf32> to vector<1x64xf32>
    %78 = vector.extract_strided_slice %74 {offsets = [0, 0], sizes = [1, 360], strides = [1, 1]} : vector<16x720xf32> to vector<1x360xf32>
    %79 = arith.truncf %78 : vector<1x360xf32> to vector<1x360xbf16>
    %c0_68 = arith.constant 0 : index
    %c0_69 = arith.constant 0 : index
    %80 = vector.load %arg9[%c0_68, %c0_69] : memref<5760x64xbf16, #tpu.memory_space<vmem>>, vector<360x64xbf16>
    %cst_70 = arith.constant dense<0.000000e+00> : vector<1x64xf32>
    %81 = tpu.matmul %79, %80, %cst_70 {dimension_numbers = #tpu.dot_dimension_numbers<[1], [0], [0], [1], [0, 0, 1, 1], [], []>} : vector<1x360xbf16>, vector<360x64xbf16>, vector<1x64xf32> -> vector<1x64xf32>
    %82 = arith.addf %77, %81 : vector<1x64xf32>
    %83 = vector.extract_strided_slice %74 {offsets = [1, 0], sizes = [1, 360], strides = [1, 1]} : vector<16x720xf32> to vector<1x360xf32>
    %84 = arith.truncf %83 : vector<1x360xf32> to vector<1x360xbf16>
    %c360 = arith.constant 360 : index
    %c0_71 = arith.constant 0 : index
    %85 = vector.load %arg9[%c360, %c0_71] : memref<5760x64xbf16, #tpu.memory_space<vmem>>, vector<360x64xbf16>
    %cst_72 = arith.constant dense<0.000000e+00> : vector<1x64xf32>
    %86 = tpu.matmul %84, %85, %cst_72 {dimension_numbers = #tpu.dot_dimension_numbers<[1], [0], [0], [1], [0, 0, 1, 1], [], []>} : vector<1x360xbf16>, vector<360x64xbf16>, vector<1x64xf32> -> vector<1x64xf32>
    %87 = arith.addf %82, %86 : vector<1x64xf32>
    %88 = vector.extract_strided_slice %74 {offsets = [2, 0], sizes = [1, 360], strides = [1, 1]} : vector<16x720xf32> to vector<1x360xf32>
    %89 = arith.truncf %88 : vector<1x360xf32> to vector<1x360xbf16>
    %c720_73 = arith.constant 720 : index
    %c0_74 = arith.constant 0 : index
    %90 = vector.load %arg9[%c720_73, %c0_74] : memref<5760x64xbf16, #tpu.memory_space<vmem>>, vector<360x64xbf16>
    %cst_75 = arith.constant dense<0.000000e+00> : vector<1x64xf32>
    %91 = tpu.matmul %89, %90, %cst_75 {dimension_numbers = #tpu.dot_dimension_numbers<[1], [0], [0], [1], [0, 0, 1, 1], [], []>} : vector<1x360xbf16>, vector<360x64xbf16>, vector<1x64xf32> -> vector<1x64xf32>
    %92 = arith.addf %87, %91 : vector<1x64xf32>
    %93 = vector.extract_strided_slice %74 {offsets = [3, 0], sizes = [1, 360], strides = [1, 1]} : vector<16x720xf32> to vector<1x360xf32>
    %94 = arith.truncf %93 : vector<1x360xf32> to vector<1x360xbf16>
    %c1080 = arith.constant 1080 : index
    %c0_76 = arith.constant 0 : index
    %95 = vector.load %arg9[%c1080, %c0_76] : memref<5760x64xbf16, #tpu.memory_space<vmem>>, vector<360x64xbf16>
    %cst_77 = arith.constant dense<0.000000e+00> : vector<1x64xf32>
    %96 = tpu.matmul %94, %95, %cst_77 {dimension_numbers = #tpu.dot_dimension_numbers<[1], [0], [0], [1], [0, 0, 1, 1], [], []>} : vector<1x360xbf16>, vector<360x64xbf16>, vector<1x64xf32> -> vector<1x64xf32>
    %97 = arith.addf %92, %96 : vector<1x64xf32>
    %98 = vector.extract_strided_slice %74 {offsets = [4, 0], sizes = [1, 360], strides = [1, 1]} : vector<16x720xf32> to vector<1x360xf32>
    %99 = arith.truncf %98 : vector<1x360xf32> to vector<1x360xbf16>
    %c1440 = arith.constant 1440 : index
    %c0_78 = arith.constant 0 : index
    %100 = vector.load %arg9[%c1440, %c0_78] : memref<5760x64xbf16, #tpu.memory_space<vmem>>, vector<360x64xbf16>
    %cst_79 = arith.constant dense<0.000000e+00> : vector<1x64xf32>
    %101 = tpu.matmul %99, %100, %cst_79 {dimension_numbers = #tpu.dot_dimension_numbers<[1], [0], [0], [1], [0, 0, 1, 1], [], []>} : vector<1x360xbf16>, vector<360x64xbf16>, vector<1x64xf32> -> vector<1x64xf32>
    %102 = arith.addf %97, %101 : vector<1x64xf32>
    %103 = vector.extract_strided_slice %74 {offsets = [5, 0], sizes = [1, 360], strides = [1, 1]} : vector<16x720xf32> to vector<1x360xf32>
    %104 = arith.truncf %103 : vector<1x360xf32> to vector<1x360xbf16>
    %c1800 = arith.constant 1800 : index
    %c0_80 = arith.constant 0 : index
    %105 = vector.load %arg9[%c1800, %c0_80] : memref<5760x64xbf16, #tpu.memory_space<vmem>>, vector<360x64xbf16>
    %cst_81 = arith.constant dense<0.000000e+00> : vector<1x64xf32>
    %106 = tpu.matmul %104, %105, %cst_81 {dimension_numbers = #tpu.dot_dimension_numbers<[1], [0], [0], [1], [0, 0, 1, 1], [], []>} : vector<1x360xbf16>, vector<360x64xbf16>, vector<1x64xf32> -> vector<1x64xf32>
    %107 = arith.addf %102, %106 : vector<1x64xf32>
    %108 = vector.extract_strided_slice %74 {offsets = [6, 0], sizes = [1, 360], strides = [1, 1]} : vector<16x720xf32> to vector<1x360xf32>
    %109 = arith.truncf %108 : vector<1x360xf32> to vector<1x360xbf16>
    %c2160 = arith.constant 2160 : index
    %c0_82 = arith.constant 0 : index
    %110 = vector.load %arg9[%c2160, %c0_82] : memref<5760x64xbf16, #tpu.memory_space<vmem>>, vector<360x64xbf16>
    %cst_83 = arith.constant dense<0.000000e+00> : vector<1x64xf32>
    %111 = tpu.matmul %109, %110, %cst_83 {dimension_numbers = #tpu.dot_dimension_numbers<[1], [0], [0], [1], [0, 0, 1, 1], [], []>} : vector<1x360xbf16>, vector<360x64xbf16>, vector<1x64xf32> -> vector<1x64xf32>
    %112 = arith.addf %107, %111 : vector<1x64xf32>
    %113 = vector.extract_strided_slice %74 {offsets = [7, 0], sizes = [1, 360], strides = [1, 1]} : vector<16x720xf32> to vector<1x360xf32>
    %114 = arith.truncf %113 : vector<1x360xf32> to vector<1x360xbf16>
    %c2520 = arith.constant 2520 : index
    %c0_84 = arith.constant 0 : index
    %115 = vector.load %arg9[%c2520, %c0_84] : memref<5760x64xbf16, #tpu.memory_space<vmem>>, vector<360x64xbf16>
    %cst_85 = arith.constant dense<0.000000e+00> : vector<1x64xf32>
    %116 = tpu.matmul %114, %115, %cst_85 {dimension_numbers = #tpu.dot_dimension_numbers<[1], [0], [0], [1], [0, 0, 1, 1], [], []>} : vector<1x360xbf16>, vector<360x64xbf16>, vector<1x64xf32> -> vector<1x64xf32>
    %117 = arith.addf %112, %116 : vector<1x64xf32>
    %118 = vector.extract_strided_slice %74 {offsets = [8, 0], sizes = [1, 360], strides = [1, 1]} : vector<16x720xf32> to vector<1x360xf32>
    %119 = arith.truncf %118 : vector<1x360xf32> to vector<1x360xbf16>
    %c2880 = arith.constant 2880 : index
    %c0_86 = arith.constant 0 : index
    %120 = vector.load %arg9[%c2880, %c0_86] : memref<5760x64xbf16, #tpu.memory_space<vmem>>, vector<360x64xbf16>
    %cst_87 = arith.constant dense<0.000000e+00> : vector<1x64xf32>
    %121 = tpu.matmul %119, %120, %cst_87 {dimension_numbers = #tpu.dot_dimension_numbers<[1], [0], [0], [1], [0, 0, 1, 1], [], []>} : vector<1x360xbf16>, vector<360x64xbf16>, vector<1x64xf32> -> vector<1x64xf32>
    %122 = arith.addf %117, %121 : vector<1x64xf32>
    %123 = vector.extract_strided_slice %74 {offsets = [9, 0], sizes = [1, 360], strides = [1, 1]} : vector<16x720xf32> to vector<1x360xf32>
    %124 = arith.truncf %123 : vector<1x360xf32> to vector<1x360xbf16>
    %c3240 = arith.constant 3240 : index
    %c0_88 = arith.constant 0 : index
    %125 = vector.load %arg9[%c3240, %c0_88] : memref<5760x64xbf16, #tpu.memory_space<vmem>>, vector<360x64xbf16>
    %cst_89 = arith.constant dense<0.000000e+00> : vector<1x64xf32>
    %126 = tpu.matmul %124, %125, %cst_89 {dimension_numbers = #tpu.dot_dimension_numbers<[1], [0], [0], [1], [0, 0, 1, 1], [], []>} : vector<1x360xbf16>, vector<360x64xbf16>, vector<1x64xf32> -> vector<1x64xf32>
    %127 = arith.addf %122, %126 : vector<1x64xf32>
    %128 = vector.extract_strided_slice %74 {offsets = [10, 0], sizes = [1, 360], strides = [1, 1]} : vector<16x720xf32> to vector<1x360xf32>
    %129 = arith.truncf %128 : vector<1x360xf32> to vector<1x360xbf16>
    %c3600 = arith.constant 3600 : index
    %c0_90 = arith.constant 0 : index
    %130 = vector.load %arg9[%c3600, %c0_90] : memref<5760x64xbf16, #tpu.memory_space<vmem>>, vector<360x64xbf16>
    %cst_91 = arith.constant dense<0.000000e+00> : vector<1x64xf32>
    %131 = tpu.matmul %129, %130, %cst_91 {dimension_numbers = #tpu.dot_dimension_numbers<[1], [0], [0], [1], [0, 0, 1, 1], [], []>} : vector<1x360xbf16>, vector<360x64xbf16>, vector<1x64xf32> -> vector<1x64xf32>
    %132 = arith.addf %127, %131 : vector<1x64xf32>
    %133 = vector.extract_strided_slice %74 {offsets = [11, 0], sizes = [1, 360], strides = [1, 1]} : vector<16x720xf32> to vector<1x360xf32>
    %134 = arith.truncf %133 : vector<1x360xf32> to vector<1x360xbf16>
    %c3960 = arith.constant 3960 : index
    %c0_92 = arith.constant 0 : index
    %135 = vector.load %arg9[%c3960, %c0_92] : memref<5760x64xbf16, #tpu.memory_space<vmem>>, vector<360x64xbf16>
    %cst_93 = arith.constant dense<0.000000e+00> : vector<1x64xf32>
    %136 = tpu.matmul %134, %135, %cst_93 {dimension_numbers = #tpu.dot_dimension_numbers<[1], [0], [0], [1], [0, 0, 1, 1], [], []>} : vector<1x360xbf16>, vector<360x64xbf16>, vector<1x64xf32> -> vector<1x64xf32>
    %137 = arith.addf %132, %136 : vector<1x64xf32>
    %138 = vector.extract_strided_slice %74 {offsets = [12, 0], sizes = [1, 360], strides = [1, 1]} : vector<16x720xf32> to vector<1x360xf32>
    %139 = arith.truncf %138 : vector<1x360xf32> to vector<1x360xbf16>
    %c4320 = arith.constant 4320 : index
    %c0_94 = arith.constant 0 : index
    %140 = vector.load %arg9[%c4320, %c0_94] : memref<5760x64xbf16, #tpu.memory_space<vmem>>, vector<360x64xbf16>
    %cst_95 = arith.constant dense<0.000000e+00> : vector<1x64xf32>
    %141 = tpu.matmul %139, %140, %cst_95 {dimension_numbers = #tpu.dot_dimension_numbers<[1], [0], [0], [1], [0, 0, 1, 1], [], []>} : vector<1x360xbf16>, vector<360x64xbf16>, vector<1x64xf32> -> vector<1x64xf32>
    %142 = arith.addf %137, %141 : vector<1x64xf32>
    %143 = vector.extract_strided_slice %74 {offsets = [13, 0], sizes = [1, 360], strides = [1, 1]} : vector<16x720xf32> to vector<1x360xf32>
    %144 = arith.truncf %143 : vector<1x360xf32> to vector<1x360xbf16>
    %c4680 = arith.constant 4680 : index
    %c0_96 = arith.constant 0 : index
    %145 = vector.load %arg9[%c4680, %c0_96] : memref<5760x64xbf16, #tpu.memory_space<vmem>>, vector<360x64xbf16>
    %cst_97 = arith.constant dense<0.000000e+00> : vector<1x64xf32>
    %146 = tpu.matmul %144, %145, %cst_97 {dimension_numbers = #tpu.dot_dimension_numbers<[1], [0], [0], [1], [0, 0, 1, 1], [], []>} : vector<1x360xbf16>, vector<360x64xbf16>, vector<1x64xf32> -> vector<1x64xf32>
    %147 = arith.addf %142, %146 : vector<1x64xf32>
    %148 = vector.extract_strided_slice %74 {offsets = [14, 0], sizes = [1, 360], strides = [1, 1]} : vector<16x720xf32> to vector<1x360xf32>
    %149 = arith.truncf %148 : vector<1x360xf32> to vector<1x360xbf16>
    %c5040 = arith.constant 5040 : index
    %c0_98 = arith.constant 0 : index
    %150 = vector.load %arg9[%c5040, %c0_98] : memref<5760x64xbf16, #tpu.memory_space<vmem>>, vector<360x64xbf16>
    %cst_99 = arith.constant dense<0.000000e+00> : vector<1x64xf32>
    %151 = tpu.matmul %149, %150, %cst_99 {dimension_numbers = #tpu.dot_dimension_numbers<[1], [0], [0], [1], [0, 0, 1, 1], [], []>} : vector<1x360xbf16>, vector<360x64xbf16>, vector<1x64xf32> -> vector<1x64xf32>
    %152 = arith.addf %147, %151 : vector<1x64xf32>
    %153 = vector.extract_strided_slice %74 {offsets = [15, 0], sizes = [1, 360], strides = [1, 1]} : vector<16x720xf32> to vector<1x360xf32>
    %154 = arith.truncf %153 : vector<1x360xf32> to vector<1x360xbf16>
    %c5400 = arith.constant 5400 : index
    %c0_100 = arith.constant 0 : index
    %155 = vector.load %arg9[%c5400, %c0_100] : memref<5760x64xbf16, #tpu.memory_space<vmem>>, vector<360x64xbf16>
    %cst_101 = arith.constant dense<0.000000e+00> : vector<1x64xf32>
    %156 = tpu.matmul %154, %155, %cst_101 {dimension_numbers = #tpu.dot_dimension_numbers<[1], [0], [0], [1], [0, 0, 1, 1], [], []>} : vector<1x360xbf16>, vector<360x64xbf16>, vector<1x64xf32> -> vector<1x64xf32>
    %157 = arith.addf %152, %156 : vector<1x64xf32>
    %c0_102 = arith.constant 0 : index
    %c0_103 = arith.constant 0 : index
    %158 = vector.load %arg10[%c0_102, %c0_103] : memref<1x64xf32, #tpu.memory_space<vmem>>, vector<1x64xf32>
    %159 = arith.addf %157, %158 : vector<1x64xf32>
    %cst_104 = arith.constant 0.000000e+00 : f32
    %160 = vector.broadcast %cst_104 : f32 to vector<1x64xf32>
    %161 = arith.maximumf %159, %160 : vector<1x64xf32>
    %c0_105 = arith.constant 0 : index
    %c0_106 = arith.constant 0 : index
    %162 = vector.load %arg11[%c0_105, %c0_106] : memref<64x6xf32, #tpu.memory_space<vmem>>, vector<64x6xf32>
    %cst_107 = arith.constant dense<0.000000e+00> : vector<1x6xf32>
    %163 = tpu.matmul %161, %162, %cst_107 {dimension_numbers = #tpu.dot_dimension_numbers<[1], [0], [0], [1], [0, 0, 1, 1], [], []>} : vector<1x64xf32>, vector<64x6xf32>, vector<1x6xf32> -> vector<1x6xf32>
    %c0_108 = arith.constant 0 : index
    %c0_109 = arith.constant 0 : index
    %164 = vector.load %arg12[%c0_108, %c0_109] : memref<1x6xf32, #tpu.memory_space<vmem>>, vector<1x6xf32>
    %165 = arith.addf %163, %164 : vector<1x6xf32>
    %c0_110 = arith.constant 0 : index
    %c0_111 = arith.constant 0 : index
    %166 = vector.load %arg13[%c0_110, %c0_111] : memref<2x6xf32, #tpu.memory_space<vmem>>, vector<1x6xf32>
    tpu.vector_store %arg13[%c0_110, %c0_111], %165 {strides = array<i32>} : memref<2x6xf32, #tpu.memory_space<vmem>>, vector<1x6xf32>,
    %167 = vector.extract_strided_slice %76 {offsets = [1, 0], sizes = [1, 64], strides = [1, 1]} : vector<2x64xf32> to vector<1x64xf32>
    %168 = vector.extract_strided_slice %74 {offsets = [0, 360], sizes = [1, 360], strides = [1, 1]} : vector<16x720xf32> to vector<1x360xf32>
    %169 = arith.truncf %168 : vector<1x360xf32> to vector<1x360xbf16>
    %c0_112 = arith.constant 0 : index
    %c0_113 = arith.constant 0 : index
    %170 = vector.load %arg9[%c0_112, %c0_113] : memref<5760x64xbf16, #tpu.memory_space<vmem>>, vector<360x64xbf16>
    %cst_114 = arith.constant dense<0.000000e+00> : vector<1x64xf32>
    %171 = tpu.matmul %169, %170, %cst_114 {dimension_numbers = #tpu.dot_dimension_numbers<[1], [0], [0], [1], [0, 0, 1, 1], [], []>} : vector<1x360xbf16>, vector<360x64xbf16>, vector<1x64xf32> -> vector<1x64xf32>
    %172 = arith.addf %167, %171 : vector<1x64xf32>
    %173 = vector.extract_strided_slice %74 {offsets = [1, 360], sizes = [1, 360], strides = [1, 1]} : vector<16x720xf32> to vector<1x360xf32>
    %174 = arith.truncf %173 : vector<1x360xf32> to vector<1x360xbf16>
    %c360_115 = arith.constant 360 : index
    %c0_116 = arith.constant 0 : index
    %175 = vector.load %arg9[%c360_115, %c0_116] : memref<5760x64xbf16, #tpu.memory_space<vmem>>, vector<360x64xbf16>
    %cst_117 = arith.constant dense<0.000000e+00> : vector<1x64xf32>
    %176 = tpu.matmul %174, %175, %cst_117 {dimension_numbers = #tpu.dot_dimension_numbers<[1], [0], [0], [1], [0, 0, 1, 1], [], []>} : vector<1x360xbf16>, vector<360x64xbf16>, vector<1x64xf32> -> vector<1x64xf32>
    %177 = arith.addf %172, %176 : vector<1x64xf32>
    %178 = vector.extract_strided_slice %74 {offsets = [2, 360], sizes = [1, 360], strides = [1, 1]} : vector<16x720xf32> to vector<1x360xf32>
    %179 = arith.truncf %178 : vector<1x360xf32> to vector<1x360xbf16>
    %c720_118 = arith.constant 720 : index
    %c0_119 = arith.constant 0 : index
    %180 = vector.load %arg9[%c720_118, %c0_119] : memref<5760x64xbf16, #tpu.memory_space<vmem>>, vector<360x64xbf16>
    %cst_120 = arith.constant dense<0.000000e+00> : vector<1x64xf32>
    %181 = tpu.matmul %179, %180, %cst_120 {dimension_numbers = #tpu.dot_dimension_numbers<[1], [0], [0], [1], [0, 0, 1, 1], [], []>} : vector<1x360xbf16>, vector<360x64xbf16>, vector<1x64xf32> -> vector<1x64xf32>
    %182 = arith.addf %177, %181 : vector<1x64xf32>
    %183 = vector.extract_strided_slice %74 {offsets = [3, 360], sizes = [1, 360], strides = [1, 1]} : vector<16x720xf32> to vector<1x360xf32>
    %184 = arith.truncf %183 : vector<1x360xf32> to vector<1x360xbf16>
    %c1080_121 = arith.constant 1080 : index
    %c0_122 = arith.constant 0 : index
    %185 = vector.load %arg9[%c1080_121, %c0_122] : memref<5760x64xbf16, #tpu.memory_space<vmem>>, vector<360x64xbf16>
    %cst_123 = arith.constant dense<0.000000e+00> : vector<1x64xf32>
    %186 = tpu.matmul %184, %185, %cst_123 {dimension_numbers = #tpu.dot_dimension_numbers<[1], [0], [0], [1], [0, 0, 1, 1], [], []>} : vector<1x360xbf16>, vector<360x64xbf16>, vector<1x64xf32> -> vector<1x64xf32>
    %187 = arith.addf %182, %186 : vector<1x64xf32>
    %188 = vector.extract_strided_slice %74 {offsets = [4, 360], sizes = [1, 360], strides = [1, 1]} : vector<16x720xf32> to vector<1x360xf32>
    %189 = arith.truncf %188 : vector<1x360xf32> to vector<1x360xbf16>
    %c1440_124 = arith.constant 1440 : index
    %c0_125 = arith.constant 0 : index
    %190 = vector.load %arg9[%c1440_124, %c0_125] : memref<5760x64xbf16, #tpu.memory_space<vmem>>, vector<360x64xbf16>
    %cst_126 = arith.constant dense<0.000000e+00> : vector<1x64xf32>
    %191 = tpu.matmul %189, %190, %cst_126 {dimension_numbers = #tpu.dot_dimension_numbers<[1], [0], [0], [1], [0, 0, 1, 1], [], []>} : vector<1x360xbf16>, vector<360x64xbf16>, vector<1x64xf32> -> vector<1x64xf32>
    %192 = arith.addf %187, %191 : vector<1x64xf32>
    %193 = vector.extract_strided_slice %74 {offsets = [5, 360], sizes = [1, 360], strides = [1, 1]} : vector<16x720xf32> to vector<1x360xf32>
    %194 = arith.truncf %193 : vector<1x360xf32> to vector<1x360xbf16>
    %c1800_127 = arith.constant 1800 : index
    %c0_128 = arith.constant 0 : index
    %195 = vector.load %arg9[%c1800_127, %c0_128] : memref<5760x64xbf16, #tpu.memory_space<vmem>>, vector<360x64xbf16>
    %cst_129 = arith.constant dense<0.000000e+00> : vector<1x64xf32>
    %196 = tpu.matmul %194, %195, %cst_129 {dimension_numbers = #tpu.dot_dimension_numbers<[1], [0], [0], [1], [0, 0, 1, 1], [], []>} : vector<1x360xbf16>, vector<360x64xbf16>, vector<1x64xf32> -> vector<1x64xf32>
    %197 = arith.addf %192, %196 : vector<1x64xf32>
    %198 = vector.extract_strided_slice %74 {offsets = [6, 360], sizes = [1, 360], strides = [1, 1]} : vector<16x720xf32> to vector<1x360xf32>
    %199 = arith.truncf %198 : vector<1x360xf32> to vector<1x360xbf16>
    %c2160_130 = arith.constant 2160 : index
    %c0_131 = arith.constant 0 : index
    %200 = vector.load %arg9[%c2160_130, %c0_131] : memref<5760x64xbf16, #tpu.memory_space<vmem>>, vector<360x64xbf16>
    %cst_132 = arith.constant dense<0.000000e+00> : vector<1x64xf32>
    %201 = tpu.matmul %199, %200, %cst_132 {dimension_numbers = #tpu.dot_dimension_numbers<[1], [0], [0], [1], [0, 0, 1, 1], [], []>} : vector<1x360xbf16>, vector<360x64xbf16>, vector<1x64xf32> -> vector<1x64xf32>
    %202 = arith.addf %197, %201 : vector<1x64xf32>
    %203 = vector.extract_strided_slice %74 {offsets = [7, 360], sizes = [1, 360], strides = [1, 1]} : vector<16x720xf32> to vector<1x360xf32>
    %204 = arith.truncf %203 : vector<1x360xf32> to vector<1x360xbf16>
    %c2520_133 = arith.constant 2520 : index
    %c0_134 = arith.constant 0 : index
    %205 = vector.load %arg9[%c2520_133, %c0_134] : memref<5760x64xbf16, #tpu.memory_space<vmem>>, vector<360x64xbf16>
    %cst_135 = arith.constant dense<0.000000e+00> : vector<1x64xf32>
    %206 = tpu.matmul %204, %205, %cst_135 {dimension_numbers = #tpu.dot_dimension_numbers<[1], [0], [0], [1], [0, 0, 1, 1], [], []>} : vector<1x360xbf16>, vector<360x64xbf16>, vector<1x64xf32> -> vector<1x64xf32>
    %207 = arith.addf %202, %206 : vector<1x64xf32>
    %208 = vector.extract_strided_slice %74 {offsets = [8, 360], sizes = [1, 360], strides = [1, 1]} : vector<16x720xf32> to vector<1x360xf32>
    %209 = arith.truncf %208 : vector<1x360xf32> to vector<1x360xbf16>
    %c2880_136 = arith.constant 2880 : index
    %c0_137 = arith.constant 0 : index
    %210 = vector.load %arg9[%c2880_136, %c0_137] : memref<5760x64xbf16, #tpu.memory_space<vmem>>, vector<360x64xbf16>
    %cst_138 = arith.constant dense<0.000000e+00> : vector<1x64xf32>
    %211 = tpu.matmul %209, %210, %cst_138 {dimension_numbers = #tpu.dot_dimension_numbers<[1], [0], [0], [1], [0, 0, 1, 1], [], []>} : vector<1x360xbf16>, vector<360x64xbf16>, vector<1x64xf32> -> vector<1x64xf32>
    %212 = arith.addf %207, %211 : vector<1x64xf32>
    %213 = vector.extract_strided_slice %74 {offsets = [9, 360], sizes = [1, 360], strides = [1, 1]} : vector<16x720xf32> to vector<1x360xf32>
    %214 = arith.truncf %213 : vector<1x360xf32> to vector<1x360xbf16>
    %c3240_139 = arith.constant 3240 : index
    %c0_140 = arith.constant 0 : index
    %215 = vector.load %arg9[%c3240_139, %c0_140] : memref<5760x64xbf16, #tpu.memory_space<vmem>>, vector<360x64xbf16>
    %cst_141 = arith.constant dense<0.000000e+00> : vector<1x64xf32>
    %216 = tpu.matmul %214, %215, %cst_141 {dimension_numbers = #tpu.dot_dimension_numbers<[1], [0], [0], [1], [0, 0, 1, 1], [], []>} : vector<1x360xbf16>, vector<360x64xbf16>, vector<1x64xf32> -> vector<1x64xf32>
    %217 = arith.addf %212, %216 : vector<1x64xf32>
    %218 = vector.extract_strided_slice %74 {offsets = [10, 360], sizes = [1, 360], strides = [1, 1]} : vector<16x720xf32> to vector<1x360xf32>
    %219 = arith.truncf %218 : vector<1x360xf32> to vector<1x360xbf16>
    %c3600_142 = arith.constant 3600 : index
    %c0_143 = arith.constant 0 : index
    %220 = vector.load %arg9[%c3600_142, %c0_143] : memref<5760x64xbf16, #tpu.memory_space<vmem>>, vector<360x64xbf16>
    %cst_144 = arith.constant dense<0.000000e+00> : vector<1x64xf32>
    %221 = tpu.matmul %219, %220, %cst_144 {dimension_numbers = #tpu.dot_dimension_numbers<[1], [0], [0], [1], [0, 0, 1, 1], [], []>} : vector<1x360xbf16>, vector<360x64xbf16>, vector<1x64xf32> -> vector<1x64xf32>
    %222 = arith.addf %217, %221 : vector<1x64xf32>
    %223 = vector.extract_strided_slice %74 {offsets = [11, 360], sizes = [1, 360], strides = [1, 1]} : vector<16x720xf32> to vector<1x360xf32>
    %224 = arith.truncf %223 : vector<1x360xf32> to vector<1x360xbf16>
    %c3960_145 = arith.constant 3960 : index
    %c0_146 = arith.constant 0 : index
    %225 = vector.load %arg9[%c3960_145, %c0_146] : memref<5760x64xbf16, #tpu.memory_space<vmem>>, vector<360x64xbf16>
    %cst_147 = arith.constant dense<0.000000e+00> : vector<1x64xf32>
    %226 = tpu.matmul %224, %225, %cst_147 {dimension_numbers = #tpu.dot_dimension_numbers<[1], [0], [0], [1], [0, 0, 1, 1], [], []>} : vector<1x360xbf16>, vector<360x64xbf16>, vector<1x64xf32> -> vector<1x64xf32>
    %227 = arith.addf %222, %226 : vector<1x64xf32>
    %228 = vector.extract_strided_slice %74 {offsets = [12, 360], sizes = [1, 360], strides = [1, 1]} : vector<16x720xf32> to vector<1x360xf32>
    %229 = arith.truncf %228 : vector<1x360xf32> to vector<1x360xbf16>
    %c4320_148 = arith.constant 4320 : index
    %c0_149 = arith.constant 0 : index
    %230 = vector.load %arg9[%c4320_148, %c0_149] : memref<5760x64xbf16, #tpu.memory_space<vmem>>, vector<360x64xbf16>
    %cst_150 = arith.constant dense<0.000000e+00> : vector<1x64xf32>
    %231 = tpu.matmul %229, %230, %cst_150 {dimension_numbers = #tpu.dot_dimension_numbers<[1], [0], [0], [1], [0, 0, 1, 1], [], []>} : vector<1x360xbf16>, vector<360x64xbf16>, vector<1x64xf32> -> vector<1x64xf32>
    %232 = arith.addf %227, %231 : vector<1x64xf32>
    %233 = vector.extract_strided_slice %74 {offsets = [13, 360], sizes = [1, 360], strides = [1, 1]} : vector<16x720xf32> to vector<1x360xf32>
    %234 = arith.truncf %233 : vector<1x360xf32> to vector<1x360xbf16>
    %c4680_151 = arith.constant 4680 : index
    %c0_152 = arith.constant 0 : index
    %235 = vector.load %arg9[%c4680_151, %c0_152] : memref<5760x64xbf16, #tpu.memory_space<vmem>>, vector<360x64xbf16>
    %cst_153 = arith.constant dense<0.000000e+00> : vector<1x64xf32>
    %236 = tpu.matmul %234, %235, %cst_153 {dimension_numbers = #tpu.dot_dimension_numbers<[1], [0], [0], [1], [0, 0, 1, 1], [], []>} : vector<1x360xbf16>, vector<360x64xbf16>, vector<1x64xf32> -> vector<1x64xf32>
    %237 = arith.addf %232, %236 : vector<1x64xf32>
    %238 = vector.extract_strided_slice %74 {offsets = [14, 360], sizes = [1, 360], strides = [1, 1]} : vector<16x720xf32> to vector<1x360xf32>
    %239 = arith.truncf %238 : vector<1x360xf32> to vector<1x360xbf16>
    %c5040_154 = arith.constant 5040 : index
    %c0_155 = arith.constant 0 : index
    %240 = vector.load %arg9[%c5040_154, %c0_155] : memref<5760x64xbf16, #tpu.memory_space<vmem>>, vector<360x64xbf16>
    %cst_156 = arith.constant dense<0.000000e+00> : vector<1x64xf32>
    %241 = tpu.matmul %239, %240, %cst_156 {dimension_numbers = #tpu.dot_dimension_numbers<[1], [0], [0], [1], [0, 0, 1, 1], [], []>} : vector<1x360xbf16>, vector<360x64xbf16>, vector<1x64xf32> -> vector<1x64xf32>
    %242 = arith.addf %237, %241 : vector<1x64xf32>
    %243 = vector.extract_strided_slice %74 {offsets = [15, 360], sizes = [1, 360], strides = [1, 1]} : vector<16x720xf32> to vector<1x360xf32>
    %244 = arith.truncf %243 : vector<1x360xf32> to vector<1x360xbf16>
    %c5400_157 = arith.constant 5400 : index
    %c0_158 = arith.constant 0 : index
    %245 = vector.load %arg9[%c5400_157, %c0_158] : memref<5760x64xbf16, #tpu.memory_space<vmem>>, vector<360x64xbf16>
    %cst_159 = arith.constant dense<0.000000e+00> : vector<1x64xf32>
    %246 = tpu.matmul %244, %245, %cst_159 {dimension_numbers = #tpu.dot_dimension_numbers<[1], [0], [0], [1], [0, 0, 1, 1], [], []>} : vector<1x360xbf16>, vector<360x64xbf16>, vector<1x64xf32> -> vector<1x64xf32>
    %247 = arith.addf %242, %246 : vector<1x64xf32>
    %c0_160 = arith.constant 0 : index
    %c0_161 = arith.constant 0 : index
    %248 = vector.load %arg10[%c0_160, %c0_161] : memref<1x64xf32, #tpu.memory_space<vmem>>, vector<1x64xf32>
    %249 = arith.addf %247, %248 : vector<1x64xf32>
    %cst_162 = arith.constant 0.000000e+00 : f32
    %250 = vector.broadcast %cst_162 : f32 to vector<1x64xf32>
    %251 = arith.maximumf %249, %250 : vector<1x64xf32>
    %c0_163 = arith.constant 0 : index
    %c0_164 = arith.constant 0 : index
    %252 = vector.load %arg11[%c0_163, %c0_164] : memref<64x6xf32, #tpu.memory_space<vmem>>, vector<64x6xf32>
    %cst_165 = arith.constant dense<0.000000e+00> : vector<1x6xf32>
    %253 = tpu.matmul %251, %252, %cst_165 {dimension_numbers = #tpu.dot_dimension_numbers<[1], [0], [0], [1], [0, 0, 1, 1], [], []>} : vector<1x64xf32>, vector<64x6xf32>, vector<1x6xf32> -> vector<1x6xf32>
    %c0_166 = arith.constant 0 : index
    %c0_167 = arith.constant 0 : index
    %254 = vector.load %arg12[%c0_166, %c0_167] : memref<1x6xf32, #tpu.memory_space<vmem>>, vector<1x6xf32>
    %255 = arith.addf %253, %254 : vector<1x6xf32>
    %c1_168 = arith.constant 1 : index
    %c0_169 = arith.constant 0 : index
    %256 = vector.load %arg13[%c1_168, %c0_169] : memref<2x6xf32, #tpu.memory_space<vmem>>, vector<1x6xf32>
    tpu.vector_store %arg13[%c1_168, %c0_169], %255 {strides = array<i32>} : memref<2x6xf32, #tpu.memory_space<vmem>>, vector<1x6xf32>,
    return
  }
}

</mosaic_0001>

<bundles_post_ra>
// kernel: pinball_dqn_forward.1
= control target key start
LH: loop header
LB: loop body
LE: loop exit
PB: predicated region body
PF: predicated region fallthrough
CT: control target
= control target key end

     0   :  { %s16126_s29 = smov 127   ;;  %v20122_v6 = vmov 0.0   ;;  %vm59_vm0 = vcmask 1044480   ;;  %vm55_vm1 = vcmask 39936   ;;  %vm16128_vm2 = vmmov 0   ;;  %s16133_s27 = smov 106   ;;  %s20101_s0 = inlined_call_operand.vmem [shape: f32[2,5], index: 0, kind: input, shape index: {}]   ;;  %s20102_s1 = inlined_call_operand.vmem [shape: f32[4,768], index: 1, kind: input, shape index: {}]   ;;  %s20103_s2 = inlined_call_operand.vmem [shape: f32[5,16], index: 2, kind: input, shape index: {}]   ;;  %s20104_s3 = inlined_call_operand.vmem [shape: f32[1,16], index: 3, kind: input, shape index: {}]   ;;  %s20105_s4 = inlined_call_operand.vmem [shape: f32[32,4], index: 4, kind: input, shape index: {}]   ;;  %s20106_s5 = inlined_call_operand.vmem [shape: f32[8,1], index: 5, kind: input, shape index: {}]   ;;  %s20107_s6 = inlined_call_operand.vmem [shape: f32[144,8], index: 6, kind: input, shape index: {}]   ;;  %s20108_s7 = inlined_call_operand.vmem [shape: f32[16,1], index: 7, kind: input, shape index: {}]   ;;  %s20109_s8 = inlined_call_operand.vmem [shape: f32[16,64], index: 8, kind: input, shape index: {}]   ;;  %s20110_s9 = inlined_call_operand.vmem [shape: bf16[5760,64], index: 9, kind: input, shape index: {}]   ;;  %s20111_s10 = inlined_call_operand.vmem [shape: f32[1,64], index: 10, kind: input, shape index: {}]   ;;  %s20112_s11 = inlined_call_operand.vmem [shape: f32[64,6], index: 11, kind: input, shape index: {}]   ;;  %s20113_s12 = inlined_call_operand.vmem [shape: f32[1,6], index: 12, kind: input, shape index: {}]   ;;  %s20114_s13 = inlined_call_operand.hbm [shape: f32[2,6], index: 13, kind: output, shape index: {}]  }
   0x1   :  { %v16212_v0 = vld [vmem:[%s20102_s1] sm:$0xff]  ;;  %v16217_v1 = vld [vmem:[%s20102_s1 + $0x8] sm:$0xff]  ;;  %v16235_v5 = vld [vmem:[%s20102_s1 + $0x10] sm:$0xff]  ;;  %14724 = vmatprep.subr.mxu0 %v20122_v6  ;;  %386 = vmatprep.mubr.f32.mxu1 %v20122_v6  ;;  %s16130_s1 = smov 107   ;;  %v16131_v9 = vmov 0   ;;  %vm157_vm3 = vcmask 1039360  }
   0x2   :  { %145 = vrot.lane.b32.xlu1 %v16212_v0, %s16126_s29  ;;  %v16223_v2 = vcombine.high %v16212_v0, %v16212_v0  ;;  %v16227_v3 = vcombine.high %v16217_v1, %v16217_v1  ;;  %v47_v4 = vld [vmem:[%s20103_s2] sm:$0x1f]  ;;  %14726 = vmatprep.mubr.msk.f32.mxu0 %vm16128_vm2, %v20122_v6  ;;  %v16250_v8 = vcombine.high %v16235_v5, %v16235_v5  ;;  %vm167_vm4 = vcmask 1043456   ;;  %v138_v14 = vld [vmem:[%s20105_s4 + $0x8] sm:$0xff]  ;;  %v621_v28 = vld [vmem:[%s20105_s4 + $0x10] sm:$0xff]  ;;  %s16134_s28 = smov 88  }
   0x3   :  { %v46_v7 = vld [vmem:[%s20101_s0] sm:$0x3]  ;;  %14725 = vmatpush3.msk.msra.mxu0 %vm59_vm0, %v47_v4  ;;  %s16129_s0 = smov 108   ;;  %15363 = vset.pattern.permute.xlu0 %v16131_v9  ;;  %vm163_vm5 = vcmask 31744   ;;  %vm643_vm6 = vcmask 883712   ;;  %vm905_vm7 = vcmask 875520  }
   0x4   :  { %147 = vrot.lane.b32.xlu0 %v16223_v2, %s16126_s29  ;;  %14727 = vmatmul.mubr.msk.f32.vlgmr.msra.gmra.mxu0 %vm55_vm1, %v46_v7  ;;  %v1145_v10 = vld [vmem:[%s20106_s5] sm:$0xff]  ;;  %v883_v40 = vld [vmem:[%s20105_s4 + $0x18] sm:$0xff]  ;;  %vm1168_vm8 = vcmask 654336   ;;  %vm1170_vm9 = vcmask 1048192   ;;  %s16136_s30 = smov 86   ;;  %vm1211_vm10 = vcmask 64512  }
   0x5   :  { %244 = vmatprep.mubr.f32.mxu0 %v20122_v6  ;;  %15364 = vset.pattern.permute.xlu1 %v16131_v9  ;;  %v134_v24 = vld [vmem:[%s20105_s4] sm:$0xff]  ;;  %s16132_s4 = smov 126   ;;  %vm1700_vm11 = vcmask 1031168  }
   0x6   :  { %151 = vrot.lane.b32.xlu1 %v16227_v3, %s16126_s29 }
   0x8   :  { %149 = vrot.lane.b32.xlu0 %v16217_v1, %s16126_s29 }
   0xa   :  { %155 = vrot.lane.b32.xlu1 %v16250_v8, %s16126_s29 }
   0xc   :  { %153 = vrot.lane.b32.xlu0 %v16235_v5, %s16126_s29 }
   0xe   :  { %635 = vrot.lane.b32.xlu1 %v16217_v1, %s16129_s0 }
  0x10   :  { %633 = vrot.lane.b32.xlu0 %v16223_v2, %s16129_s0 }
  0x12   :  { %637 = vrot.lane.b32.xlu1 %v16227_v3, %s16129_s0 }
  0x14   :  { %631 = vrot.lane.b32.xlu0 %v16212_v0, %s16129_s0 }
  0x16   :  { %641 = vrot.lane.b32.xlu1 %v16250_v8, %s16129_s0 }
  0x18   :  { %639 = vrot.lane.b32.xlu0 %v16235_v5, %s16129_s0 }
  0x1a   :  { %897 = vrot.lane.b32.xlu1 %v16217_v1, %s16130_s1 }
  0x1c   :  { %895 = vrot.lane.b32.xlu0 %v16223_v2, %s16130_s1 }
  0x1e   :  { %899 = vrot.lane.b32.xlu1 %v16227_v3, %s16130_s1 }
  0x20   :  { %893 = vrot.lane.b32.xlu0 %v16212_v0, %s16130_s1 }
  0x22   :  { %903 = vrot.lane.b32.xlu1 %v16250_v8, %s16130_s1 }
  0x24   :  { %901 = vrot.lane.b32.xlu0 %v16235_v5, %s16130_s1 }
  0x28   :  { %1148 = vperm.xlu0 %15363, %v1145_v10  }
  0x74   :  { %v146_v11 = vpop.permute.xlu1 %145 }
  0x76   :  { %v148_v12 = vpop.permute.xlu0 %147 }
  0x77   :  { %v158_v17 = vsel %vm157_vm3, %v146_v11, %v148_v12 }
  0x78   :  { %v152_v13 = vpop.permute.xlu1 %151 }
  0x7a   :  { %v150_v15 = vpop.permute.xlu0 %149 }
  0x7b   :  { %v159_v16 = vsel %vm157_vm3, %v148_v12, %v150_v15  ;;  %v160_v22 = vsel %vm157_vm3, %v150_v15, %v152_v13 }
  0x7c   :  { %12879 = vmatprep.subr.msk.mxu0 %vm167_vm4, %v159_v16  ;;  %v156_v18 = vpop.permute.xlu1 %155 }
  0x7d   :  { %12880 = vmatpush1.msk.msra.mxu0 %vm167_vm4, %v158_v17  ;;  %12885 = vmatprep.subr.msk.mxu1 %vm167_vm4, %v156_v18 }
  0x7e   :  { %v154_v19 = vpop.permute.xlu0 %153  ;;  %12881 = vmatmul.mubr.msk.f32.vlgmr.msra.gmra.mxu0 %vm163_vm5, %v138_v14 }
  0x7f   :  { %v161_v20 = vsel %vm157_vm3, %v152_v13, %v154_v19  ;;  %v162_v21 = vsel %vm157_vm3, %v154_v19, %v156_v18  ;;  %315 = vmatprep.mubr.f32.mxu0 %v20122_v6 }
  0x80   :  { %12882 = vmatprep.subr.msk.mxu0 %vm167_vm4, %v161_v20  ;;  %12886 = vmatpush1.msk.msra.mxu1 %vm167_vm4, %v162_v21  ;;  %v636_v23 = vpop.permute.xlu1 %635 }
  0x81   :  { %12883 = vmatpush1.msk.msra.mxu0 %vm167_vm4, %v160_v22  ;;  %12887 = vmatmul.mubr.msk.f32.vlgmr.msra.gmra.mxu1 %vm163_vm5, %v138_v14 }
  0x82   :  { %12891 = vmatprep.subr.msk.mxu1 %vm167_vm4, %v16227_v3  ;;  %v634_v25 = vpop.permute.xlu0 %633  ;;  %12884 = vmatmul.mubr.msk.f32.vlgmr.msra.gmra.mxu0 %vm163_vm5, %v138_v14 }
  0x83   :  { %12892 = vmatpush1.msk.msra.mxu1 %vm167_vm4, %v16217_v1  ;;  %12888 = vmatprep.subr.msk.mxu0 %vm167_vm4, %v16223_v2  ;;  %v645_v26 = vsel %vm643_vm6, %v634_v25, %v636_v23 }
  0x84   :  { %543 = vmatprep.mubr.f32.mxu1 %v20122_v6  ;;  %12897 = vmatprep.subr.msk.mxu1 %vm167_vm4, %v645_v26  ;;  %v638_v27 = vpop.permute.xlu1 %637 }
  0x85   :  { %12889 = vmatpush1.msk.msra.mxu0 %vm167_vm4, %v16212_v0  ;;  %472 = vmatprep.mubr.f32.mxu0 %v20122_v6  ;;  %v646_v35 = vsel %vm643_vm6, %v636_v23, %v638_v27 }
  0x86   :  { %12893 = vmatmul.mubr.msk.f32.vlgmr.msra.gmra.mxu1 %vm163_vm5, %v134_v24  ;;  %v632_v29 = vpop.permute.xlu0 %631  ;;  %12890 = vmatmul.mubr.msk.f32.vlgmr.msra.gmra.mxu0 %vm163_vm5, %v134_v24 }
  0x87   :  { %v644_v30 = vsel %vm643_vm6, %v632_v29, %v634_v25  ;;  %12894 = vmatprep.subr.msk.mxu0 %vm167_vm4, %v16250_v8  ;;  %728 = vmatprep.mubr.f32.mxu1 %v20122_v6 }
  0x88   :  { %12898 = vmatpush1.msk.msra.mxu1 %vm167_vm4, %v644_v30  ;;  %12895 = vmatpush1.msk.msra.mxu0 %vm167_vm4, %v16235_v5  ;;  %v642_v31 = vpop.permute.xlu1 %641 }
  0x89   :  { %614 = vmatprep.mubr.f32.mxu0 %v20122_v6  ;;  %12903 = vmatprep.subr.msk.mxu1 %vm167_vm4, %v642_v31 }
  0x8a   :  { %12899 = vmatmul.mubr.msk.f32.vlgmr.msra.gmra.mxu1 %vm163_vm5, %v621_v28  ;;  %v640_v32 = vpop.permute.xlu0 %639  ;;  %12896 = vmatmul.mubr.msk.f32.vlgmr.msra.gmra.mxu0 %vm163_vm5, %v134_v24 }
  0x8b   :  { %v648_v33 = vsel %vm643_vm6, %v640_v32, %v642_v31  ;;  %v647_v34 = vsel %vm643_vm6, %v638_v27, %v640_v32  ;;  %870 = vmatprep.mubr.f32.mxu1 %v20122_v6  ;;  %799 = vmatprep.mubr.f32.mxu0 %v20122_v6 }
  0x8c   :  { %12900 = vmatprep.subr.msk.mxu0 %vm167_vm4, %v647_v34  ;;  %12904 = vmatpush1.msk.msra.mxu1 %vm167_vm4, %v648_v33  ;;  %v898_v36 = vpop.permute.xlu1 %897 }
  0x8d   :  { %12901 = vmatpush1.msk.msra.mxu0 %vm167_vm4, %v646_v35 }
  0x8e   :  { %12905 = vmatmul.mubr.msk.f32.vlgmr.msra.gmra.mxu1 %vm163_vm5, %v621_v28  ;;  %v896_v37 = vpop.permute.xlu0 %895  ;;  %12902 = vmatmul.mubr.msk.f32.vlgmr.msra.gmra.mxu0 %vm163_vm5, %v621_v28 }
  0x8f   :  { %v907_v38 = vsel %vm905_vm7, %v896_v37, %v898_v36  ;;  %990 = vmatprep.mubr.f32.mxu0 %v20122_v6  ;;  %1061 = vmatprep.mubr.f32.mxu1 %v20122_v6 }
  0x90   :  { %12906 = vmatprep.subr.msk.mxu0 %vm167_vm4, %v907_v38  ;;  %v900_v39 = vpop.permute.xlu1 %899 }
  0x91   :  { %v908_v47 = vsel %vm905_vm7, %v898_v36, %v900_v39 }
  0x92   :  { %v894_v41 = vpop.permute.xlu0 %893 }
  0x93   :  { %v906_v42 = vsel %vm905_vm7, %v894_v41, %v896_v37 }
  0x94   :  { %12907 = vmatpush1.msk.msra.mxu0 %vm167_vm4, %v906_v42  ;;  %v904_v43 = vpop.permute.xlu1 %903 }
  0x95   :  { %12908 = vmatmul.mubr.msk.f32.vlgmr.msra.gmra.mxu0 %vm163_vm5, %v883_v40  ;;  %12912 = vmatprep.subr.msk.mxu0 %vm167_vm4, %v904_v43 }
  0x96   :  { %v902_v44 = vpop.permute.xlu0 %901  ;;  %1132 = vmatprep.mubr.f32.mxu0 %v20122_v6 }
  0x97   :  { %v910_v45 = vsel %vm905_vm7, %v902_v44, %v904_v43  ;;  %v909_v46 = vsel %vm905_vm7, %v900_v39, %v902_v44  ;;  %v3609_v43 = vld [vmem:[%s20108_s7] sm:$0xff]  ;;  %v3610_v44 = vld [vmem:[%s20108_s7 + $0x8] sm:$0xff] }
  0x98   :  { %12909 = vmatprep.subr.msk.mxu1 %vm167_vm4, %v909_v46  ;;  %12913 = vmatpush1.msk.msra.mxu0 %vm167_vm4, %v910_v45 }
  0x99   :  { %12910 = vmatpush1.msk.msra.mxu1 %vm167_vm4, %v908_v47  ;;  %12914 = vmatmul.mubr.msk.f32.vlgmr.msra.gmra.mxu0 %vm163_vm5, %v883_v40 }
  0x9a   :  { %12911 = vmatmul.mubr.msk.f32.vlgmr.msra.gmra.mxu1 %vm163_vm5, %v883_v40  ;;  %1359 = vmatprep.mubr.f32.mxu0 %v20122_v6 }
  0x9b   :  { %1282 = vmatprep.mubr.f32.mxu1 %v20122_v6 }
  0xa3   :  { %v1149_v10 = vpop.permute.xlu0 %1148 }
  0xc4   :  { %v16367_v48 = vpop.f32.mrf.mxu0 }
  0xc6   :  { %v14728_v49 = vpop.f32.mrf.mxu0 }
  0xc7   :  { %v1180_v49 = vld [vmem:[%s20107_s6 + $0x10] sm:$0xff] }
 0x13e   :  { %v246_v50 = vpop.f32.mrf.mxu0 }
 0x140   :  { %v248_v51 = vpop.f32.mrf.mxu0 }
 0x141   :  { %v388_v52 = vpop.f32.mrf.mxu1 }
 0x142   :  { %v317_v53 = vpop.f32.mrf.mxu0 }
 0x143   :  { %v390_v54 = vpop.f32.mrf.mxu1 }
 0x144   :  { %v319_v55 = vpop.f32.mrf.mxu0 }
 0x146   :  { %v545_v56 = vpop.f32.mrf.mxu1  ;;  %v474_v57 = vpop.f32.mrf.mxu0 }
 0x147   :  { %v475_v1 = vadd.f32 %v474_v57, %v246_v50  ;;  %v546_v8 = vadd.f32 %v545_v56, %v317_v53 }
 0x148   :  { %v547_v58 = vpop.f32.mrf.mxu1  ;;  %v476_v59 = vpop.f32.mrf.mxu0 }
 0x149   :  { %v477_v2 = vadd.f32 %v476_v59, %v248_v51  ;;  %v548_v19 = vadd.f32 %v547_v58, %v319_v55  ;;  %v1172_v59 = vld [vmem:[%s20107_s6] sm:$0xff] }
 0x14a   :  { %v616_v60 = vpop.f32.mrf.mxu0  ;;  %v730_v61 = vpop.f32.mrf.mxu1 }
 0x14b   :  { %v877_v5 = vadd.f32 %v730_v61, %v475_v1  ;;  %v617_v7 = vadd.f32 %v616_v60, %v388_v52 }
 0x14c   :  { %v618_v62 = vpop.f32.mrf.mxu0  ;;  %v732_v63 = vpop.f32.mrf.mxu1 }
 0x14d   :  { %v878_v11 = vadd.f32 %v732_v63, %v477_v2  ;;  %v619_v12 = vadd.f32 %v618_v62, %v390_v54  ;;  %v1181_v54 = vld [vmem:[%s20107_s6 + $0x18] sm:$0xff]  ;;  %v1173_v63 = vld [vmem:[%s20107_s6 + $0x8] sm:$0xff] }
 0x14e   :  { %v801_v0 = vpop.f32.mrf.mxu0  ;;  %v872_v3 = vpop.f32.mrf.mxu1 }
 0x14f   :  { %v881_v16 = vadd.f32 %v872_v3, %v617_v7  ;;  %v879_v20 = vadd.f32 %v801_v0, %v546_v8 }
 0x150   :  { %v803_v4 = vpop.f32.mrf.mxu0  ;;  %v874_v14 = vpop.f32.mrf.mxu1 }
 0x151   :  { %v882_v22 = vadd.f32 %v874_v14, %v619_v12  ;;  %v880_v27 = vadd.f32 %v803_v4, %v548_v19 }
 0x155   :  { %v992_v9 = vpop.f32.mrf.mxu0 }
 0x156   :  { %v1139_v13 = vadd.f32 %v992_v9, %v877_v5 }
 0x157   :  { %v994_v15 = vpop.f32.mrf.mxu0 }
 0x158   :  { %v1151_v17 = vadd.f32 %v1149_v10, %v1139_v13  ;;  %v1140_v18 = vadd.f32 %v994_v15, %v878_v11  ;;  %v1686_v11 = vld [vmem:[%s20107_s6 + $0x20] sm:$0xff] }
 0x159   :  { %v1134_v21 = vpop.f32.mrf.mxu0 }
 0x15a   :  { %v16369_v23 = vmax.f32 %v1151_v17, 0.0  ;;  %v1152_v24 = vadd.f32 %v1149_v10, %v1140_v18  ;;  %v1143_v25 = vadd.f32 %v1134_v21, %v881_v16  ;;  %v1063_v26 = vpop.f32.mrf.mxu1 }
 0x15b   :  { %v1141_v28 = vadd.f32 %v1063_v26, %v879_v20  ;;  %v1136_v29 = vpop.f32.mrf.mxu0 }
 0x15c   :  { %v16371_v30 = vmax.f32 %v1152_v24, 0.0  ;;  %v1155_v31 = vadd.f32 %v1149_v10, %v1143_v25  ;;  %v1144_v32 = vadd.f32 %v1136_v29, %v882_v22  ;;  %v1065_v33 = vpop.f32.mrf.mxu1 }
 0x15d   :  { %v1153_v34 = vadd.f32 %v1149_v10, %v1141_v28  ;;  %v1142_v35 = vadd.f32 %v1065_v33, %v880_v27 }
 0x15e   :  { %v16373_v36 = vmax.f32 %v1155_v31, 0.0  ;;  %v1156_v37 = vadd.f32 %v1149_v10, %v1144_v32 }
 0x15f   :  { %v16375_v38 = vmax.f32 %v1153_v34, 0.0  ;;  %v1154_v39 = vadd.f32 %v1149_v10, %v1142_v35 }
 0x160   :  { %v1162_v40 = vmax.f32 %v1156_v37, 0.0 }
 0x161   :  { %v16377_v41 = vmax.f32 %v1154_v39, 0.0  ;;  %1192 = vrot.lane.b32.xlu0 %v16375_v38, %s16126_s29 }
 0x162   :  { %1169 = vst.msk [vmem:[#allocation2 + $0x28] sm:$0xff] %vm1168_vm8, %v1162_v40 }
 0x163   :  { %1171 = vst.msk [vmem:[#allocation2 + $0x28] sm:$0xff] %vm1170_vm9, %v20122_v6  ;;  %1194 = vrot.lane.b32.xlu1 %v16377_v41, %s16126_s29 }
 0x165   :  { %1188 = vrot.lane.b32.xlu0 %v16369_v23, %s16126_s29 }
 0x167   :  { %1196 = vrot.lane.b32.xlu1 %v16373_v36, %s16126_s29 }
 0x169   :  { %1694 = vrot.lane.b32.xlu0 %v16377_v41, %s16132_s4 }
 0x16a   :  { %v16389_v42 = vld [vmem:[#allocation2 + $0x28] sm:$0xff] }
 0x16b   :  { %1190 = vrot.lane.b32.xlu1 %v16371_v30, %s16126_s29 }
 0x16d   :  { %1692 = vrot.lane.b32.xlu0 %v16375_v38, %s16132_s4 }
 0x16f   :  { %1198 = vrot.lane.b32.xlu1 %v16389_v42, %s16126_s29  ;;  %s16135_s29 = smov 87  }
 0x171   :  { %1688 = vrot.lane.b32.xlu0 %v16369_v23, %s16132_s4 }
 0x173   :  { %1696 = vrot.lane.b32.xlu1 %v16373_v36, %s16132_s4 }
 0x175   :  { %1967 = vrot.lane.b32.xlu0 %v16375_v38, %s16129_s0 }
 0x177   :  { %1690 = vrot.lane.b32.xlu1 %v16371_v30, %s16132_s4 }
 0x179   :  { %1698 = vrot.lane.b32.xlu0 %v16389_v42, %s16132_s4 }
 0x17b   :  { %1965 = vrot.lane.b32.xlu1 %v16371_v30, %s16129_s0 }
 0x17d   :  { %1973 = vrot.lane.b32.xlu0 %v16389_v42, %s16129_s0 }
 0x17f   :  { %1963 = vrot.lane.b32.xlu1 %v16369_v23, %s16129_s0 }
 0x181   :  { %2243 = vrot.lane.b32.xlu0 %v16377_v41, %s16130_s1 }
 0x183   :  { %1971 = vrot.lane.b32.xlu1 %v16373_v36, %s16129_s0 }
 0x185   :  { %2241 = vrot.lane.b32.xlu0 %v16375_v38, %s16130_s1 }
 0x187   :  { %1969 = vrot.lane.b32.xlu1 %v16377_v41, %s16129_s0 }
 0x189   :  { %2237 = vrot.lane.b32.xlu0 %v16369_v23, %s16130_s1 }
 0x18b   :  { %2245 = vrot.lane.b32.xlu1 %v16373_v36, %s16130_s1 }
 0x18d   :  { %2515 = vrot.lane.b32.xlu0 %v16375_v38, %s16133_s27 }
 0x18f   :  { %2239 = vrot.lane.b32.xlu1 %v16371_v30, %s16130_s1 }
 0x191   :  { %2247 = vrot.lane.b32.xlu0 %v16389_v42, %s16130_s1 }
 0x193   :  { %2513 = vrot.lane.b32.xlu1 %v16371_v30, %s16133_s27 }
 0x195   :  { %2521 = vrot.lane.b32.xlu0 %v16389_v42, %s16133_s27 }
 0x197   :  { %2511 = vrot.lane.b32.xlu1 %v16369_v23, %s16133_s27 }
 0x199   :  { %2792 = vrot.lane.b32.xlu0 %v16377_v41, %s16134_s28 }
 0x19b   :  { %2519 = vrot.lane.b32.xlu1 %v16373_v36, %s16133_s27 }
 0x19d   :  { %2790 = vrot.lane.b32.xlu0 %v16375_v38, %s16134_s28 }
 0x19f   :  { %2517 = vrot.lane.b32.xlu1 %v16377_v41, %s16133_s27 }
 0x1a1   :  { %2786 = vrot.lane.b32.xlu0 %v16369_v23, %s16134_s28 }
 0x1a3   :  { %2794 = vrot.lane.b32.xlu1 %v16373_v36, %s16134_s28 }
 0x1a5   :  { %3065 = vrot.lane.b32.xlu0 %v16375_v38, %s16135_s29 }
 0x1a7   :  { %2788 = vrot.lane.b32.xlu1 %v16371_v30, %s16134_s28 }
 0x1a9   :  { %2796 = vrot.lane.b32.xlu0 %v16389_v42, %s16134_s28 }
 0x1ab   :  { %3063 = vrot.lane.b32.xlu1 %v16371_v30, %s16135_s29 }
 0x1ad   :  { %3071 = vrot.lane.b32.xlu0 %v16389_v42, %s16135_s29 }
 0x1af   :  { %3061 = vrot.lane.b32.xlu1 %v16369_v23, %s16135_s29 }
 0x1b1   :  { %3342 = vrot.lane.b32.xlu0 %v16377_v41, %s16136_s30 }
 0x1b3   :  { %3069 = vrot.lane.b32.xlu1 %v16373_v36, %s16135_s29 }
 0x1b5   :  { %3340 = vrot.lane.b32.xlu0 %v16375_v38, %s16136_s30 }
 0x1b7   :  { %3067 = vrot.lane.b32.xlu1 %v16377_v41, %s16135_s29 }
 0x1b9   :  { %3336 = vrot.lane.b32.xlu0 %v16369_v23, %s16136_s30 }
 0x1bb   :  { %3344 = vrot.lane.b32.xlu1 %v16373_v36, %s16136_s30 }
 0x1bd   :  { %3613 = vperm.xlu0 %15363, %v3609_v43  }
 0x1bf   :  { %3338 = vrot.lane.b32.xlu1 %v16371_v30, %s16136_s30 }
 0x1c3   :  { %3346 = vrot.lane.b32.xlu1 %v16389_v42, %s16136_s30 }
 0x1c7   :  { %3618 = vperm.xlu1 %15364, %v3610_v44  }
 0x1d3   :  { %v1193_v45 = vpop.permute.xlu0 %1192 }
 0x1d5   :  { %v1195_v46 = vpop.permute.xlu1 %1194 }
 0x1d6   :  { %v1202_v53 = vsel %vm157_vm3, %v1193_v45, %v1195_v46 }
 0x1d7   :  { %v1189_v47 = vpop.permute.xlu0 %1188 }
 0x1d9   :  { %v1197_v50 = vpop.permute.xlu1 %1196 }
 0x1da   :  { %v1203_v51 = vsel %vm157_vm3, %v1195_v46, %v1197_v50 }
 0x1db   :  { %1325 = vmatprep.subr.mxu0 %v1203_v51  ;;  %v1695_v52 = vpop.permute.xlu0 %1694 }
 0x1dc   :  { %1326 = vmatpush1.msra.mxu0 %v1202_v53 }
 0x1dd   :  { %12917 = vmatmul.mubr.msk.f32.vlgmr.msra.gmra.mxu0 %vm1211_vm10, %v1180_v49  ;;  %v1191_v55 = vpop.permute.xlu1 %1190  ;;  %1485 = vmatprep.subr.mxu0 %v16371_v30 }
 0x1de   :  { %1486 = vmatpush1.msra.mxu0 %v16369_v23  ;;  %v1201_v56 = vsel %vm157_vm3, %v1191_v55, %v1193_v45  ;;  %v1200_v57 = vsel %vm157_vm3, %v1189_v47, %v1191_v55  ;;  %1365 = vmatprep.mubr.f32.mxu0 %v20122_v6 }
 0x1df   :  { %1248 = vmatprep.subr.mxu1 %v1201_v56  ;;  %v1693_v58 = vpop.permute.xlu0 %1692  ;;  %1639 = vmatprep.subr.mxu0 %v16389_v42 }
 0x1e0   :  { %1249 = vmatpush1.msra.mxu1 %v1200_v57  ;;  %v1703_v8 = vsel %vm1700_vm11, %v1693_v58, %v1695_v52 }
 0x1e1   :  { %12918 = vmatmul.mubr.msk.f32.gmra.mxu0 %vm1211_vm10, %v1181_v54  ;;  %v1199_v60 = vpop.permute.xlu1 %1198  ;;  %12915 = vmatmul.mubr.msk.f32.vlgmr.msra.gmra.mxu1 %vm1211_vm10, %v1180_v49 }
 0x1e2   :  { %1402 = vmatprep.subr.mxu1 %v1199_v60  ;;  %v1204_v61 = vsel %vm157_vm3, %v1197_v50, %v1199_v60  ;;  %1288 = vmatprep.mubr.f32.mxu1 %v20122_v6 }
 0x1e3   :  { %1403 = vmatpush1.msra.mxu1 %v1204_v61  ;;  %v1689_v62 = vpop.permute.xlu0 %1688  ;;  %1519 = vmatprep.mubr.f32.mxu0 %v20122_v6 }
 0x1e4   :  { %1562 = vmatprep.subr.mxu1 %v16377_v41 }
 0x1e5   :  { %v1697_v0 = vpop.permute.xlu1 %1696  ;;  %12916 = vmatmul.mubr.msk.f32.gmra.mxu1 %vm1211_vm10, %v1181_v54  ;;  %12921 = vmatmul.mubr.msk.f32.vlgmr.msra.gmra.mxu0 %vm1211_vm10, %v1172_v59 }
 0x1e6   :  { %1640 = vmatpush1.msra.mxu0 %v16373_v36  ;;  %v1704_v1 = vsel %vm1700_vm11, %v1695_v52, %v1697_v0  ;;  %1436 = vmatprep.mubr.f32.mxu1 %v20122_v6 }
 0x1e7   :  { %v16486_v2 = vpop.permute.xlu0 %1967  ;;  %1825 = vmatprep.subr.mxu0 %v1704_v1  ;;  %1525 = vmatprep.mubr.f32.mxu0 %v20122_v6 }
 0x1e9   :  { %v1691_v3 = vpop.permute.xlu1 %1690  ;;  %12919 = vmatmul.mubr.msk.f32.vlgmr.msra.gmra.mxu1 %vm1211_vm10, %v1180_v49  ;;  %12922 = vmatmul.mubr.msk.f32.gmra.mxu0 %vm1211_vm10, %v1173_v63 }
 0x1ea   :  { %1563 = vmatpush1.msra.mxu1 %v16375_v38  ;;  %v1702_v4 = vsel %vm1700_vm11, %v1691_v3, %v1693_v58  ;;  %1442 = vmatprep.mubr.f32.mxu1 %v20122_v6  ;;  %v1701_v13 = vsel %vm1700_vm11, %v1689_v62, %v1691_v3 }
 0x1eb   :  { %1748 = vmatprep.subr.mxu1 %v1702_v4  ;;  %v1699_v5 = vpop.permute.xlu0 %1698  ;;  %1673 = vmatprep.mubr.f32.mxu0 %v20122_v6 }
 0x1ed   :  { %v1966_v7 = vpop.permute.xlu1 %1965  ;;  %12920 = vmatmul.mubr.msk.f32.gmra.mxu1 %vm1211_vm10, %v1181_v54  ;;  %12925 = vmatmul.mubr.msk.f32.vlgmr.msra.gmra.mxu0 %vm1211_vm10, %v1172_v59 }
 0x1ee   :  { %1826 = vmatpush1.msra.mxu0 %v1703_v8  ;;  %v1976_v9 = vsel %vm643_vm6, %v1966_v7, %v16486_v2  ;;  %1596 = vmatprep.mubr.f32.mxu1 %v20122_v6 }
 0x1ef   :  { %v1974_v10 = vpop.permute.xlu0 %1973  ;;  %2022 = vmatprep.subr.mxu0 %v1976_v9  ;;  %1679 = vmatprep.mubr.f32.mxu0 %v20122_v6 }
 0x1f1   :  { %v1964_v12 = vpop.permute.xlu1 %1963  ;;  %12923 = vmatmul.mubr.msk.f32.vlgmr.msra.gmra.mxu1 %vm1211_vm10, %v1172_v59  ;;  %12926 = vmatmul.mubr.msk.f32.gmra.mxu0 %vm1211_vm10, %v1173_v63 }
 0x1f2   :  { %1749 = vmatpush1.msra.mxu1 %v1701_v13  ;;  %1602 = vmatprep.mubr.f32.mxu1 %v20122_v6 }
 0x1f3   :  { %v2244_v14 = vpop.permute.xlu0 %2243  ;;  %1859 = vmatprep.mubr.f32.mxu0 %v20122_v6  ;;  %1902 = vmatprep.subr.mxu1 %v1699_v5 }
 0x1f4   :  { %18 = vsyncpa [#allocation4], 0  ;;  %v1975_v15 = vsel %vm643_vm6, %v1964_v12, %v1966_v7  ;;  %v1687_v17 = vld [vmem:[%s20107_s6 + $0x28] sm:$0xff]  ;;  %v1705_v20 = vsel %vm1700_vm11, %v1697_v0, %v1699_v5  ;;  %v1961_v22 = vld [vmem:[%s20107_s6 + $0x30] sm:$0xff]  ;;  %vm2523_vm12 = vcmask 867328   ;;  %vm2798_vm13 = vcmask 719872  }
 0x1f5   :  { %v1972_v16 = vpop.permute.xlu1 %1971  ;;  %12924 = vmatmul.mubr.msk.f32.gmra.mxu1 %vm1211_vm10, %v1173_v63  ;;  %12929 = vmatmul.mubr.msk.f32.vlgmr.msra.gmra.mxu0 %vm1211_vm10, %v1686_v11  ;;  %v1962_v27 = vld [vmem:[%s20107_s6 + $0x38] sm:$0xff]  ;;  %v2235_v39 = vld [vmem:[%s20107_s6 + $0x40] sm:$0xff]  ;;  %v2236_v43 = vld [vmem:[%s20107_s6 + $0x48] sm:$0xff]  ;;  %vm3073_vm14 = vcmask 711680   ;;  %vm3348_vm15 = vcmask 703488   ;;  %vm3647_vm0 = vcmask 130048  }
 0x1f6   :  { %2023 = vmatpush1.msra.mxu0 %v1975_v15  ;;  %1782 = vmatprep.mubr.f32.mxu1 %v20122_v6  ;;  %v1979_v25 = vsel %vm643_vm6, %v1972_v16, %v1974_v10  ;;  %v2509_v49 = vld [vmem:[%s20107_s6 + $0x50] sm:$0xff]  ;;  %v2510_v54 = vld [vmem:[%s20107_s6 + $0x58] sm:$0xff]  ;;  %v2784_v1 = vld [vmem:[%s20107_s6 + $0x60] sm:$0xff]  ;;  %vm3904_vm1 = vcmask 850944   ;;  %s16137_s30 = smov 24   ;;  %vm8233_vm3 = vcmask 195584  }
 0x1f7   :  { %v2242_v18 = vpop.permute.xlu0 %2241  ;;  %1865 = vmatprep.mubr.f32.mxu0 %v20122_v6  ;;  %2176 = vmatprep.subr.mxu0 %v1974_v10  ;;  %v2785_v5 = vld [vmem:[%s20107_s6 + $0x68] sm:$0xff]  ;;  %v3059_v10 = vld [vmem:[%s20107_s6 + $0x70] sm:$0xff]  ;;  %v3060_v15 = vld [vmem:[%s20107_s6 + $0x78] sm:$0xff]  ;;  %vm8098_vm5 = vcmask 523264   ;;  %s16138_s7 = smov [#allocation3]  }
 0x1f8   :  { %v2251_v33 = vsel %vm905_vm7, %v2242_v18, %v2244_v14 }
 0x1f9   :  { %v1970_v19 = vpop.permute.xlu1 %1969  ;;  %12927 = vmatmul.mubr.msk.f32.vlgmr.msra.gmra.mxu1 %vm1211_vm10, %v1686_v11  ;;  %12930 = vmatmul.mubr.msk.f32.gmra.mxu0 %vm1211_vm10, %v1687_v17 }
 0x1fa   :  { %1903 = vmatpush1.msra.mxu1 %v1705_v20  ;;  %v1978_v21 = vsel %vm643_vm6, %v1970_v19, %v1972_v16  ;;  %1788 = vmatprep.mubr.f32.mxu1 %v20122_v6  ;;  %v1977_v29 = vsel %vm643_vm6, %v16486_v2, %v1970_v19  ;;  %vm8172_vm6 = vcmask 40960  }
 0x1fb   :  { %2099 = vmatprep.subr.mxu1 %v1978_v21  ;;  %v2238_v23 = vpop.permute.xlu0 %2237  ;;  %2056 = vmatprep.mubr.f32.mxu0 %v20122_v6 }
 0x1fd   :  { %v2246_v24 = vpop.permute.xlu1 %2245  ;;  %12928 = vmatmul.mubr.msk.f32.gmra.mxu1 %vm1211_vm10, %v1687_v17  ;;  %12933 = vmatmul.mubr.msk.f32.vlgmr.msra.gmra.mxu0 %vm1211_vm10, %v1961_v22 }
 0x1fe   :  { %2177 = vmatpush1.msra.mxu0 %v1979_v25  ;;  %v2252_v26 = vsel %vm905_vm7, %v2244_v14, %v2246_v24  ;;  %1936 = vmatprep.mubr.f32.mxu1 %v20122_v6  ;;  %v12876_v25 = vld [vmem:[%s20104_s3] ss:$0 sm:$0xff] }
 0x1ff   :  { %v16535_v28 = vpop.permute.xlu0 %2515  ;;  %2373 = vmatprep.subr.mxu0 %v2252_v26  ;;  %2062 = vmatprep.mubr.f32.mxu0 %v20122_v6  ;;  %v3646_v26 = vld [vmem:[%s20109_s8 + $0x8] sm:$0xff] }
 0x201   :  { %v2240_v30 = vpop.permute.xlu1 %2239  ;;  %12931 = vmatmul.mubr.msk.f32.vlgmr.msra.gmra.mxu1 %vm1211_vm10, %v1686_v11  ;;  %12934 = vmatmul.mubr.msk.f32.gmra.mxu0 %vm1211_vm10, %v1962_v27 }
 0x202   :  { %2100 = vmatpush1.msra.mxu1 %v1977_v29  ;;  %v2250_v31 = vsel %vm905_vm7, %v2240_v30, %v2242_v18  ;;  %1942 = vmatprep.mubr.f32.mxu1 %v20122_v6  ;;  %v2249_v37 = vsel %vm905_vm7, %v2238_v23, %v2240_v30  ;;  %v3645_v29 = vld [vmem:[%s20109_s8] sm:$0xff] }
 0x203   :  { %2296 = vmatprep.subr.mxu1 %v2250_v31  ;;  %v2248_v32 = vpop.permute.xlu0 %2247  ;;  %2210 = vmatprep.mubr.f32.mxu0 %v20122_v6 }
 0x204   :  { %v2253_v45 = vsel %vm905_vm7, %v2246_v24, %v2248_v32  ;;  %v3334_v24 = vld [vmem:[%s20107_s6 + $0x80] sm:$0xff] }
 0x205   :  { %v2514_v34 = vpop.permute.xlu1 %2513  ;;  %12932 = vmatmul.mubr.msk.f32.gmra.mxu1 %vm1211_vm10, %v1687_v17  ;;  %12937 = vmatmul.mubr.msk.f32.vlgmr.msra.gmra.mxu0 %vm1211_vm10, %v1961_v22 }
 0x206   :  { %2374 = vmatpush1.msra.mxu0 %v2251_v33  ;;  %v2525_v35 = vsel %vm2523_vm12, %v2514_v34, %v16535_v28  ;;  %2133 = vmatprep.mubr.f32.mxu1 %v20122_v6  ;;  %v15369_v33 = vld [vmem:[%s20110_s9 + $0x78] sm:$0xff]  }
 0x207   :  { %v2522_v36 = vpop.permute.xlu0 %2521  ;;  %2571 = vmatprep.subr.mxu0 %v2525_v35  ;;  %2216 = vmatprep.mubr.f32.mxu0 %v20122_v6  ;;  %v15371_v35 = vld [vmem:[%s20110_s9 + $0xa8] sm:$0xff]  }
 0x209   :  { %v2512_v38 = vpop.permute.xlu1 %2511  ;;  %12935 = vmatmul.mubr.msk.f32.vlgmr.msra.gmra.mxu1 %vm1211_vm10, %v1961_v22  ;;  %12938 = vmatmul.mubr.msk.f32.gmra.mxu0 %vm1211_vm10, %v1962_v27 }
 0x20a   :  { %2297 = vmatpush1.msra.mxu1 %v2249_v37  ;;  %2139 = vmatprep.mubr.f32.mxu1 %v20122_v6  ;;  %v2524_v41 = vsel %vm2523_vm12, %v2512_v38, %v2514_v34  ;;  %v15370_v34 = vld [vmem:[%s20110_s9 + $0x38] sm:$0xff]   ;;  %v15373_v37 = vld [vmem:[%s20110_s9 + $0x30] sm:$0xff]   ;;  %v15374_v38 = vld [vmem:[%s20110_s9 + $0xa0] sm:$0xff]  }
 0x20b   :  { %v2793_v40 = vpop.permute.xlu0 %2792  ;;  %2407 = vmatprep.mubr.f32.mxu0 %v20122_v6  ;;  %2450 = vmatprep.subr.mxu1 %v2248_v32 }
 0x20d   :  { %v2520_v42 = vpop.permute.xlu1 %2519  ;;  %12936 = vmatmul.mubr.msk.f32.gmra.mxu1 %vm1211_vm10, %v1962_v27  ;;  %12941 = vmatmul.mubr.msk.f32.vlgmr.msra.gmra.mxu0 %vm1211_vm10, %v2235_v39  ;;  %v3335_v27 = vld [vmem:[%s20107_s6 + $0x88] sm:$0xff] }
 0x20e   :  { %2572 = vmatpush1.msra.mxu0 %v2524_v41  ;;  %2330 = vmatprep.mubr.f32.mxu1 %v20122_v6  ;;  %v2528_v51 = vsel %vm2523_vm12, %v2520_v42, %v2522_v36  ;;  %v15377_v41 = vld [vmem:[%s20110_s9 + $0x98] sm:$0xff]  }
 0x20f   :  { %v2791_v44 = vpop.permute.xlu0 %2790  ;;  %2413 = vmatprep.mubr.f32.mxu0 %v20122_v6  ;;  %2725 = vmatprep.subr.mxu0 %v2522_v36  ;;  %v15372_v36 = vld [vmem:[%s20110_s9 + $0x70] sm:$0xff]  }
 0x210   :  { %v2801_v59 = vsel %vm2798_vm13, %v2791_v44, %v2793_v40 }
 0x211   :  { %v2518_v46 = vpop.permute.xlu1 %2517  ;;  %12939 = vmatmul.mubr.msk.f32.vlgmr.msra.gmra.mxu1 %vm1211_vm10, %v2235_v39  ;;  %12942 = vmatmul.mubr.msk.f32.gmra.mxu0 %vm1211_vm10, %v2236_v43 }
 0x212   :  { %2451 = vmatpush1.msra.mxu1 %v2253_v45  ;;  %v2527_v47 = vsel %vm2523_vm12, %v2518_v46, %v2520_v42  ;;  %2336 = vmatprep.mubr.f32.mxu1 %v20122_v6  ;;  %v2526_v55 = vsel %vm2523_vm12, %v16535_v28, %v2518_v46  ;;  %v130_v28 = vadd.f32 %v12876_v25, %v16367_v48  ;;  %v15368_v48 = vld [vmem:[%s20110_s9 + $0xb0] ss:$0 sps:$4 sm:$0xff]   ;;  %v15378_v42 = vld [vmem:[%s20110_s9 + $0x60] sm:$0xff]   ;;  %v15381_v45 = vld [vmem:[%s20110_s9 + $0x58] sm:$0xff]  }
 0x213   :  { %2648 = vmatprep.subr.mxu1 %v2527_v47  ;;  %v2787_v50 = vpop.permute.xlu0 %2786  ;;  %2605 = vmatprep.mubr.f32.mxu0 %v20122_v6  ;;  %v3909_v32 = vsel %vm167_vm4, %v15368_v48, 0  ;;  %v15382_v46 = vld [vmem:[%s20110_s9 + $0x18] sm:$0xff]   ;;  %v15383_v47 = vld [vmem:[%s20110_s9 + $0x88] sm:$0xff]  }
 0x214   :  { %v133_v31 = vmax.f32 %v130_v28, 0.0 }
 0x215   :  { %v2795_v52 = vpop.permute.xlu1 %2794  ;;  %12940 = vmatmul.mubr.msk.f32.gmra.mxu1 %vm1211_vm10, %v2236_v43  ;;  %12945 = vmatmul.mubr.msk.f32.vlgmr.msra.gmra.mxu0 %vm1211_vm10, %v2509_v49 }
 0x216   :  { %2726 = vmatpush1.msra.mxu0 %v2528_v51  ;;  %v2802_v53 = vsel %vm2798_vm13, %v2793_v40, %v2795_v52  ;;  %2484 = vmatprep.mubr.f32.mxu1 %v20122_v6  ;;  %v15376_v40 = vld [vmem:[%s20110_s9 + $0x28] sm:$0xff]   ;;  %v15386_v51 = vld [vmem:[%s20110_s9 + $0x80] sm:$0xff]  }
 0x217   :  { %2923 = vmatprep.subr.mxu0 %v2802_v53  ;;  %2611 = vmatprep.mubr.f32.mxu0 %v20122_v6  ;;  %v16588_v56 = vpop.permute.xlu0 %3065  ;;  %v15388_v53 = vld [vmem:[%s20110_s9 + $0x8] sm:$0xff]  }
 0x219   :  { %v2789_v57 = vpop.permute.xlu1 %2788  ;;  %12943 = vmatmul.mubr.msk.f32.vlgmr.msra.gmra.mxu1 %vm1211_vm10, %v2235_v39  ;;  %12946 = vmatmul.mubr.msk.f32.gmra.mxu0 %vm1211_vm10, %v2510_v54  ;;  %v15375_v39 = vld [vmem:[%s20110_s9 + $0x68] sm:$0xff]  }
 0x21a   :  { %2649 = vmatpush1.msra.mxu1 %v2526_v55  ;;  %v2800_v58 = vsel %vm2798_vm13, %v2789_v57, %v2791_v44  ;;  %2490 = vmatprep.mubr.f32.mxu1 %v20122_v6  ;;  %v2799_v63 = vsel %vm2798_vm13, %v2787_v50, %v2789_v57  ;;  %v15380_v44 = vld [vmem:[%s20110_s9 + $0x90] sm:$0xff]   ;;  %v15391_v55 = vld [vmem:[%s20110_s9 + $0x40] sm:$0xff]  }
 0x21b   :  { %2846 = vmatprep.subr.mxu1 %v2800_v58  ;;  %2759 = vmatprep.mubr.f32.mxu0 %v20122_v6  ;;  %v2797_v62 = vpop.permute.xlu0 %2796  ;;  %v15385_v50 = vld [vmem:[%s20110_s9 + $0x10] sm:$0xff]  }
 0x21c   :  { %v2803_v7 = vsel %vm2798_vm13, %v2795_v52, %v2797_v62  ;;  %v15387_v52 = vld [vmem:[%s20110_s9 + $0x48] sm:$0xff]  }
 0x21d   :  { %v3064_v60 = vpop.permute.xlu1 %3063  ;;  %12944 = vmatmul.mubr.msk.f32.gmra.mxu1 %vm1211_vm10, %v2236_v43  ;;  %12949 = vmatmul.mubr.msk.f32.vlgmr.msra.gmra.mxu0 %vm1211_vm10, %v2509_v49  ;;  %v15379_v43 = vld [vmem:[%s20110_s9 + $0x20] sm:$0xff]  }
 0x21e   :  { %2924 = vmatpush1.msra.mxu0 %v2801_v59  ;;  %v3075_v61 = vsel %vm3073_vm14, %v3064_v60, %v16588_v56  ;;  %2682 = vmatprep.mubr.f32.mxu1 %v20122_v6 }
 0x21f   :  { %3121 = vmatprep.subr.mxu0 %v3075_v61  ;;  %2765 = vmatprep.mubr.f32.mxu0 %v20122_v6  ;;  %v3072_v2 = vpop.permute.xlu0 %3071 }
 0x221   :  { %v3062_v0 = vpop.permute.xlu1 %3061  ;;  %12947 = vmatmul.mubr.msk.f32.vlgmr.msra.gmra.mxu1 %vm1211_vm10, %v2509_v49  ;;  %12950 = vmatmul.mubr.msk.f32.gmra.mxu0 %vm1211_vm10, %v2510_v54  ;;  %v15384_v49 = vld [vmem:[%s20110_s9 + $0x50] sm:$0xff]  }
 0x222   :  { %2847 = vmatpush1.msra.mxu1 %v2799_v63  ;;  %2688 = vmatprep.mubr.f32.mxu1 %v20122_v6  ;;  %v3074_v3 = vsel %vm3073_vm14, %v3062_v0, %v3064_v60 }
 0x223   :  { %2957 = vmatprep.mubr.f32.mxu0 %v20122_v6  ;;  %3000 = vmatprep.subr.mxu1 %v2797_v62  ;;  %v3343_v11 = vpop.permute.xlu0 %3342 }
 0x225   :  { %v3070_v4 = vpop.permute.xlu1 %3069  ;;  %12948 = vmatmul.mubr.msk.f32.gmra.mxu1 %vm1211_vm10, %v2510_v54  ;;  %12953 = vmatmul.mubr.msk.f32.vlgmr.msra.gmra.mxu0 %vm1211_vm10, %v2784_v1  ;;  %v15389_v54 = vld [vmem:[%s20110_s9 + $0x12c] sm:$0xff]  }
 0x226   :  { %3122 = vmatpush1.msra.mxu0 %v3074_v3  ;;  %2880 = vmatprep.mubr.f32.mxu1 %v20122_v6  ;;  %v3078_v12 = vsel %vm3073_vm14, %v3070_v4, %v3072_v2 }
 0x227   :  { %2963 = vmatprep.mubr.f32.mxu0 %v20122_v6  ;;  %3275 = vmatprep.subr.mxu0 %v3072_v2  ;;  %v3341_v16 = vpop.permute.xlu0 %3340 }
 0x228   :  { %v3351_v20 = vsel %vm3348_vm15, %v3341_v16, %v3343_v11 }
 0x229   :  { %v3068_v8 = vpop.permute.xlu1 %3067  ;;  %12951 = vmatmul.mubr.msk.f32.vlgmr.msra.gmra.mxu1 %vm1211_vm10, %v2784_v1  ;;  %12954 = vmatmul.mubr.msk.f32.gmra.mxu0 %vm1211_vm10, %v2785_v5 }
 0x22a   :  { %3001 = vmatpush1.msra.mxu1 %v2803_v7  ;;  %v3077_v9 = vsel %vm3073_vm14, %v3068_v8, %v3070_v4  ;;  %2886 = vmatprep.mubr.f32.mxu1 %v20122_v6  ;;  %v3076_v17 = vsel %vm3073_vm14, %v16588_v56, %v3068_v8  ;;  %v15392_v56 = vld [vmem:[%s20110_s9] sm:$0xff]  }
 0x22b   :  { %3198 = vmatprep.subr.mxu1 %v3077_v9  ;;  %3155 = vmatprep.mubr.f32.mxu0 %v20122_v6  ;;  %v3337_v21 = vpop.permute.xlu0 %3336 }
 0x22d   :  { %v3345_v13 = vpop.permute.xlu1 %3344  ;;  %12952 = vmatmul.mubr.msk.f32.gmra.mxu1 %vm1211_vm10, %v2785_v5  ;;  %12957 = vmatmul.mubr.msk.f32.vlgmr.msra.gmra.mxu0 %vm1211_vm10, %v3059_v10 }
 0x22e   :  { %3276 = vmatpush1.msra.mxu0 %v3078_v12  ;;  %v3352_v14 = vsel %vm3348_vm15, %v3343_v11, %v3345_v13  ;;  %3034 = vmatprep.mubr.f32.mxu1 %v20122_v6 }
 0x22f   :  { %3473 = vmatprep.subr.mxu0 %v3352_v14  ;;  %3161 = vmatprep.mubr.f32.mxu0 %v20122_v6 }
 0x231   :  { %v3339_v18 = vpop.permute.xlu1 %3338  ;;  %12955 = vmatmul.mubr.msk.f32.vlgmr.msra.gmra.mxu1 %vm1211_vm10, %v2784_v1  ;;  %12958 = vmatmul.mubr.msk.f32.gmra.mxu0 %vm1211_vm10, %v3060_v15 }
 0x232   :  { %3199 = vmatpush1.msra.mxu1 %v3076_v17  ;;  %v3350_v19 = vsel %vm3348_vm15, %v3339_v18, %v3341_v16  ;;  %3040 = vmatprep.mubr.f32.mxu1 %v20122_v6  ;;  %v3349_v22 = vsel %vm3348_vm15, %v3337_v21, %v3339_v18 }
 0x233   :  { %3396 = vmatprep.subr.mxu1 %v3350_v19  ;;  %3309 = vmatprep.mubr.f32.mxu0 %v20122_v6 }
 0x235   :  { %12956 = vmatmul.mubr.msk.f32.gmra.mxu1 %vm1211_vm10, %v2785_v5  ;;  %12961 = vmatmul.mubr.msk.f32.vlgmr.msra.gmra.mxu0 %vm1211_vm10, %v3059_v10  ;;  %v3347_v23 = vpop.permute.xlu1 %3346 }
 0x236   :  { %3474 = vmatpush1.msra.mxu0 %v3351_v20  ;;  %3232 = vmatprep.mubr.f32.mxu1 %v20122_v6  ;;  %v3353_v30 = vsel %vm3348_vm15, %v3345_v13, %v3347_v23 }
 0x237   :  { %3315 = vmatprep.mubr.f32.mxu0 %v20122_v6  ;;  %14729 = vmatprep.subr.mxu0 %v20122_v6 }
 0x239   :  { %12959 = vmatmul.mubr.msk.f32.vlgmr.msra.gmra.mxu1 %vm1211_vm10, %v3059_v10  ;;  %12962 = vmatmul.mubr.msk.f32.gmra.mxu0 %vm1211_vm10, %v3060_v15 }
 0x23a   :  { %3397 = vmatpush1.msra.mxu1 %v3349_v22  ;;  %3238 = vmatprep.mubr.f32.mxu1 %v20122_v6 }
 0x23b   :  { %3507 = vmatprep.mubr.f32.mxu0 %v20122_v6  ;;  %3550 = vmatprep.subr.mxu1 %v3347_v23 }
 0x23d   :  { %12960 = vmatmul.mubr.msk.f32.gmra.mxu1 %vm1211_vm10, %v3060_v15  ;;  %12965 = vmatmul.mubr.msk.f32.vlgmr.msra.gmra.mxu0 %vm1211_vm10, %v3334_v24 }
 0x23e   :  { %3430 = vmatprep.mubr.f32.mxu1 %v20122_v6  ;;  %3513 = vmatprep.mubr.f32.mxu0 %v20122_v6 }
 0x23f   :  { %14730 = vmatpush3.msra.mxu0 %v3646_v26 }
 0x240   :  { %14731 = vmatprep.subr.mxu0 %v20122_v6 }
 0x241   :  { %12963 = vmatmul.mubr.msk.f32.vlgmr.msra.gmra.mxu1 %vm1211_vm10, %v3334_v24  ;;  %12966 = vmatmul.mubr.msk.f32.gmra.mxu0 %vm1211_vm10, %v3335_v27 }
 0x242   :  { %3551 = vmatpush1.msra.mxu1 %v3353_v30  ;;  %3436 = vmatprep.mubr.f32.mxu1 %v20122_v6 }
 0x243   :  { %14732 = vmatpush3.msra.mxu0 %v3645_v29  ;;  %14733 = vmatprep.mubr.msk.f32.mxu0 %vm16128_vm2, %v20122_v6 }
 0x244   :  { %14736 = vmatprep.subr.bf16.mxu0 %v20122_v6  ;;  %13746 = vmatprep.subr.bf16.mxu1 %v15369_v33 }
 0x245   :  { %12964 = vmatmul.mubr.msk.f32.gmra.mxu1 %vm1211_vm10, %v3335_v27  ;;  %14734 = vmatmul.mubr.msk.f32.vlgmr.msra.gmra.mxu0 %vm3647_vm0, %v133_v31 }
 0x246   :  { %3584 = vmatprep.mubr.f32.mxu1 %v20122_v6  ;;  %14750 = vmatprep.mubr.msk.bf16.mxu0 %vm16128_vm2, %v20122_v6 }
 0x247   :  { %14737 = vmatpush3.bf16.msra.mxu0 %v3909_v32 }
 0x248   :  { %14738 = vmatprep.subr.bf16.mxu0 %v20122_v6 }
 0x249   :  { %12967 = vmatmul.mubr.msk.f32.vlgmr.msra.gmra.mxu1 %vm1211_vm10, %v3334_v24 }
 0x24a   :  { %3590 = vmatprep.mubr.f32.mxu1 %v20122_v6  ;;  %13747 = vmatpush3.bf16.msra.mxu1 %v15370_v34 }
 0x24b   :  { %14739 = vmatpush3.bf16.msra.mxu0 %v15371_v35  ;;  %13748 = vmatprep.subr.bf16.mxu1 %v15372_v36 }
 0x24c   :  { %14740 = vmatprep.subr.bf16.mxu0 %v20122_v6 }
 0x24d   :  { %12968 = vmatmul.mubr.msk.f32.gmra.mxu1 %vm1211_vm10, %v3335_v27 }
 0x24e   :  { %13749 = vmatpush3.bf16.msra.mxu1 %v15373_v37 }
 0x24f   :  { %14741 = vmatpush3.bf16.msra.mxu0 %v15374_v38  ;;  %13750 = vmatprep.subr.bf16.mxu1 %v15375_v39 }
 0x250   :  { %14742 = vmatprep.subr.bf16.mxu0 %v20122_v6 }
 0x252   :  { %13751 = vmatpush3.bf16.msra.mxu1 %v15376_v40 }
 0x253   :  { %14743 = vmatpush3.bf16.msra.mxu0 %v15377_v41  ;;  %13752 = vmatprep.subr.bf16.mxu1 %v15378_v42 }
 0x254   :  { %14744 = vmatprep.subr.bf16.mxu0 %v20122_v6 }
 0x256   :  { %13753 = vmatpush3.bf16.msra.mxu1 %v15379_v43 }
 0x257   :  { %14745 = vmatpush3.bf16.msra.mxu0 %v15380_v44  ;;  %13754 = vmatprep.subr.bf16.mxu1 %v15381_v45 }
 0x258   :  { %14746 = vmatprep.subr.bf16.mxu0 %v20122_v6 }
 0x25a   :  { %13755 = vmatpush3.bf16.msra.mxu1 %v15382_v46 }
 0x25b   :  { %14747 = vmatpush3.bf16.msra.mxu0 %v15383_v47  ;;  %13756 = vmatprep.subr.bf16.mxu1 %v15384_v49 }
 0x25c   :  { %14748 = vmatprep.subr.bf16.mxu0 %v20122_v6 }
 0x25e   :  { %13757 = vmatpush3.bf16.msra.mxu1 %v15385_v50 }
 0x25f   :  { %14749 = vmatpush3.bf16.msra.mxu0 %v15386_v51  ;;  %13758 = vmatprep.subr.bf16.mxu1 %v15387_v52 }
 0x260   :  { %13776 = vmatprep.subr.bf16.mxu0 %v15389_v54 }
 0x262   :  { %13759 = vmatpush3.bf16.msra.mxu1 %v15388_v53 }
 0x263   :  { %13760 = vmatprep.subr.bf16.mxu1 %v15391_v55 }
 0x266   :  { %13761 = vmatpush3.bf16.msra.mxu1 %v15392_v56 }
 0x267   :  { %14754 = vmatprep.subr.bf16.mxu1 %v20122_v6 }
 0x29d   :  { %v16769_v57 = vpop.f32.mrf.mxu0 }
 0x29f   :  { %v16771_v58 = vpop.f32.mrf.mxu0 }
 0x2a1   :  { %v1284_v59 = vpop.f32.mrf.mxu1  ;;  %v1367_v60 = vpop.f32.mrf.mxu0 }
 0x2a3   :  { %v16773_v61 = vpop.f32.mrf.mxu1  ;;  %v1369_v62 = vpop.f32.mrf.mxu0 }
 0x2a5   :  { %v1290_v63 = vpop.f32.mrf.mxu1  ;;  %v1521_v0 = vpop.f32.mrf.mxu0 }
 0x2a6   :  { %v1522_v1 = vadd.f32 %v1521_v0, %v1284_v59 }
 0x2a7   :  { %v1292_v2 = vpop.f32.mrf.mxu1  ;;  %v16775_v3 = vpop.f32.mrf.mxu0 }
 0x2a9   :  { %v1438_v4 = vpop.f32.mrf.mxu1  ;;  %v1527_v5 = vpop.f32.mrf.mxu0 }
 0x2aa   :  { %v1528_v7 = vadd.f32 %v1527_v5, %v1290_v63 }
 0x2ab   :  { %v16777_v8 = vpop.f32.mrf.mxu1  ;;  %v1529_v9 = vpop.f32.mrf.mxu0 }
 0x2ac   :  { %v1530_v34 = vadd.f32 %v1529_v9, %v1292_v2 }
 0x2ad   :  { %v1444_v10 = vpop.f32.mrf.mxu1  ;;  %v1675_v11 = vpop.f32.mrf.mxu0 }
 0x2ae   :  { %v16779_v12 = vadd.f32 %v1675_v11, %v1438_v4 }
 0x2af   :  { %v1446_v13 = vpop.f32.mrf.mxu1  ;;  %v16781_v14 = vpop.f32.mrf.mxu0 }
 0x2b1   :  { %v16783_v15 = vpop.f32.mrf.mxu1  ;;  %v1681_v16 = vpop.f32.mrf.mxu0 }
 0x2b2   :  { %v1682_v17 = vadd.f32 %v1681_v16, %v1444_v10 }
 0x2b3   :  { %v16785_v18 = vpop.f32.mrf.mxu1  ;;  %v1683_v19 = vpop.f32.mrf.mxu0 }
 0x2b4   :  { %v1684_v47 = vadd.f32 %v1683_v19, %v1446_v13 }
 0x2b5   :  { %v1604_v20 = vpop.f32.mrf.mxu1  ;;  %v16787_v21 = vpop.f32.mrf.mxu0 }
 0x2b6   :  { %v1605_v22 = vadd.f32 %v1604_v20, %v1367_v60 }
 0x2b7   :  { %v1606_v23 = vpop.f32.mrf.mxu1  ;;  %v16789_v24 = vpop.f32.mrf.mxu0 }
 0x2b8   :  { %v1607_v25 = vadd.f32 %v1606_v23, %v1369_v62 }
 0x2b9   :  { %v1784_v26 = vpop.f32.mrf.mxu1  ;;  %v1867_v27 = vpop.f32.mrf.mxu0 }
 0x2ba   :  { %v16791_v28 = vadd.f32 %v1784_v26, %v1522_v1  ;;  %v1957_v29 = vadd.f32 %v1867_v27, %v1605_v22 }
 0x2bb   :  { %v16793_v30 = vpop.f32.mrf.mxu1  ;;  %v1869_v31 = vpop.f32.mrf.mxu0 }
 0x2bc   :  { %v1958_v48 = vadd.f32 %v1869_v31, %v1607_v25 }
 0x2bd   :  { %v1790_v32 = vpop.f32.mrf.mxu1  ;;  %v16795_v33 = vpop.f32.mrf.mxu0 }
 0x2be   :  { %v1955_v35 = vadd.f32 %v1790_v32, %v1528_v7 }
 0x2bf   :  { %v1792_v36 = vpop.f32.mrf.mxu1  ;;  %v16797_v37 = vpop.f32.mrf.mxu0 }
 0x2c0   :  { %v1956_v38 = vadd.f32 %v1792_v36, %v1530_v34 }
 0x2c1   :  { %v16799_v39 = vpop.f32.mrf.mxu1  ;;  %v2064_v40 = vpop.f32.mrf.mxu0 }
 0x2c2   :  { %v2229_v41 = vadd.f32 %v2064_v40, %v1955_v35 }
 0x2c3   :  { %v16801_v42 = vpop.f32.mrf.mxu1  ;;  %v2066_v43 = vpop.f32.mrf.mxu0 }
 0x2c4   :  { %v2230_v44 = vadd.f32 %v2066_v43, %v1956_v38 }
 0x2c5   :  { %v1944_v45 = vpop.f32.mrf.mxu1  ;;  %v16803_v46 = vpop.f32.mrf.mxu0 }
 0x2c6   :  { %v1959_v49 = vadd.f32 %v1944_v45, %v1682_v17 }
 0x2c7   :  { %v1946_v50 = vpop.f32.mrf.mxu1  ;;  %v16805_v51 = vpop.f32.mrf.mxu0 }
 0x2c8   :  { %v1960_v52 = vadd.f32 %v1946_v50, %v1684_v47 }
 0x2c9   :  { %v16807_v53 = vpop.f32.mrf.mxu1  ;;  %v2218_v54 = vpop.f32.mrf.mxu0 }
 0x2ca   :  { %v2233_v55 = vadd.f32 %v2218_v54, %v1959_v49 }
 0x2cb   :  { %v16809_v56 = vpop.f32.mrf.mxu1  ;;  %v2220_v59 = vpop.f32.mrf.mxu0 }
 0x2cc   :  { %v2234_v60 = vadd.f32 %v2220_v59, %v1960_v52 }
 0x2cd   :  { %v2141_v62 = vpop.f32.mrf.mxu1  ;;  %v16811_v63 = vpop.f32.mrf.mxu0 }
 0x2ce   :  { %v2231_v0 = vadd.f32 %v2141_v62, %v1957_v29 }
 0x2cf   :  { %v2143_v1 = vpop.f32.mrf.mxu1  ;;  %v16813_v2 = vpop.f32.mrf.mxu0 }
 0x2d0   :  { %v2232_v4 = vadd.f32 %v2143_v1, %v1958_v48 }
 0x2d1   :  { %v16815_v5 = vpop.f32.mrf.mxu1  ;;  %v2415_v7 = vpop.f32.mrf.mxu0 }
 0x2d2   :  { %v2505_v9 = vadd.f32 %v2415_v7, %v2231_v0 }
 0x2d3   :  { %v16817_v10 = vpop.f32.mrf.mxu1  ;;  %v2417_v11 = vpop.f32.mrf.mxu0 }
 0x2d4   :  { %v2506_v13 = vadd.f32 %v2417_v11, %v2232_v4 }
 0x2d5   :  { %v2338_v16 = vpop.f32.mrf.mxu1  ;;  %v16819_v17 = vpop.f32.mrf.mxu0 }
 0x2d6   :  { %v2503_v19 = vadd.f32 %v2338_v16, %v2229_v41 }
 0x2d7   :  { %v2340_v20 = vpop.f32.mrf.mxu1  ;;  %v16821_v22 = vpop.f32.mrf.mxu0 }
 0x2d8   :  { %v2504_v23 = vadd.f32 %v2340_v20, %v2230_v44 }
 0x2d9   :  { %v16823_v25 = vpop.f32.mrf.mxu1  ;;  %v2613_v26 = vpop.f32.mrf.mxu0 }
 0x2da   :  { %v2778_v27 = vadd.f32 %v2613_v26, %v2503_v19 }
 0x2db   :  { %v16825_v29 = vpop.f32.mrf.mxu1  ;;  %v2615_v31 = vpop.f32.mrf.mxu0 }
 0x2dc   :  { %v2779_v48 = vadd.f32 %v2615_v31, %v2504_v23  ;;  %v1599_v31 = vadd.f32 %v16783_v15, %v16769_v57 }
 0x2dd   :  { %v2492_v32 = vpop.f32.mrf.mxu1  ;;  %v16827_v34 = vpop.f32.mrf.mxu0 }
 0x2de   :  { %v2507_v35 = vadd.f32 %v2492_v32, %v2233_v55 }
 0x2df   :  { %v2494_v36 = vpop.f32.mrf.mxu1  ;;  %v16829_v38 = vpop.f32.mrf.mxu0 }
 0x2e0   :  { %v2508_v40 = vadd.f32 %v2494_v36, %v2234_v60  ;;  %v1951_v36 = vadd.f32 %v16787_v21, %v1599_v31  ;;  %v1524_v21 = vadd.f32 %v16775_v3, %v16773_v61 }
 0x2e1   :  { %v2684_v41 = vpop.f32.mrf.mxu1  ;;  %v2767_v43 = vpop.f32.mrf.mxu0 }
 0x2e2   :  { %v2782_v45 = vadd.f32 %v2767_v43, %v2507_v35  ;;  %v1601_v35 = vadd.f32 %v16785_v18, %v16771_v58 }
 0x2e3   :  { %v2686_v44 = vpop.f32.mrf.mxu1  ;;  %v2769_v47 = vpop.f32.mrf.mxu0 }
 0x2e4   :  { %v2783_v49 = vadd.f32 %v2769_v47, %v2508_v40  ;;  %v1952_v47 = vadd.f32 %v16789_v24, %v1601_v35  ;;  %v2223_v24 = vadd.f32 %v16795_v33, %v16791_v28 }
 0x2e5   :  { %v2690_v50 = vpop.f32.mrf.mxu1  ;;  %v2959_v52 = vpop.f32.mrf.mxu0 }
 0x2e6   :  { %v2780_v54 = vadd.f32 %v2690_v50, %v2505_v9  ;;  %v2225_v50 = vadd.f32 %v16807_v53, %v1951_v36 }
 0x2e7   :  { %v2692_v59 = vpop.f32.mrf.mxu1  ;;  %v2961_v62 = vpop.f32.mrf.mxu0 }
 0x2e8   :  { %v2781_v0 = vadd.f32 %v2692_v59, %v2506_v13  ;;  %v2499_v58 = vadd.f32 %v16811_v63, %v2225_v50  ;;  %v2497_v63 = vadd.f32 %v16815_v5, %v2223_v24  ;;  %v1953_v5 = vadd.f32 %v16799_v39, %v16779_v12 }
 0x2e9   :  { %v2882_v1 = vpop.f32.mrf.mxu1  ;;  %v2965_v4 = vpop.f32.mrf.mxu0 }
 0x2ea   :  { %v3055_v7 = vadd.f32 %v2965_v4, %v2780_v54  ;;  %v2774_v4 = vadd.f32 %v2684_v41, %v2499_v58  ;;  %v2772_v28 = vadd.f32 %v16819_v17, %v2497_v63 }
 0x2eb   :  { %v16831_v55 = vpop.f32.mrf.mxu1  ;;  %v2967_v11 = vpop.f32.mrf.mxu0 }
 0x2ec   :  { %v3056_v16 = vadd.f32 %v2967_v11, %v2781_v0 }
 0x2ed   :  { %v2888_v60 = vpop.f32.mrf.mxu1  ;;  %v3157_v19 = vpop.f32.mrf.mxu0 }
 0x2ee   :  { %v3053_v20 = vadd.f32 %v2888_v60, %v2778_v27  ;;  %v1950_v60 = vadd.f32 %v16793_v30, %v1524_v21  ;;  %v1678_v30 = vadd.f32 %v16781_v14, %v16777_v8 }
 0x2ef   :  { %v2890_v23 = vpop.f32.mrf.mxu1  ;;  %v16833_v26 = vpop.f32.mrf.mxu0 }
 0x2f0   :  { %v3054_v9 = vadd.f32 %v2890_v23, %v2779_v48  ;;  %v2226_v48 = vadd.f32 %v16809_v56, %v1952_v47  ;;  %v3049_v23 = vadd.f32 %v2959_v52, %v2774_v4  ;;  %v2224_v61 = vadd.f32 %v16797_v37, %v1950_v60 }
 0x2f1   :  { %v16837_v32 = vpop.f32.mrf.mxu1  ;;  %v3163_v13 = vpop.f32.mrf.mxu0  ;;  %v3047_v37 = vadd.f32 %v2882_v1, %v2772_v28  ;;  %v15395_v28 = vld [vmem:[%s20110_s9 + $0x11c] sm:$0xff]  }
 0x2f2   :  { %v16842_v40 = vadd.f32 %v3163_v13, %v3053_v20  ;;  %v2500_v53 = vadd.f32 %v16813_v2, %v2226_v48  ;;  %v16874_v13 = vpop.permute.xlu0 %3613 }
 0x2f3   :  { %v16844_v43 = vpop.f32.mrf.mxu1  ;;  %v3165_v27 = vpop.f32.mrf.mxu0  ;;  %v3322_v50 = vadd.f32 %v3157_v19, %v3047_v37 }
 0x2f4   :  { %v16848_v54 = vadd.f32 %v3165_v27, %v3054_v9  ;;  %v2227_v27 = vadd.f32 %v16803_v46, %v1953_v5 }
 0x2f5   :  { %v3042_v57 = vpop.f32.mrf.mxu1  ;;  %v16850_v15 = vpop.f32.mrf.mxu0 }
 0x2f6   :  { %v3057_v18 = vadd.f32 %v3042_v57, %v2782_v45  ;;  %v2775_v45 = vadd.f32 %v2686_v44, %v2500_v53  ;;  %v2498_v44 = vadd.f32 %v16817_v10, %v2224_v61  ;;  %v2501_v1 = vadd.f32 %v16823_v25, %v2227_v27 }
 0x2f7   :  { %v3044_v59 = vpop.f32.mrf.mxu1  ;;  %v16856_v0 = vpop.f32.mrf.mxu0 }
 0x2f8   :  { %v3058_v11 = vadd.f32 %v3044_v59, %v2783_v49  ;;  %v3050_v33 = vadd.f32 %v2961_v62, %v2775_v45  ;;  %v1954_v62 = vadd.f32 %v16801_v42, %v1678_v30  ;;  %v2773_v47 = vadd.f32 %v16821_v22, %v2498_v44  ;;  %v15397_v44 = vld [vmem:[%s20110_s9 + $0xdc] sm:$0xff]  }
 0x2f9   :  { %v3234_v20 = vpop.f32.mrf.mxu1  ;;  %v3317_v56 = vpop.f32.mrf.mxu0  ;;  %v2776_v25 = vadd.f32 %v16827_v34, %v2501_v1  ;;  %v15404_v1 = vld [vmem:[%s20110_s9 + $0x104] sm:$0xff]  }
 0x2fa   :  { %v16863_v31 = vadd.f32 %v3317_v56, %v3057_v18  ;;  %v3324_v2 = vadd.f32 %v3234_v20, %v3049_v23  ;;  %v2228_v57 = vadd.f32 %v16805_v51, %v1954_v62  ;;  %v15390_v51 = vld [vmem:[%s20110_s9 + $0xec] sm:$0xff]  }
 0x2fb   :  { %v3236_v3 = vpop.f32.mrf.mxu1  ;;  %v3319_v9 = vpop.f32.mrf.mxu0  ;;  %v3051_v56 = vadd.f32 %v16837_v32, %v2776_v25  ;;  %v15411_v25 = vld [vmem:[%s20110_s9 + $0x13c] sm:$0xff]  }
 0x2fc   :  { %v16867_v41 = vadd.f32 %v3319_v9, %v3058_v11  ;;  %v3325_v35 = vadd.f32 %v3236_v3, %v3050_v33  ;;  %v2502_v19 = vadd.f32 %v16825_v29, %v2228_v57  ;;  %v15394_v3 = vld [vmem:[%s20110_s9 + $0xe4] sm:$0xff]  }
 0x2fd   :  { %v3240_v49 = vpop.f32.mrf.mxu1  ;;  %v3509_v52 = vpop.f32.mrf.mxu0  ;;  %v3326_v32 = vadd.f32 %v16850_v15, %v3051_v56  ;;  %v15396_v33 = vld [vmem:[%s20110_s9 + $0x164] ss:$0 sps:$4 sm:$0xff]  }
 0x2fe   :  { %v3330_v36 = vadd.f32 %v3240_v49, %v3055_v7  ;;  %v3599_v17 = vadd.f32 %v3509_v52, %v3324_v2  ;;  %v3048_v7 = vadd.f32 %v16831_v55, %v2773_v47  ;;  %v2777_v20 = vadd.f32 %v16829_v38, %v2502_v19  ;;  %v15399_v47 = vld [vmem:[%s20110_s9 + $0x15c] sm:$0xff]   ;;  %v15408_v19 = vld [vmem:[%s20110_s9 + $0x144] sm:$0xff]  }
 0x2ff   :  { %v3242_v8 = vpop.f32.mrf.mxu1  ;;  %v3511_v14 = vpop.f32.mrf.mxu0 }
 0x300   :  { %v3623_v12 = vadd.f32 %v16874_v13, %v3599_v17  ;;  %v3331_v39 = vadd.f32 %v3242_v8, %v3056_v16  ;;  %v3600_v10 = vadd.f32 %v3511_v14, %v3325_v35  ;;  %v3323_v21 = vadd.f32 %v16833_v26, %v3048_v7  ;;  %v15393_v26 = vld [vmem:[%s20110_s9 + $0x124] sm:$0xff]   ;;  %v15400_v8 = vld [vmem:[%s20110_s9 + $0xd4] sm:$0xff]  }
 0x301   :  { %v3432_v48 = vpop.f32.mrf.mxu1  ;;  %v3515_v58 = vpop.f32.mrf.mxu0  ;;  %v3052_v38 = vadd.f32 %v16844_v43, %v2777_v20 }
 0x302   :  { %v3635_v42 = vmax.f32 %v3623_v12, 0.0  ;;  %v3624_v46 = vadd.f32 %v16874_v13, %v3600_v10  ;;  %v3597_v18 = vadd.f32 %v3432_v48, %v3322_v50  ;;  %v16884_v22 = vadd.f32 %v3515_v58, %v3330_v36  ;;  %v15398_v36 = vld [vmem:[%s20110_s9 + $0x114] sm:$0xff]   ;;  %v15403_v10 = vld [vmem:[%s20110_s9 + $0xcc] sm:$0xff]   ;;  %v15406_v58 = vld [vmem:[%s20110_s9 + $0xc4] sm:$0xff]  }
 0x303   :  { %v3434_v16 = vpop.f32.mrf.mxu1  ;;  %v3517_v59 = vpop.f32.mrf.mxu0  ;;  %v3327_v15 = vadd.f32 %v16856_v0, %v3052_v38  ;;  %v4186_v0 = vsel %vm167_vm4, %v15396_v33, 0  ;;  %v15405_v48 = vld [vmem:[%s20110_s9 + $0x14c] sm:$0xff]  }
 0x304   :  { %v16892_v55 = vpack.c.bf16 %v3635_v42, %v3635_v42  ;;  %v3636_v24 = vmax.f32 %v3624_v46, 0.0  ;;  %v3621_v53 = vadd.f32 %v16874_v13, %v3597_v18  ;;  %v3598_v4 = vadd.f32 %v3434_v16, %v3323_v21  ;;  %v15407_v46 = vld [vmem:[%s20110_s9 + $0xfc] sm:$0xff]  }
 0x305   :  { %v16895_v11 = vadd.f32 %v3517_v59, %v3331_v39  ;;  %v3438_v29 = vpop.f32.mrf.mxu1  ;;  %v16897_v60 = vpop.f32.mrf.mxu0  ;;  %v15402_v39 = vld [vmem:[%s20110_s9 + $0x154] sm:$0xff]   ;;  %v15409_v21 = vld [vmem:[%s20110_s9 + $0xbc] sm:$0xff]  }
 0x306   :  { %20127 = vst [vmem:[#allocation6_spill] sm:$0xff] %v16897_v60  ;;  %v16904_v34 = vpack.c.bf16 %v3636_v24, %v3636_v24  ;;  %v16907_v63 = vadd.f32 %v3438_v29, %v16842_v40  ;;  %14751 = vmatmul.mubr.msk.bf16.vlgmr.msra.gmra.mxu0 %vm3904_vm1, %v16892_v55  ;;  %v3622_v45 = vadd.f32 %v16874_v13, %v3598_v4  ;;  %v3633_v9 = vmax.f32 %v3621_v53, 0.0  ;;  %v15410_v59 = vld [vmem:[%s20110_s9 + $0xf4] sm:$0xff]  }
 0x307   :  { %13777 = vmatpush3.bf16.msra.mxu0 %v15390_v51  ;;  %v3440_v23 = vpop.f32.mrf.mxu1  ;;  %v14735_v61 = vpop.f32.mrf.mxu0  ;;  %v16970_v12 = vshrl.u32 %v16892_v55, 16  ;;  %v4319_v18 = vrot.slane %v16892_v55, 1  ;;  %v15412_v24 = vld [vmem:[%s20110_s9 + $0xb4] sm:$0xff]  }
 0x308   :  { %v16918_v40 = vadd.f32 %v3440_v23, %v16848_v54  ;;  %8227 = vrot.lane.b32.xlu0 %v16904_v34, %s16137_s30  ;;  %v3634_v2 = vmax.f32 %v3622_v45, 0.0  ;;  %13778 = vmatprep.subr.bf16.mxu0 %v15393_v26  ;;  %v16934_v49 = vpack.c.bf16 %v3633_v9, %v3633_v9  ;;  %v16950_v27 = vshrl.u32 %v16904_v34, 16  ;;  %v15414_v4 = vld [vmem:[%s20110_s9 + $0x218] ss:$0 sps:$4 sm:$0xff]   ;;  %v15415_v23 = vld [vmem:[%s20110_s9 + $0x1e0] sm:$0xff]  }
 0x309   :  { %v3586_v43 = vpop.f32.mrf.mxu1  ;;  %v8801_v7 = vrot.slane %v16904_v34, 1  ;;  %v4591_v29 = vrot.slane %v16970_v12, 1  ;;  %v15413_v26 = vld [vmem:[%s20110_s9 + $0x134] sm:$0xff]   ;;  %v4461_v45 = vsel %vm167_vm4, %v15414_v4, 0  ;;  %v9373_v33 = vrot.slane %v16904_v34, 2 }
 0x30a   :  { %v3601_v30 = vadd.f32 %v3586_v43, %v3326_v32  ;;  %v16929_v54 = vpack.c.bf16 %v3634_v2, %v3634_v2  ;;  %v9087_v51 = vrot.slane %v16950_v27, 1  ;;  %v17049_v20 = vshrl.u32 %v16934_v49, 16  ;;  %v15417_v32 = vld [vmem:[%s20110_s9 + $0x210] sm:$0xff]   ;;  %v15419_v2 = vld [vmem:[%s20110_s9 + $0x198] sm:$0xff]  }
 0x30b   :  { %13779 = vmatpush3.bf16.msra.mxu0 %v15394_v3  ;;  %v3588_v5 = vpop.f32.mrf.mxu1  ;;  %v15416_v3 = vld [vmem:[%s20110_s9 + $0x1a0] sm:$0xff]  }
 0x30c   :  { %v3625_v52 = vadd.f32 %v16874_v13, %v3601_v30  ;;  %v3602_v37 = vadd.f32 %v3588_v5, %v3327_v15  ;;  %8225 = vrot.lane.b32.xlu0 %v16892_v55, %s16137_s30  ;;  %13780 = vmatprep.subr.bf16.mxu0 %v15395_v28  ;;  %v16942_v35 = vshrl.u32 %v16929_v54, 16  ;;  %v4318_v9 = vrot.slane %v16929_v54, 1  ;;  %v15418_v28 = vld [vmem:[%s20110_s9 + $0x1d8] sm:$0xff]   ;;  %v15420_v15 = vld [vmem:[%s20110_s9 + $0x208] sm:$0xff]   ;;  %v15421_v30 = vld [vmem:[%s20110_s9 + $0x1d0] sm:$0xff]  }
 0x30d   :  { %3943 = vmatprep.mubr.bf16.mxu1 %v16929_v54  ;;  %v9659_v5 = vrot.slane %v16950_v27, 2 }
 0x30e   :  { %v3637_v17 = vmax.f32 %v3625_v52, 0.0  ;;  %v3626_v62 = vadd.f32 %v16874_v13, %v3602_v37  ;;  %3944 = vmatmul.mubr.bf16.vlgmr.msra.gmra.mxu1 %v16934_v49  ;;  %4220 = vmatprep.mubr.bf16.mxu0 %v16942_v35  ;;  %v15401_v13 = vld [vmem:[%s20110_s9 + $0x10c] sm:$0xff]   ;;  %v15423_v37 = vld [vmem:[%s20110_s9 + $0x200] sm:$0xff]  }
 0x30f   :  { %14755 = vmatpush3.bf16.msra.mxu1 %v4186_v0  ;;  %13781 = vmatpush3.bf16.msra.mxu0 %v15397_v44  ;;  %v15422_v44 = vld [vmem:[%s20110_s9 + $0x190] sm:$0xff]   ;;  %v15424_v0 = vld [vmem:[%s20110_s9 + $0x1c8] sm:$0xff]  }
 0x310   :  { %v16958_v14 = vpack.c.bf16 %v3637_v17, %v3637_v17  ;;  %v3638_v50 = vmax.f32 %v3626_v62, 0.0  ;;  %8520 = vrot.lane.b32.xlu0 %v16950_v27, %s16137_s30  ;;  %14756 = vmatprep.subr.bf16.mxu1 %v20122_v6  ;;  %v15425_v17 = vld [vmem:[%s20110_s9 + $0x188] sm:$0xff]   ;;  %v4863_v62 = vrot.slane %v16892_v55, 2 }
 0x311   :  { %13782 = vmatprep.subr.bf16.mxu0 %v15398_v36  ;;  %14768 = vmatprep.mubr.msk.bf16.mxu1 %vm16128_vm2, %v20122_v6  ;;  %v5135_v36 = vrot.slane %v16970_v12, 2 }
 0x312   :  { %8229 = vrot.lane.b32.xlu1 %v16958_v14, %s16137_s30  ;;  %v16980_v57 = vpack.c.bf16 %v3638_v50, %v3638_v50  ;;  %v17000_v42 = vshrl.u32 %v16958_v14, 16  ;;  %v8802_v53 = vrot.slane %v16958_v14, 1  ;;  %v9374_v61 = vrot.slane %v16958_v14, 2 }
 0x313   :  { %14757 = vmatpush3.bf16.msra.mxu1 %v15399_v47  ;;  %13783 = vmatpush3.bf16.msra.mxu0 %v15400_v8  ;;  %v15426_v47 = vld [vmem:[%s20110_s9 + $0x1f8] sm:$0xff]   ;;  %v15427_v8 = vld [vmem:[%s20110_s9 + $0x1c0] sm:$0xff]   ;;  %v9946_v50 = vrot.slane %v16958_v14, 3 }
 0x314   :  { %8518 = vrot.lane.b32.xlu0 %v16970_v12, %s16137_s30  ;;  %14758 = vmatprep.subr.bf16.mxu1 %v20122_v6  ;;  %v17019_v16 = vshrl.u32 %v16980_v57, 16  ;;  %v8803_v56 = vrot.slane %v16980_v57, 1  ;;  %v9088_v38 = vrot.slane %v17000_v42, 1  ;;  %v9375_v52 = vrot.slane %v16980_v57, 2  ;;  %v15430_v14 = vld [vmem:[%s20110_s9 + $0x1b8] sm:$0xff]  }
 0x315   :  { %13784 = vmatprep.subr.bf16.mxu0 %v15401_v13  ;;  %v15428_v13 = vld [vmem:[%s20110_s9 + $0x180] sm:$0xff]  }
 0x316   :  { %8231 = vrot.lane.b32.xlu1 %v16980_v57, %s16137_s30  ;;  %v9089_v43 = vrot.slane %v17019_v16, 1 }
 0x317   :  { %14759 = vmatpush3.bf16.msra.mxu1 %v15402_v39  ;;  %13785 = vmatpush3.bf16.msra.mxu0 %v15403_v10  ;;  %v3592_v39 = vpop.f32.mrf.mxu1  ;;  %v9660_v10 = vrot.slane %v17000_v42, 2 }
 0x318   :  { %8806 = vrot.lane.b32.xlu0 %v8801_v7, %s16137_s30  ;;  %14760 = vmatprep.subr.bf16.mxu1 %v20122_v6  ;;  %v9945_v7 = vrot.slane %v16904_v34, 3  ;;  %v15435_v34 = vld [vmem:[%s20110_s9 + $0x294] sm:$0xff]  }
 0x319   :  { %13786 = vmatprep.subr.bf16.mxu0 %v15404_v1  ;;  %v15429_v1 = vld [vmem:[%s20110_s9 + $0x1f0] sm:$0xff]   ;;  %v3594_v4 = vpop.f32.mrf.mxu1 }
 0x31a   :  { %8522 = vrot.lane.b32.xlu1 %v17000_v42, %s16137_s30 }
 0x31b   :  { %14761 = vmatpush3.bf16.msra.mxu1 %v15405_v48  ;;  %13787 = vmatpush3.bf16.msra.mxu0 %v15406_v58  ;;  %v3607_v48 = vadd.f32 %v3592_v39, %v16863_v31  ;;  %v15431_v58 = vld [vmem:[%s20110_s9 + $0x178] sm:$0xff]   ;;  %v15433_v31 = vld [vmem:[%s20110_s9 + $0x1b0] sm:$0xff]  }
 0x31c   :  { %8804 = vrot.lane.b32.xlu0 %v4319_v18, %s16137_s30  ;;  %14762 = vmatprep.subr.bf16.mxu1 %v20122_v6  ;;  %v15450_v39 = vld [vmem:[%s20110_s9 + $0x26c] sm:$0xff]  }
 0x31d   :  { %13788 = vmatprep.subr.bf16.mxu0 %v15407_v46  ;;  %v9661_v46 = vrot.slane %v17019_v16, 2 }
 0x31e   :  { %8524 = vrot.lane.b32.xlu1 %v17019_v16, %s16137_s30 }
 0x31f   :  { %14763 = vmatpush3.bf16.msra.mxu1 %v15408_v19  ;;  %13789 = vmatpush3.bf16.msra.mxu0 %v15409_v21  ;;  %v15432_v19 = vld [vmem:[%s20110_s9 + $0x1e8] sm:$0xff]   ;;  %v17155_v21 = vpop.permute.xlu1 %3618 }
 0x320   :  { %9092 = vrot.lane.b32.xlu0 %v9087_v51, %s16137_s30  ;;  %14764 = vmatprep.subr.bf16.mxu1 %v20122_v6  ;;  %v3631_v51 = vadd.f32 %v17155_v21, %v3607_v48 }
 0x321   :  { %13790 = vmatprep.subr.bf16.mxu0 %v15410_v59  ;;  %v10231_v59 = vrot.slane %v16950_v27, 3  ;;  %v15437_v27 = vld [vmem:[%s20110_s9 + $0x1a8] sm:$0xff]  }
 0x322   :  { %8808 = vrot.lane.b32.xlu1 %v8802_v53, %s16137_s30  ;;  %v15436_v53 = vld [vmem:[%s20110_s9 + $0x254] sm:$0xff]  }
 0x323   :  { %14765 = vmatpush3.bf16.msra.mxu1 %v15411_v25  ;;  %13791 = vmatpush3.bf16.msra.mxu0 %v15412_v24  ;;  %v15434_v25 = vld [vmem:[%s20110_s9 + $0x170] sm:$0xff]   ;;  %v9947_v24 = vrot.slane %v16980_v57, 3  ;;  %v3630_v57 = vadd.f32 %v17155_v21, %v16895_v11 }
 0x324   :  { %9090 = vrot.lane.b32.xlu0 %v4591_v29, %s16137_s30  ;;  %14766 = vmatprep.subr.bf16.mxu1 %v20122_v6  ;;  %v15440_v11 = vld [vmem:[%s20110_s9 + $0x24c] sm:$0xff]  }
 0x325   :  { %14772 = vmatprep.subr.bf16.mxu0 %v20122_v6 }
 0x326   :  { %4221 = vmatmul.mubr.bf16.vlgmr.msra.gmra.mxu0 %v17049_v20  ;;  %8810 = vrot.lane.b32.xlu1 %v8803_v56, %s16137_s30  ;;  %v15439_v56 = vld [vmem:[%s20110_s9 + $0x28c] sm:$0xff]  }
 0x327   :  { %14767 = vmatpush3.bf16.msra.mxu1 %v15413_v26  ;;  %14773 = vmatpush3.bf16.msra.mxu0 %v4461_v45  ;;  %v4590_v26 = vrot.slane %v16942_v35, 1  ;;  %v3643_v45 = vmax.f32 %v3631_v51, 0.0 }
 0x328   :  { %9380 = vrot.lane.b32.xlu0 %v9374_v61, %s16137_s30  ;;  %13806 = vmatprep.subr.bf16.mxu1 %v15415_v23  ;;  %v20121_v23 = vrot.slane %v16970_v12, 3  ;;  %v15438_v61 = vld [vmem:[%s20110_s9 + $0x168] sm:$0xff]  }
 0x329   :  { %14774 = vmatprep.subr.bf16.mxu0 %v20122_v6  ;;  %14786 = vmatprep.mubr.msk.bf16.mxu0 %vm16128_vm2, %v20122_v6 }
 0x32a   :  { %14769 = vmatmul.mubr.msk.bf16.vlgmr.msra.gmra.mxu1 %vm3904_vm1, %v16970_v12  ;;  %9094 = vrot.lane.b32.xlu1 %v9088_v38, %s16137_s30  ;;  %v5407_v38 = vrot.slane %v16892_v55, 3  ;;  %v15534_v55 = vld [vmem:[%s20110_s9 + $0x59c] ss:$0 sps:$4 sm:$0xff]  }
 0x32b   :  { %13807 = vmatpush3.bf16.msra.mxu1 %v15416_v3  ;;  %4495 = vmatprep.mubr.bf16.mxu1 %v4318_v9  ;;  %v3608_v3 = vadd.f32 %v3594_v4, %v16867_v41  ;;  %v15441_v41 = vld [vmem:[%s20110_s9 + $0x284] sm:$0xff]   ;;  %v3642_v9 = vmax.f32 %v3630_v57, 0.0  ;;  %v15459_v4 = vld [vmem:[%s20110_s9 + $0x29c] sm:$0xff]  }
 0x32c   :  { %14775 = vmatpush3.bf16.msra.mxu0 %v15417_v32  ;;  %9378 = vrot.lane.b32.xlu0 %v9373_v33, %s16137_s30  ;;  %v3629_v32 = vadd.f32 %v17155_v21, %v16884_v22  ;;  %v15444_v22 = vld [vmem:[%s20110_s9 + $0x27c] sm:$0xff]  }
 0x32d   :  { %13808 = vmatprep.subr.bf16.mxu1 %v15418_v28  ;;  %14776 = vmatprep.subr.bf16.mxu0 %v20122_v6  ;;  %v17204_v28 = vpack.c.bf16 %v3643_v45, %v3643_v45  ;;  %v3632_v33 = vadd.f32 %v17155_v21, %v3608_v3 }
 0x32e   :  { %9096 = vrot.lane.b32.xlu1 %v9089_v43, %s16137_s30 }
 0x32f   :  { %13809 = vmatpush3.bf16.msra.mxu1 %v15419_v2  ;;  %v4317_v2 = vrot.slane %v16934_v49, 1  ;;  %v11099_v48 = vrot.slane %v17204_v28, 1 }
 0x330   :  { %14777 = vmatpush3.bf16.msra.mxu0 %v15420_v15  ;;  %9664 = vrot.lane.b32.xlu0 %v9659_v5, %s16137_s30  ;;  %v10232_v15 = vrot.slane %v17000_v42, 3  ;;  %v3641_v5 = vmax.f32 %v3629_v32, 0.0  ;;  %v15445_v42 = vld [vmem:[%s20110_s9 + $0x2c4] sm:$0xff]   ;;  %v11671_v32 = vrot.slane %v17204_v28, 2 }
 0x331   :  { %13810 = vmatprep.subr.bf16.mxu1 %v15421_v30  ;;  %14778 = vmatprep.subr.bf16.mxu0 %v20122_v6  ;;  %v15443_v30 = vld [vmem:[%s20110_s9 + $0x244] sm:$0xff]  }
 0x332   :  { %9382 = vrot.lane.b32.xlu1 %v9375_v52, %s16137_s30  ;;  %v3644_v52 = vmax.f32 %v3632_v33, 0.0 }
 0x333   :  { %13811 = vmatpush3.bf16.msra.mxu1 %v15422_v44  ;;  %v17220_v44 = vpack.c.bf16 %v3642_v9, %v3642_v9  ;;  %v15465_v9 = vld [vmem:[%s20110_s9 + $0x300] sm:$0xff]  }
 0x334   :  { %14779 = vmatpush3.bf16.msra.mxu0 %v15423_v37  ;;  %9662 = vrot.lane.b32.xlu0 %v5135_v36, %s16137_s30  ;;  %v10233_v37 = vrot.slane %v17019_v16, 3  ;;  %v15448_v16 = vld [vmem:[%s20110_s9 + $0x2bc] sm:$0xff]  }
 0x335   :  { %13812 = vmatprep.subr.bf16.mxu1 %v15424_v0  ;;  %14780 = vmatprep.subr.bf16.mxu0 %v20122_v6  ;;  %v15446_v0 = vld [vmem:[%s20110_s9 + $0x23c] sm:$0xff]  }
 0x336   :  { %9376 = vrot.lane.b32.xlu1 %v4863_v62, %s16137_s30 }
 0x337   :  { %13813 = vmatpush3.bf16.msra.mxu1 %v15425_v17  ;;  %v15447_v17 = vld [vmem:[%s20110_s9 + $0x274] sm:$0xff]  }
 0x338   :  { %14781 = vmatpush3.bf16.msra.mxu0 %v15426_v47  ;;  %9952 = vrot.lane.b32.xlu0 %v9946_v50, %s16137_s30  ;;  %v17238_v47 = vpack.c.bf16 %v3641_v5, %v3641_v5  ;;  %v17246_v50 = vpack.c.bf16 %v3644_v52, %v3644_v52  ;;  %v15470_v5 = vld [vmem:[%s20110_s9 + $0x330] sm:$0xff]  }
 0x339   :  { %13814 = vmatprep.subr.bf16.mxu1 %v15427_v8  ;;  %14782 = vmatprep.subr.bf16.mxu0 %v20122_v6  ;;  %v17241_v8 = vshrl.u32 %v17220_v44, 16  ;;  %v15471_v52 = vld [vmem:[%s20110_s9 + $0x2f0] sm:$0xff]  }
 0x33a   :  { %9666 = vrot.lane.b32.xlu1 %v9660_v10, %s16137_s30  ;;  %v17260_v10 = vshrl.u32 %v17238_v47, 16  ;;  %v17299_v51 = vshrl.u32 %v17246_v50, 16  ;;  %v20120_v3 = vrot.slane %v17238_v47, 1 }
 0x33b   :  { %13815 = vmatpush3.bf16.msra.mxu1 %v15428_v13  ;;  %v15449_v13 = vld [vmem:[%s20110_s9 + $0x234] sm:$0xff]  }
 0x33c   :  { %14783 = vmatpush3.bf16.msra.mxu0 %v15429_v1  ;;  %9950 = vrot.lane.b32.xlu0 %v9945_v7, %s16137_s30  ;;  %v15451_v1 = vld [vmem:[%s20110_s9 + $0x2b4] sm:$0xff]   ;;  %v15453_v7 = vld [vmem:[%s20110_s9 + $0x264] sm:$0xff]   ;;  %v20119_v45 = vrot.slane %v17260_v10, 1 }
 0x33d   :  { %13816 = vmatprep.subr.bf16.mxu1 %v15430_v14  ;;  %14784 = vmatprep.subr.bf16.mxu0 %v20122_v6  ;;  %v15452_v14 = vld [vmem:[%s20110_s9 + $0x22c] sm:$0xff]  }
 0x33e   :  { %9668 = vrot.lane.b32.xlu1 %v9661_v46, %s16137_s30  ;;  %v17282_v46 = vshrl.u32 %v17204_v28, 16 }
 0x33f   :  { %13817 = vmatpush3.bf16.msra.mxu1 %v15431_v58  ;;  %v15454_v58 = vld [vmem:[%s20110_s9 + $0x2ac] sm:$0xff]  }
 0x340   :  { %14785 = vmatpush3.bf16.msra.mxu0 %v15432_v19  ;;  %10236 = vrot.lane.b32.xlu0 %v10231_v59, %s16137_s30  ;;  %v15455_v19 = vld [vmem:[%s20110_s9 + $0x224] sm:$0xff]   ;;  %v11385_v33 = vrot.slane %v17282_v46, 1 }
 0x341   :  { %13818 = vmatprep.subr.bf16.mxu1 %v15433_v31  ;;  %13836 = vmatprep.subr.bf16.mxu0 %v15435_v34  ;;  %v15456_v31 = vld [vmem:[%s20110_s9 + $0x25c] sm:$0xff]   ;;  %v11098_v34 = vrot.slane %v17220_v44, 1  ;;  %v15457_v59 = vld [vmem:[%s20110_s9 + $0x2a4] sm:$0xff]  }
 0x342   :  { %9954 = vrot.lane.b32.xlu1 %v9947_v24, %s16137_s30  ;;  %v15460_v24 = vld [vmem:[%s20110_s9 + $0x380] ss:$0 sps:$4 sm:$0xff]  }
 0x343   :  { %13819 = vmatpush3.bf16.msra.mxu1 %v15434_v25  ;;  %14787 = vmatmul.mubr.msk.bf16.vlgmr.msra.gmra.mxu0 %vm3904_vm1, %v4319_v18  ;;  %v15442_v18 = vld [vmem:[%s20110_s9 + $0x2cc] ss:$0 sps:$4 sm:$0xff]   ;;  %v15458_v25 = vld [vmem:[%s20110_s9 + $0x21c] sm:$0xff]   ;;  %v5005_v57 = vsel %vm167_vm4, %v15460_v24, 0  ;;  %v11958_v24 = vrot.slane %v17299_v51, 2 }
 0x344   :  { %13837 = vmatpush3.bf16.msra.mxu0 %v15436_v53  ;;  %4767 = vmatprep.mubr.bf16.mxu0 %v4590_v26  ;;  %v4733_v43 = vsel %vm167_vm4, %v15442_v18, 0  ;;  %v11384_v53 = vrot.slane %v17241_v8, 1  ;;  %v15461_v26 = vld [vmem:[%s20110_s9 + $0x348] sm:$0xff]   ;;  %v15464_v18 = vld [vmem:[%s20110_s9 + $0x340] sm:$0xff]  }
 0x345   :  { %10234 = vrot.lane.b32.xlu0 %v20121_v23, %s16137_s30  ;;  %13820 = vmatprep.subr.bf16.mxu1 %v15437_v27  ;;  %v11100_v27 = vrot.slane %v17246_v50, 1 }
 0x346   :  { %13838 = vmatprep.subr.bf16.mxu0 %v15439_v56  ;;  %9948 = vrot.lane.b32.xlu1 %v5407_v38, %s16137_s30  ;;  %v4589_v56 = vrot.slane %v17049_v20, 1 }
 0x347   :  { %13821 = vmatpush3.bf16.msra.mxu1 %v15438_v61  ;;  %v15462_v61 = vld [vmem:[%s20110_s9 + $0x308] sm:$0xff]  }
 0x348   :  { %13839 = vmatpush3.bf16.msra.mxu0 %v15440_v11  ;;  %14790 = vmatprep.subr.bf16.mxu1 %v20122_v6  ;;  %v15463_v11 = vld [vmem:[%s20110_s9 + $0x378] sm:$0xff]  }
 0x349   :  { %10527 = vrot.lane.b32.xlu0 %v17204_v28, %s16137_s30  ;;  %13840 = vmatprep.subr.bf16.mxu0 %v15441_v41  ;;  %v4862_v41 = vrot.slane %v16929_v54, 2 }
 0x34a   :  { %4496 = vmatmul.mubr.bf16.vlgmr.msra.gmra.mxu1 %v4317_v2  ;;  %10238 = vrot.lane.b32.xlu1 %v10232_v15, %s16137_s30  ;;  %v15467_v2 = vld [vmem:[%s20110_s9 + $0x338] sm:$0xff]  }
 0x34b   :  { %14791 = vmatpush3.bf16.msra.mxu1 %v4733_v43  ;;  %14804 = vmatprep.mubr.msk.bf16.mxu1 %vm16128_vm2, %v20122_v6  ;;  %v11670_v43 = vrot.slane %v17220_v44, 2  ;;  %v15468_v15 = vld [vmem:[%s20110_s9 + $0x2f8] sm:$0xff]  }
 0x34c   :  { %13841 = vmatpush3.bf16.msra.mxu0 %v15443_v30  ;;  %14792 = vmatprep.subr.bf16.mxu1 %v20122_v6  ;;  %v11386_v30 = vrot.slane %v17299_v51, 1 }
 0x34d   :  { %10525 = vrot.lane.b32.xlu0 %v17220_v44, %s16137_s30  ;;  %13842 = vmatprep.subr.bf16.mxu0 %v15444_v22  ;;  %v15469_v22 = vld [vmem:[%s20110_s9 + $0x368] sm:$0xff]  }
 0x34e   :  { %10240 = vrot.lane.b32.xlu1 %v10233_v37, %s16137_s30  ;;  %v11672_v37 = vrot.slane %v17246_v50, 2 }
 0x34f   :  { %14793 = vmatpush3.bf16.msra.mxu1 %v15445_v42  ;;  %v11956_v42 = vrot.slane %v17241_v8, 2 }
 0x350   :  { %13843 = vmatpush3.bf16.msra.mxu0 %v15446_v0  ;;  %14794 = vmatprep.subr.bf16.mxu1 %v20122_v6  ;;  %v15472_v0 = vld [vmem:[%s20110_s9 + $0x360] sm:$0xff]  }
 0x351   :  { %10817 = vrot.lane.b32.xlu0 %v17241_v8, %s16137_s30  ;;  %13844 = vmatprep.subr.bf16.mxu0 %v15447_v17  ;;  %v15473_v17 = vld [vmem:[%s20110_s9 + $0x328] sm:$0xff]  }
 0x352   :  { %10529 = vrot.lane.b32.xlu1 %v17246_v50, %s16137_s30 }
 0x353   :  { %14795 = vmatpush3.bf16.msra.mxu1 %v15448_v16  ;;  %v20117_v16 = vrot.slane %v17260_v10, 2 }
 0x354   :  { %13845 = vmatpush3.bf16.msra.mxu0 %v15449_v13  ;;  %14796 = vmatprep.subr.bf16.mxu1 %v20122_v6  ;;  %v15474_v13 = vld [vmem:[%s20110_s9 + $0x2e8] sm:$0xff]  }
 0x355   :  { %10815 = vrot.lane.b32.xlu0 %v17260_v10, %s16137_s30  ;;  %13846 = vmatprep.subr.bf16.mxu0 %v15450_v39  ;;  %v20118_v39 = vrot.slane %v17238_v47, 2 }
 0x356   :  { %10523 = vrot.lane.b32.xlu1 %v17238_v47, %s16137_s30 }
 0x357   :  { %14797 = vmatpush3.bf16.msra.mxu1 %v15451_v1  ;;  %v15475_v1 = vld [vmem:[%s20110_s9 + $0x358] sm:$0xff]  }
 0x358   :  { %13847 = vmatpush3.bf16.msra.mxu0 %v15452_v14  ;;  %14798 = vmatprep.subr.bf16.mxu1 %v20122_v6  ;;  %v15476_v14 = vld [vmem:[%s20110_s9 + $0x320] sm:$0xff]  }
 0x359   :  { %11105 = vrot.lane.b32.xlu0 %v11099_v48, %s16137_s30  ;;  %13848 = vmatprep.subr.bf16.mxu0 %v15453_v7  ;;  %v12243_v7 = vrot.slane %v17204_v28, 3  ;;  %v15477_v48 = vld [vmem:[%s20110_s9 + $0x2e0] sm:$0xff]  }
 0x35a   :  { %10819 = vrot.lane.b32.xlu1 %v17282_v46, %s16137_s30  ;;  %v15481_v28 = vld [vmem:[%s20110_s9 + $0x3fc] sm:$0xff]  }
 0x35b   :  { %14799 = vmatpush3.bf16.msra.mxu1 %v15454_v58  ;;  %v11957_v58 = vrot.slane %v17282_v46, 2 }
 0x35c   :  { %13849 = vmatpush3.bf16.msra.mxu0 %v15455_v19  ;;  %14800 = vmatprep.subr.bf16.mxu1 %v20122_v6  ;;  %v15478_v19 = vld [vmem:[%s20110_s9 + $0x350] sm:$0xff]  }
 0x35d   :  { %11103 = vrot.lane.b32.xlu0 %v11098_v34, %s16137_s30  ;;  %13850 = vmatprep.subr.bf16.mxu0 %v15456_v31  ;;  %v15479_v31 = vld [vmem:[%s20110_s9 + $0x318] sm:$0xff]  }
 0x35e   :  { %10821 = vrot.lane.b32.xlu1 %v17299_v51, %s16137_s30 }
 0x35f   :  { %14801 = vmatpush3.bf16.msra.mxu1 %v15457_v59  ;;  %v12242_v59 = vrot.slane %v17220_v44, 3 }
 0x360   :  { %13851 = vmatpush3.bf16.msra.mxu0 %v15458_v25  ;;  %14802 = vmatprep.subr.bf16.mxu1 %v20122_v6  ;;  %v15480_v25 = vld [vmem:[%s20110_s9 + $0x2d8] sm:$0xff]  }
 0x361   :  { %11389 = vrot.lane.b32.xlu0 %v11384_v53, %s16137_s30  ;;  %14808 = vmatprep.subr.bf16.mxu0 %v20122_v6  ;;  %v15482_v53 = vld [vmem:[%s20110_s9 + $0x3bc] sm:$0xff]  }
 0x362   :  { %11107 = vrot.lane.b32.xlu1 %v11100_v27, %s16137_s30  ;;  %v5134_v27 = vrot.slane %v16942_v35, 2 }
 0x363   :  { %4768 = vmatmul.mubr.bf16.vlgmr.msra.gmra.mxu0 %v4589_v56  ;;  %14803 = vmatpush3.bf16.msra.mxu1 %v15459_v4  ;;  %v15483_v4 = vld [vmem:[%s20110_s9 + $0x310] sm:$0xff]   ;;  %v12528_v56 = vrot.slane %v17241_v8, 3 }
 0x364   :  { %14809 = vmatpush3.bf16.msra.mxu0 %v5005_v57  ;;  %13866 = vmatprep.subr.bf16.mxu1 %v15461_v26  ;;  %v15485_v26 = vld [vmem:[%s20110_s9 + $0x3f4] sm:$0xff]  }
 0x365   :  { %11387 = vrot.lane.b32.xlu0 %v20119_v45, %s16137_s30  ;;  %14810 = vmatprep.subr.bf16.mxu0 %v20122_v6  ;;  %v15484_v57 = vld [vmem:[%s20110_s9 + $0x2d0] sm:$0xff]  }
 0x366   :  { %14805 = vmatmul.mubr.msk.bf16.vlgmr.msra.gmra.mxu1 %vm3904_vm1, %v4591_v29  ;;  %11101 = vrot.lane.b32.xlu1 %v20120_v3, %s16137_s30  ;;  %v15466_v29 = vld [vmem:[%s20110_s9 + $0x370] sm:$0xff]  }
 0x367   :  { %13867 = vmatpush3.bf16.msra.mxu1 %v15462_v61  ;;  %5039 = vmatprep.mubr.bf16.mxu1 %v4862_v41  ;;  %v12244_v61 = vrot.slane %v17246_v50, 3  ;;  %v20115_v50 = vrot.slane %v17260_v10, 3 }
 0x368   :  { %14811 = vmatpush3.bf16.msra.mxu0 %v15463_v11  ;;  %13868 = vmatprep.subr.bf16.mxu1 %v15464_v18  ;;  %v15486_v11 = vld [vmem:[%s20110_s9 + $0x3b4] sm:$0xff]  }
 0x369   :  { %11677 = vrot.lane.b32.xlu0 %v11671_v32, %s16137_s30  ;;  %14812 = vmatprep.subr.bf16.mxu0 %v20122_v6  ;;  %v15488_v18 = vld [vmem:[%s20110_s9 + $0x434] ss:$0 sps:$4 sm:$0xff]   ;;  %v4861_v32 = vrot.slane %v16934_v49, 2 }
 0x36a   :  { %11391 = vrot.lane.b32.xlu1 %v11385_v33, %s16137_s30  ;;  %14822 = vmatprep.mubr.msk.bf16.mxu0 %vm16128_vm2, %v20122_v6  ;;  %v20116_v33 = vrot.slane %v17238_v47, 3 }
 0x36b   :  { %13869 = vmatpush3.bf16.msra.mxu1 %v15465_v9  ;;  %v5277_v9 = vsel %vm167_vm4, %v15488_v18, 0 }
 0x36c   :  { %14813 = vmatpush3.bf16.msra.mxu0 %v15466_v29  ;;  %13870 = vmatprep.subr.bf16.mxu1 %v15467_v2  ;;  %v15489_v29 = vld [vmem:[%s20110_s9 + $0x3ac] sm:$0xff]   ;;  %v15490_v2 = vld [vmem:[%s20110_s9 + $0x3e4] sm:$0xff]  }
 0x36d   :  { %11675 = vrot.lane.b32.xlu0 %v11670_v43, %s16137_s30  ;;  %14814 = vmatprep.subr.bf16.mxu0 %v20122_v6 }
 0x36e   :  { %11393 = vrot.lane.b32.xlu1 %v11386_v30, %s16137_s30 }
 0x36f   :  { %13871 = vmatpush3.bf16.msra.mxu1 %v15468_v15  ;;  %v15491_v15 = vld [vmem:[%s20110_s9 + $0x42c] sm:$0xff]  }
 0x370   :  { %14815 = vmatpush3.bf16.msra.mxu0 %v15469_v22  ;;  %13872 = vmatprep.subr.bf16.mxu1 %v15470_v5  ;;  %v12529_v22 = vrot.slane %v17282_v46, 3  ;;  %v15492_v5 = vld [vmem:[%s20110_s9 + $0x3a4] sm:$0xff]  }
 0x371   :  { %11961 = vrot.lane.b32.xlu0 %v11956_v42, %s16137_s30  ;;  %14816 = vmatprep.subr.bf16.mxu0 %v20122_v6  ;;  %v15494_v46 = vld [vmem:[%s20110_s9 + $0x424] sm:$0xff]  }
 0x372   :  { %11679 = vrot.lane.b32.xlu1 %v11672_v37, %s16137_s30 }
 0x373   :  { %13873 = vmatpush3.bf16.msra.mxu1 %v15471_v52  ;;  %v15493_v52 = vld [vmem:[%s20110_s9 + $0x3dc] sm:$0xff]  }
 0x374   :  { %14817 = vmatpush3.bf16.msra.mxu0 %v15472_v0  ;;  %13874 = vmatprep.subr.bf16.mxu1 %v15473_v17  ;;  %v12530_v17 = vrot.slane %v17299_v51, 3 }
 0x375   :  { %11959 = vrot.lane.b32.xlu0 %v20117_v16, %s16137_s30  ;;  %14818 = vmatprep.subr.bf16.mxu0 %v20122_v6 }
 0x376   :  { %11673 = vrot.lane.b32.xlu1 %v20118_v39, %s16137_s30 }
 0x377   :  { %13875 = vmatpush3.bf16.msra.mxu1 %v15474_v13  ;;  %v15495_v13 = vld [vmem:[%s20110_s9 + $0x39c] sm:$0xff]  }
 0x378   :  { %14819 = vmatpush3.bf16.msra.mxu0 %v15475_v1  ;;  %13876 = vmatprep.subr.bf16.mxu1 %v15476_v14  ;;  %v15496_v1 = vld [vmem:[%s20110_s9 + $0x3d4] sm:$0xff]  }
 0x379   :  { %12249 = vrot.lane.b32.xlu0 %v12243_v7, %s16137_s30  ;;  %14820 = vmatprep.subr.bf16.mxu0 %v20122_v6  ;;  %v15497_v7 = vld [vmem:[%s20110_s9 + $0x41c] sm:$0xff]  }
 0x37a   :  { %v17424_v34 = vpop.permute.xlu0 %8227  ;;  %11963 = vrot.lane.b32.xlu1 %v11957_v58, %s16137_s30 }
 0x37b   :  { %13877 = vmatpush3.bf16.msra.mxu1 %v15477_v48  ;;  %v15498_v48 = vld [vmem:[%s20110_s9 + $0x394] sm:$0xff]  }
 0x37c   :  { %14821 = vmatpush3.bf16.msra.mxu0 %v15478_v19  ;;  %13878 = vmatprep.subr.bf16.mxu1 %v15479_v31  ;;  %v15499_v19 = vld [vmem:[%s20110_s9 + $0x3cc] sm:$0xff]  }
 0x37d   :  { %12247 = vrot.lane.b32.xlu0 %v12242_v59, %s16137_s30  ;;  %13896 = vmatprep.subr.bf16.mxu0 %v15481_v28  ;;  %v15500_v28 = vld [vmem:[%s20110_s9 + $0x414] sm:$0xff]  }
 0x37e   :  { %v17439_v44 = vpop.permute.xlu0 %8225  ;;  %11965 = vrot.lane.b32.xlu1 %v11958_v24, %s16137_s30  ;;  %v15502_v24 = vld [vmem:[%s20110_s9 + $0x3c4] sm:$0xff]  }
 0x37f   :  { %13879 = vmatpush3.bf16.msra.mxu1 %v15480_v25  ;;  %14823 = vmatmul.mubr.msk.bf16.vlgmr.msra.gmra.mxu0 %vm3904_vm1, %v4863_v62  ;;  %v15487_v62 = vld [vmem:[%s20110_s9 + $0x3ec] sm:$0xff]  }
 0x380   :  { %13897 = vmatpush3.bf16.msra.mxu0 %v15482_v53  ;;  %5311 = vmatprep.mubr.bf16.mxu0 %v5134_v27  ;;  %v15501_v25 = vld [vmem:[%s20110_s9 + $0x38c] sm:$0xff]  }
 0x381   :  { %12533 = vrot.lane.b32.xlu0 %v12528_v56, %s16137_s30  ;;  %13880 = vmatprep.subr.bf16.mxu1 %v15483_v4  ;;  %v15503_v4 = vld [vmem:[%s20110_s9 + $0x40c] sm:$0xff]  }
 0x382   :  { %13898 = vmatprep.subr.bf16.mxu0 %v15485_v26  ;;  %v17464_v8 = vpop.permute.xlu0 %8520  ;;  %12251 = vrot.lane.b32.xlu1 %v12244_v61, %s16137_s30  ;;  %v15504_v26 = vld [vmem:[%s20110_s9 + $0x384] sm:$0xff]  }
 0x383   :  { %13881 = vmatpush3.bf16.msra.mxu1 %v15484_v57  ;;  %v15506_v57 = vld [vmem:[%s20110_s9 + $0x4e8] ss:$0 sps:$4 sm:$0xff]  }
 0x384   :  { %13899 = vmatpush3.bf16.msra.mxu0 %v15486_v11  ;;  %v17468_v41 = vpop.permute.xlu1 %8229  ;;  %14826 = vmatprep.subr.bf16.mxu1 %v20122_v6  ;;  %v15505_v11 = vld [vmem:[%s20110_s9 + $0x404] sm:$0xff]  }
 0x385   :  { %12531 = vrot.lane.b32.xlu0 %v20115_v50, %s16137_s30  ;;  %13900 = vmatprep.subr.bf16.mxu0 %v15487_v62  ;;  %v15507_v62 = vld [vmem:[%s20110_s9 + $0x4b0] sm:$0xff]  }
 0x386   :  { %5040 = vmatmul.mubr.bf16.vlgmr.msra.gmra.mxu1 %v4861_v32  ;;  %v17483_v43 = vpop.permute.xlu0 %8518  ;;  %12245 = vrot.lane.b32.xlu1 %v20116_v33, %s16137_s30  ;;  %v5133_v32 = vrot.slane %v17049_v20, 2 }
 0x387   :  { %14827 = vmatpush3.bf16.msra.mxu1 %v5277_v9  ;;  %14840 = vmatprep.mubr.msk.bf16.mxu1 %vm16128_vm2, %v20122_v6  ;;  %v5549_v9 = vsel %vm167_vm4, %v15506_v57, 0  ;;  %v15519_v57 = vld [vmem:[%s20110_s9 + $0x490] sm:$0xff]  }
 0x388   :  { %13901 = vmatpush3.bf16.msra.mxu0 %v15489_v29  ;;  %v8232_v30 = vpop.permute.xlu1 %8231  ;;  %14828 = vmatprep.subr.bf16.mxu1 %v20122_v6 }
 0x389   :  { %v17500_v42 = vsel %vm8233_vm3, %v17468_v41, %v8232_v30  ;;  %13902 = vmatprep.subr.bf16.mxu0 %v15490_v2  ;;  %v15508_v2 = vld [vmem:[%s20110_s9 + $0x470] sm:$0xff]  }
 0x38a   :  { %v17505_v37 = vpop.permute.xlu0 %8806  ;;  %12535 = vrot.lane.b32.xlu1 %v12529_v22, %s16137_s30  ;;  %v15509_v22 = vld [vmem:[%s20110_s9 + $0x4e0] sm:$0xff]  }
 0x38b   :  { %14829 = vmatpush3.bf16.msra.mxu1 %v15491_v15 }
 0x38c   :  { %13903 = vmatpush3.bf16.msra.mxu0 %v15492_v5  ;;  %v17511_v0 = vpop.permute.xlu1 %8522  ;;  %14830 = vmatprep.subr.bf16.mxu1 %v20122_v6  ;;  %v15510_v5 = vld [vmem:[%s20110_s9 + $0x4a8] sm:$0xff]  }
 0x38d   :  { %13904 = vmatprep.subr.bf16.mxu0 %v15493_v52 }
 0x38e   :  { %v17521_v14 = vpop.permute.xlu0 %8804  ;;  %12537 = vrot.lane.b32.xlu1 %v12530_v17, %s16137_s30  ;;  %s12868_s30 = sshll.u32 %s16138_s7, 4  ;;  %s12869_s30 = int_to_ptr.vmem [resolvable:$true] %s12868_s30 }
 0x38f   :  { %14831 = vmatpush3.bf16.msra.mxu1 %v15494_v46  ;;  %v5406_v46 = vrot.slane %v16929_v54, 3  ;;  %v15512_v54 = vld [vmem:[%s20110_s9 + $0x4d8] sm:$0xff]   ;;  %p16109_p1 = scmp.lt.s32.totalorder %s12869_s30, %s12869_s30 }
 0x390   :  { %13905 = vmatpush3.bf16.msra.mxu0 %v15495_v13  ;;  %v8525_v51 = vpop.permute.xlu1 %8524  ;;  %14832 = vmatprep.subr.bf16.mxu1 %v20122_v6  ;;  %v15511_v13 = vld [vmem:[%s20110_s9 + $0x468] sm:$0xff]  }
 0x391   :  { %v17533_v58 = vsel %vm8233_vm3, %v17511_v0, %v8525_v51  ;;  %13906 = vmatprep.subr.bf16.mxu0 %v15496_v1  ;;  %v15514_v51 = vld [vmem:[%s20110_s9 + $0x460] sm:$0xff]  }
 0x392   :  { %v17538_v31 = vpop.permute.xlu0 %9092 }
 0x393   :  { %14833 = vmatpush3.bf16.msra.mxu1 %v15497_v7 }
 0x394   :  { %13907 = vmatpush3.bf16.msra.mxu0 %v15498_v48  ;;  %v17543_v59 = vpop.permute.xlu1 %8808  ;;  %14834 = vmatprep.subr.bf16.mxu1 %v20122_v6 }
 0x395   :  { %13908 = vmatprep.subr.bf16.mxu0 %v15499_v19  ;;  %v15515_v19 = vld [vmem:[%s20110_s9 + $0x4d0] sm:$0xff]  }
 0x396   :  { %v17552_v53 = vpop.permute.xlu0 %9090 }
 0x397   :  { %14835 = vmatpush3.bf16.msra.mxu1 %v15500_v28  ;;  %v15516_v28 = vld [vmem:[%s20110_s9 + $0x498] sm:$0xff]  }
 0x398   :  { %13909 = vmatpush3.bf16.msra.mxu0 %v15501_v25  ;;  %v8811_v27 = vpop.permute.xlu1 %8810  ;;  %14836 = vmatprep.subr.bf16.mxu1 %v20122_v6 }
 0x399   :  { %v17563_v56 = vsel %vm8233_vm3, %v17543_v59, %v8811_v27  ;;  %13910 = vmatprep.subr.bf16.mxu0 %v15502_v24 }
 0x39a   :  { %v17568_v61 = vpop.permute.xlu0 %9380 }
 0x39b   :  { %14837 = vmatpush3.bf16.msra.mxu1 %v15503_v4  ;;  %v15517_v4 = vld [vmem:[%s20110_s9 + $0x458] sm:$0xff]  }
 0x39c   :  { %13911 = vmatpush3.bf16.msra.mxu0 %v15504_v26  ;;  %v17573_v18 = vpop.permute.xlu1 %9094  ;;  %14838 = vmatprep.subr.bf16.mxu1 %v20122_v6  ;;  %v15518_v26 = vld [vmem:[%s20110_s9 + $0x4c8] sm:$0xff]  }
 0x39d   :  { %14844 = vmatprep.subr.bf16.mxu0 %v20122_v6 }
 0x39e   :  { %v9379_v29 = vpop.permute.xlu0 %9378 }
 0x39f   :  { %5312 = vmatmul.mubr.bf16.vlgmr.msra.gmra.mxu0 %v5133_v32  ;;  %14839 = vmatpush3.bf16.msra.mxu1 %v15505_v11  ;;  %v17587_v15 = vsel %vm8233_vm3, %v9379_v29, %v17568_v61 }
 0x3a0   :  { %14845 = vmatpush3.bf16.msra.mxu0 %v5549_v9  ;;  %v9097_v30 = vpop.permute.xlu1 %9096  ;;  %13926 = vmatprep.subr.bf16.mxu1 %v15507_v62  ;;  %v15520_v62 = vld [vmem:[%s20110_s9 + $0x450] sm:$0xff]  }
 0x3a1   :  { %v17597_v52 = vsel %vm8233_vm3, %v17573_v18, %v9097_v30  ;;  %14846 = vmatprep.subr.bf16.mxu0 %v20122_v6  ;;  %14858 = vmatprep.mubr.msk.bf16.mxu0 %vm16128_vm2, %v20122_v6 }
 0x3a2   :  { %14841 = vmatmul.mubr.msk.bf16.vlgmr.msra.gmra.mxu1 %vm3904_vm1, %v5135_v36  ;;  %v17606_v17 = vpop.permute.xlu0 %9664  ;;  %v15513_v36 = vld [vmem:[%s20110_s9 + $0x4a0] sm:$0xff]  }
 0x3a3   :  { %13927 = vmatpush3.bf16.msra.mxu1 %v15508_v2  ;;  %5583 = vmatprep.mubr.bf16.mxu1 %v5406_v46  ;;  %v15522_v2 = vld [vmem:[%s20110_s9 + $0x488] sm:$0xff]  }
 0x3a4   :  { %14847 = vmatpush3.bf16.msra.mxu0 %v15509_v22  ;;  %v17611_v1 = vpop.permute.xlu1 %9382  ;;  %13928 = vmatprep.subr.bf16.mxu1 %v15510_v5  ;;  %v15523_v5 = vld [vmem:[%s20110_s9 + $0x448] sm:$0xff]  }
 0x3a5   :  { %14848 = vmatprep.subr.bf16.mxu0 %v20122_v6 }
 0x3a6   :  { %v17620_v7 = vpop.permute.xlu0 %9662 }
 0x3a7   :  { %13929 = vmatpush3.bf16.msra.mxu1 %v15511_v13  ;;  %v15524_v13 = vld [vmem:[%s20110_s9 + $0x4b8] sm:$0xff]  }
 0x3a8   :  { %14849 = vmatpush3.bf16.msra.mxu0 %v15512_v54  ;;  %v9377_v48 = vpop.permute.xlu1 %9376  ;;  %13930 = vmatprep.subr.bf16.mxu1 %v15513_v36  ;;  %v15525_v54 = vld [vmem:[%s20110_s9 + $0x480] sm:$0xff]  }
 0x3a9   :  { %v17632_v25 = vsel %vm8233_vm3, %v9377_v48, %v9379_v29  ;;  %14850 = vmatprep.subr.bf16.mxu0 %v20122_v6  ;;  %v15521_v29 = vld [vmem:[%s20110_s9 + $0x4c0] sm:$0xff]  }
 0x3aa   :  { %v17635_v24 = vpop.permute.xlu0 %9952  ;;  %v15527_v36 = vld [vmem:[%s20110_s9 + $0x564] sm:$0xff]  }
 0x3ab   :  { %13931 = vmatpush3.bf16.msra.mxu1 %v15514_v51  ;;  %v15526_v48 = vld [vmem:[%s20110_s9 + $0x440] sm:$0xff]  }
 0x3ac   :  { %14851 = vmatpush3.bf16.msra.mxu0 %v15515_v19  ;;  %v17640_v27 = vpop.permute.xlu1 %9666  ;;  %13932 = vmatprep.subr.bf16.mxu1 %v15516_v28  ;;  %v15528_v28 = vld [vmem:[%s20110_s9 + $0x524] sm:$0xff]  }
 0x3ad   :  { %14852 = vmatprep.subr.bf16.mxu0 %v20122_v6 }
 0x3ae   :  { %v9951_v11 = vpop.permute.xlu0 %9950 }
 0x3af   :  { %13933 = vmatpush3.bf16.msra.mxu1 %v15517_v4  ;;  %v17654_v32 = vsel %vm8233_vm3, %v9951_v11, %v17635_v24 }
 0x3b0   :  { %14853 = vmatpush3.bf16.msra.mxu0 %v15518_v26  ;;  %v9669_v9 = vpop.permute.xlu1 %9668  ;;  %13934 = vmatprep.subr.bf16.mxu1 %v15519_v57  ;;  %v15529_v26 = vld [vmem:[%s20110_s9 + $0x478] sm:$0xff]  }
 0x3b1   :  { %v17664_v30 = vsel %vm8233_vm3, %v17640_v27, %v9669_v9  ;;  %14854 = vmatprep.subr.bf16.mxu0 %v20122_v6  ;;  %v15531_v57 = vld [vmem:[%s20110_s9 + $0x55c] sm:$0xff]  }
 0x3b2   :  { %v17667_v22 = vpop.permute.xlu0 %10236 }
 0x3b3   :  { %13935 = vmatpush3.bf16.msra.mxu1 %v15520_v62  ;;  %v5678_v62 = vrot.slane %v16942_v35, 3  ;;  %v15533_v35 = vld [vmem:[%s20110_s9 + $0x554] sm:$0xff]  }
 0x3b4   :  { %14855 = vmatpush3.bf16.msra.mxu0 %v15521_v29  ;;  %v17672_v46 = vpop.permute.xlu1 %9954  ;;  %13936 = vmatprep.subr.bf16.mxu1 %v15522_v2  ;;  %v15532_v2 = vld [vmem:[%s20110_s9 + $0x51c] sm:$0xff]  }
 0x3b5   :  { %14856 = vmatprep.subr.bf16.mxu0 %v20122_v6 }
 0x3b7   :  { %13937 = vmatpush3.bf16.msra.mxu1 %v15523_v5  ;;  %v17684_v51 = vpop.permute.xlu0 %10234 }
 0x3b8   :  { %14857 = vmatpush3.bf16.msra.mxu0 %v15524_v13  ;;  %v9949_v19 = vpop.permute.xlu1 %9948  ;;  %13938 = vmatprep.subr.bf16.mxu1 %v15525_v54  ;;  %v5405_v13 = vrot.slane %v16934_v49, 3  ;;  %v5821_v54 = vsel %vm167_vm4, %v15534_v55, 0  ;;  %v15536_v49 = vld [vmem:[%s20110_s9 + $0x54c] sm:$0xff]  }
 0x3b9   :  { %v17693_v4 = vsel %vm8233_vm3, %v9949_v19, %v9951_v11  ;;  %13956 = vmatprep.subr.bf16.mxu0 %v15527_v36  ;;  %v15530_v11 = vld [vmem:[%s20110_s9 + $0x438] sm:$0xff]  }
 0x3ba   :  { %20128 = vst [vmem:[#allocation7_spill] sm:$0xff] %v17693_v4  ;;  %v15535_v36 = vld [vmem:[%s20110_s9 + $0x514] sm:$0xff]  }
 0x3bb   :  { %13939 = vmatpush3.bf16.msra.mxu1 %v15526_v48  ;;  %14859 = vmatmul.mubr.msk.bf16.vlgmr.msra.gmra.mxu0 %vm3904_vm1, %v5407_v38  ;;  %v17705_v9 = vpop.permute.xlu0 %10527 }
 0x3bc   :  { %13957 = vmatpush3.bf16.msra.mxu0 %v15528_v28  ;;  %5855 = vmatprep.mubr.bf16.mxu0 %v5678_v62  ;;  %v17710_v29 = vpop.permute.xlu1 %10238  ;;  %v15538_v62 = vld [vmem:[%s20110_s9 + $0x50c] sm:$0xff]  }
 0x3bd   :  { %13940 = vmatprep.subr.bf16.mxu1 %v15529_v26  ;;  %13958 = vmatprep.subr.bf16.mxu0 %v15531_v57  ;;  %v15537_v26 = vld [vmem:[%s20110_s9 + $0x594] sm:$0xff]  }
 0x3bf   :  { %13941 = vmatpush3.bf16.msra.mxu1 %v15530_v11  ;;  %v10526_v38 = vpop.permute.xlu0 %10525  ;;  %v15539_v11 = vld [vmem:[%s20110_s9 + $0x544] sm:$0xff]  }
 0x3c0   :  { %13959 = vmatpush3.bf16.msra.mxu0 %v15532_v2  ;;  %v10241_v5 = vpop.permute.xlu1 %10240  ;;  %14862 = vmatprep.subr.bf16.mxu1 %v20122_v6  ;;  %v17729_v48 = vsel %vm8233_vm3, %v10526_v38, %v17705_v9 }
 0x3c1   :  { %20129 = vst [vmem:[#allocation8_spill] sm:$0xff] %v17729_v48  ;;  %v17733_v19 = vsel %vm8233_vm3, %v17710_v29, %v10241_v5  ;;  %13960 = vmatprep.subr.bf16.mxu0 %v15533_v35  ;;  %v15540_v35 = vld [vmem:[%s20110_s9 + $0x58c] sm:$0xff]   ;;  %v15565_v48 = vld [vmem:[%s20110_s9 + $0x5f8] sm:$0xff]  }
 0x3c2   :  { %20130 = vst [vmem:[#allocation9_spill] sm:$0xff] %v17733_v19  ;;  %5584 = vmatmul.mubr.bf16.vlgmr.msra.gmra.mxu1 %v5405_v13 }
 0x3c3   :  { %14863 = vmatpush3.bf16.msra.mxu1 %v5821_v54  ;;  %v17738_v28 = vpop.permute.xlu0 %10817  ;;  %14876 = vmatprep.mubr.msk.bf16.mxu1 %vm16128_vm2, %v20122_v6  ;;  %v15541_v54 = vld [vmem:[%s20110_s9 + $0x504] sm:$0xff]  }
 0x3c4   :  { %13961 = vmatpush3.bf16.msra.mxu0 %v15535_v36  ;;  %v17745_v57 = vpop.permute.xlu1 %10529  ;;  %14864 = vmatprep.subr.bf16.mxu1 %v20122_v6 }
 0x3c5   :  { %13962 = vmatprep.subr.bf16.mxu0 %v15536_v49  ;;  %v15542_v49 = vld [vmem:[%s20110_s9 + $0x53c] sm:$0xff]  }
 0x3c6   :  { %v3985_v2 = vpop.f32.mrf.mxu0 }
 0x3c7   :  { %14865 = vmatpush3.bf16.msra.mxu1 %v15537_v26  ;;  %v17754_v55 = vpop.permute.xlu0 %10815 }
 0x3c8   :  { %13963 = vmatpush3.bf16.msra.mxu0 %v15538_v62  ;;  %v14752_v5 = vpop.f32.mrf.mxu0  ;;  %v10524_v13 = vpop.permute.xlu1 %10523  ;;  %14866 = vmatprep.subr.bf16.mxu1 %v20122_v6  ;;  %v15543_v62 = vld [vmem:[%s20110_s9 + $0x584] sm:$0xff]  }
 0x3c9   :  { %v17764_v36 = vsel %vm8233_vm3, %v10524_v13, %v10526_v38  ;;  %13964 = vmatprep.subr.bf16.mxu0 %v15539_v11  ;;  %v15544_v38 = vld [vmem:[%s20110_s9 + $0x4fc] sm:$0xff]   ;;  %v15545_v11 = vld [vmem:[%s20110_s9 + $0x534] sm:$0xff]  }
 0x3ca   :  { %20131 = vst [vmem:[#allocation10_spill] sm:$0xff] %v17764_v36  ;;  %v3988_v26 = vpop.f32.mrf.mxu0 }
 0x3cb   :  { %14867 = vmatpush3.bf16.msra.mxu1 %v15540_v35  ;;  %v17769_v50 = vpop.permute.xlu0 %11105 }
 0x3cc   :  { %13965 = vmatpush3.bf16.msra.mxu0 %v15541_v54  ;;  %v14753_v5 = vpop.f32.mrf.mxu0  ;;  %v17774_v33 = vpop.permute.xlu1 %10819  ;;  %14868 = vmatprep.subr.bf16.mxu1 %v20122_v6  ;;  %v15546_v54 = vld [vmem:[%s20110_s9 + $0x57c] sm:$0xff]  }
 0x3cd   :  { %13966 = vmatprep.subr.bf16.mxu0 %v15542_v49  ;;  %v15547_v49 = vld [vmem:[%s20110_s9 + $0x4f4] sm:$0xff]  }
 0x3ce   :  { %v13762_v35 = vpop.f32.mrf.mxu1 }
 0x3cf   :  { %14869 = vmatpush3.bf16.msra.mxu1 %v15543_v62  ;;  %v11104_v13 = vpop.permute.xlu0 %11103 }
 0x3d0   :  { %13967 = vmatpush3.bf16.msra.mxu0 %v15544_v38  ;;  %v13763_v26 = vpop.f32.mrf.mxu1  ;;  %v10822_v5 = vpop.permute.xlu1 %10821  ;;  %14870 = vmatprep.subr.bf16.mxu1 %v20122_v6  ;;  %v17792_v16 = vsel %vm8233_vm3, %v11104_v13, %v17769_v50  ;;  %v15548_v38 = vld [vmem:[%s20110_s9 + $0x52c] sm:$0xff]   ;;  %v15549_v6 = vld [vmem:[%s20110_s9 + $0x574] sm:$0xff]  }
 0x3d1   :  { %20132 = vst [vmem:[#allocation11_spill] sm:$0xff] %v17792_v16  ;;  %v13764_v39 = vadd.f32 %v13763_v26, %v13762_v35  ;;  %v17796_v62 = vsel %vm8233_vm3, %v17774_v33, %v10822_v5  ;;  %13968 = vmatprep.subr.bf16.mxu0 %v15545_v11  ;;  %v20134_v5 = vmov 0.0   ;;  %v15550_v11 = vld [vmem:[%s20110_s9 + $0x4ec] sm:$0xff]  }
 0x3d2   :  { %20133 = vst [vmem:[#allocation12_spill] sm:$0xff] %v17796_v62  ;;  %v13765_v45 = vpop.f32.mrf.mxu1  ;;  %v15554_v62 = vld [vmem:[%s20110_s9 + $0x5d8] sm:$0xff]  }
 0x3d3   :  { %v17801_v3 = vadd.f32 %v13764_v39, %v3985_v2  ;;  %14871 = vmatpush3.bf16.msra.mxu1 %v15546_v54  ;;  %v17803_v23 = vpop.permute.xlu0 %11389  ;;  %v3628_v45 = vadd.f32 %v17155_v21, %v16918_v40  ;;  %v15552_v39 = vld [vmem:[%s20110_s9 + $0x650] ss:$0 sps:$4 sm:$0xff]   ;;  %v15553_v40 = vld [vmem:[%s20110_s9 + $0x618] sm:$0xff]  }
 0x3d4   :  { %13969 = vmatpush3.bf16.msra.mxu0 %v15547_v49  ;;  %v13766_v35 = vpop.f32.mrf.mxu1  ;;  %v17808_v26 = vpop.permute.xlu1 %11107  ;;  %14872 = vmatprep.subr.bf16.mxu1 %v20134_v5  ;;  %v15551_v54 = vld [vmem:[%s20110_s9 + $0x56c] sm:$0xff]   ;;  %v6091_v16 = vsel %vm167_vm4, %v15552_v39, 0 }
 0x3d5   :  { %13970 = vmatprep.subr.bf16.mxu0 %v15548_v38  ;;  %v3640_v38 = vmax.f32 %v3628_v45, 0.0 }
 0x3d7   :  { %14873 = vmatpush3.bf16.msra.mxu1 %v15549_v6  ;;  %v17819_v2 = vpop.permute.xlu0 %11387  ;;  %v5677_v6 = vrot.slane %v17049_v20, 3  ;;  %v15555_v20 = vld [vmem:[%s20110_s9 + $0x648] sm:$0xff]   ;;  %v17847_v45 = vpack.c.bf16 %v3640_v38, %v3640_v38 }
 0x3d8   :  { %13971 = vmatpush3.bf16.msra.mxu0 %v15550_v11  ;;  %v11102_v49 = vpop.permute.xlu1 %11101  ;;  %14874 = vmatprep.subr.bf16.mxu1 %v20134_v5 }
 0x3d9   :  { %v17829_v35 = vsel %vm8233_vm3, %v11102_v49, %v11104_v13  ;;  %14880 = vmatprep.subr.bf16.mxu0 %v20134_v5  ;;  %v15556_v13 = vld [vmem:[%s20110_s9 + $0x610] sm:$0xff]  }
 0x3da   :  { %20135 = vst [vmem:[#allocation13_spill] sm:$0xff] %v17829_v35  ;;  %v15564_v35 = vld [vmem:[%s20110_s9 + $0x630] sm:$0xff]  }
 0x3db   :  { %5856 = vmatmul.mubr.bf16.vlgmr.msra.gmra.mxu0 %v5677_v6  ;;  %14875 = vmatpush3.bf16.msra.mxu1 %v15551_v54  ;;  %v17834_v11 = vpop.permute.xlu0 %11677  ;;  %v15557_v54 = vld [vmem:[%s20110_s9 + $0x5d0] sm:$0xff]  }
 0x3dc   :  { %20136 = vst [vmem:[#allocation14_spill] sm:$0xff] %v17834_v11  ;;  %14881 = vmatpush3.bf16.msra.mxu0 %v6091_v16  ;;  %v17839_v36 = vpop.permute.xlu1 %11391  ;;  %13986 = vmatprep.subr.bf16.mxu1 %v15553_v40  ;;  %v20137_v16 = vrot.slane %v16970_v12, 3  ;;  %v15558_v40 = vld [vmem:[%s20110_s9 + $0x640] sm:$0xff]   ;;  %v15559_v12 = vld [vmem:[%s20110_s9 + $0x608] sm:$0xff]  }
 0x3dd   :  { %14882 = vmatprep.subr.bf16.mxu0 %v20134_v5  ;;  %14894 = vmatprep.mubr.msk.bf16.mxu0 %vm16128_vm2, %v20134_v5 }
 0x3de   :  { %14877 = vmatmul.mubr.msk.bf16.vlgmr.msra.gmra.mxu1 %vm3904_vm1, %v20137_v16  ;;  %v15561_v16 = vld [vmem:[%s20110_s9 + $0x638] sm:$0xff]  }
 0x3df   :  { %13987 = vmatpush3.bf16.msra.mxu1 %v15554_v62  ;;  %6125 = vmatprep.mubr.bf16.mxu1 %v17847_v45  ;;  %v11676_v39 = vpop.permute.xlu0 %11675 }
 0x3e0   :  { %14883 = vmatpush3.bf16.msra.mxu0 %v15555_v20  ;;  %v11394_v49 = vpop.permute.xlu1 %11393  ;;  %13988 = vmatprep.subr.bf16.mxu1 %v15556_v13  ;;  %v17867_v62 = vsel %vm8233_vm3, %v11676_v39, %v17834_v11  ;;  %v15560_v20 = vld [vmem:[%s20110_s9 + $0x5c8] sm:$0xff]   ;;  %v15566_v11 = vld [vmem:[%s20110_s9 + $0x5b8] sm:$0xff]  }
 0x3e1   :  { %20138 = vst [vmem:[#allocation15_spill] sm:$0xff] %v17867_v62  ;;  %v17871_v38 = vsel %vm8233_vm3, %v17839_v36, %v11394_v49  ;;  %14884 = vmatprep.subr.bf16.mxu0 %v20134_v5  ;;  %v15562_v49 = vld [vmem:[%s20110_s9 + $0x600] sm:$0xff]  }
 0x3e2   :  { %20139 = vst [vmem:[#allocation16_spill] sm:$0xff] %v17871_v38 }
 0x3e3   :  { %13989 = vmatpush3.bf16.msra.mxu1 %v15557_v54  ;;  %v17874_v6 = vpop.permute.xlu0 %11961 }
 0x3e4   :  { %20140 = vst [vmem:[#allocation17_spill] sm:$0xff] %v17874_v6  ;;  %14885 = vmatpush3.bf16.msra.mxu0 %v15558_v40  ;;  %v17879_v13 = vpop.permute.xlu1 %11679  ;;  %13990 = vmatprep.subr.bf16.mxu1 %v15559_v12  ;;  %v15563_v40 = vld [vmem:[%s20110_s9 + $0x5c0] sm:$0xff]  }
 0x3e5   :  { %20141 = vst [vmem:[#allocation18_spill] sm:$0xff] %v17879_v13  ;;  %14886 = vmatprep.subr.bf16.mxu0 %v20134_v5 }
 0x3e6   :  { %v13792_v54 = vpop.f32.mrf.mxu0 }
 0x3e7   :  { %13991 = vmatpush3.bf16.msra.mxu1 %v15560_v20  ;;  %v17888_v62 = vpop.permute.xlu0 %11959 }
 0x3e8   :  { %20142 = vst [vmem:[#allocation19_spill] sm:$0xff] %v17888_v62  ;;  %14887 = vmatpush3.bf16.msra.mxu0 %v15561_v16  ;;  %v13793_v12 = vpop.f32.mrf.mxu0  ;;  %v11674_v38 = vpop.permute.xlu1 %11673  ;;  %13992 = vmatprep.subr.bf16.mxu1 %v15562_v49  ;;  %v3991_v16 = vadd.f32 %v17801_v3, %v16897_v60  ;;  %v15568_v3 = vld [vmem:[%s20110_s9 + $0x5f0] sm:$0xff]   ;;  %v15614_v60 = vld [vmem:[%s20110_s9 + $0x758] sm:$0xff]  }
 0x3e9   :  { %v13794_v19 = vadd.f32 %v13793_v12, %v13792_v54  ;;  %v17900_v20 = vsel %vm8233_vm3, %v11674_v38, %v11676_v39  ;;  %14888 = vmatprep.subr.bf16.mxu0 %v20134_v5  ;;  %v15567_v39 = vld [vmem:[%s20110_s9 + $0x628] sm:$0xff]  }
 0x3ea   :  { %20143 = vst [vmem:[#allocation20_spill] sm:$0xff] %v17900_v20  ;;  %v4262_v62 = vpop.f32.mrf.mxu1  ;;  %v13795_v4 = vpop.f32.mrf.mxu0  ;;  %v15613_v20 = vld [vmem:[%s20110_s9 + $0x790] sm:$0xff]  }
 0x3eb   :  { %v4263_v49 = vadd.f32 %v13794_v19, %v4262_v62  ;;  %13993 = vmatpush3.bf16.msra.mxu1 %v15563_v40  ;;  %v17905_v6 = vpop.permute.xlu0 %12249  ;;  %v15571_v40 = vld [vmem:[%s20110_s9 + $0x5e8] sm:$0xff]  }
 0x3ec   :  { %v14770_v13 = vpop.f32.mrf.mxu1  ;;  %14889 = vmatpush3.bf16.msra.mxu0 %v15564_v35  ;;  %v13796_v54 = vpop.f32.mrf.mxu0  ;;  %13994 = vmatprep.subr.bf16.mxu1 %v15565_v48  ;;  %v15569_v48 = vld [vmem:[%s20110_s9 + $0x5b0] sm:$0xff]  }
 0x3ed   :  { %v17916_v4 = vadd.f32 %v4263_v49, %v3991_v16  ;;  %v17918_v19 = vpop.permute.xlu1 %11963  ;;  %14890 = vmatprep.subr.bf16.mxu0 %v20134_v5  ;;  %v15570_v13 = vld [vmem:[%s20110_s9 + $0x620] sm:$0xff]   ;;  %v15573_v16 = vld [vmem:[%s20110_s9 + $0x6cc] sm:$0xff]  }
 0x3ee   :  { %v4265_v62 = vpop.f32.mrf.mxu1  ;;  %v15572_v54 = vld [vmem:[%s20110_s9 + $0x5a8] sm:$0xff]  }
 0x3ef   :  { %13995 = vmatpush3.bf16.msra.mxu1 %v15566_v11  ;;  %v12248_v38 = vpop.permute.xlu0 %12247 }
 0x3f0   :  { %v14771_v35 = vpop.f32.mrf.mxu1  ;;  %14891 = vmatpush3.bf16.msra.mxu0 %v15567_v39  ;;  %13996 = vmatprep.subr.bf16.mxu1 %v15568_v3  ;;  %v17932_v12 = vsel %vm8233_vm3, %v12248_v38, %v17905_v6  ;;  %v3627_v39 = vadd.f32 %v17155_v21, %v16907_v63  ;;  %v15574_v3 = vld [vmem:[%s20110_s9 + $0x68c] sm:$0xff]   ;;  %v15576_v63 = vld [vmem:[%s20110_s9 + $0x5a0] sm:$0xff]  }
 0x3f1   :  { %20144 = vst [vmem:[#allocation21_spill] sm:$0xff] %v17932_v12  ;;  %v11966_v11 = vpop.permute.xlu1 %11965  ;;  %14892 = vmatprep.subr.bf16.mxu0 %v20134_v5  ;;  %v15577_v35 = vld [vmem:[%s20110_s9 + $0x6c4] sm:$0xff]  }
 0x3f2   :  { %v17940_v49 = vsel %vm8233_vm3, %v17918_v19, %v11966_v11  ;;  %v17959_v11 = vshrl.u32 %v17847_v45, 16  ;;  %v3639_v21 = vmax.f32 %v3627_v39, 0.0 }
 0x3f3   :  { %20145 = vst [vmem:[#allocation22_spill] sm:$0xff] %v17940_v49  ;;  %13997 = vmatpush3.bf16.msra.mxu1 %v15569_v48  ;;  %v15575_v48 = vld [vmem:[%s20110_s9 + $0x5e0] sm:$0xff]  }
 0x3f4   :  { %14893 = vmatpush3.bf16.msra.mxu0 %v15570_v13  ;;  %13998 = vmatprep.subr.bf16.mxu1 %v15571_v40  ;;  %v15578_v13 = vld [vmem:[%s20110_s9 + $0x684] sm:$0xff]   ;;  %v15595_v49 = vld [vmem:[%s20110_s9 + $0x6dc] sm:$0xff]  }
 0x3f5   :  { %v17950_v62 = vpop.permute.xlu1 %12251  ;;  %14016 = vmatprep.subr.bf16.mxu0 %v15573_v16  ;;  %v15580_v40 = vld [vmem:[%s20110_s9 + $0x704] ss:$0 sps:$4 sm:$0xff]  }
 0x3f6   :  { %v6368_v12 = vsel %vm167_vm4, %v15580_v40, 0  ;;  %v15587_v40 = vld [vmem:[%s20110_s9 + $0x66c] sm:$0xff]  }
 0x3f7   :  { %13999 = vmatpush3.bf16.msra.mxu1 %v15572_v54  ;;  %14895 = vmatmul.mubr.msk.bf16.vlgmr.msra.gmra.mxu0 %vm3904_vm1, %v17238_v47  ;;  %v15579_v54 = vld [vmem:[%s20110_s9 + $0x6bc] sm:$0xff]  }
 0x3f8   :  { %14017 = vmatpush3.bf16.msra.mxu0 %v15574_v3  ;;  %6402 = vmatprep.mubr.bf16.mxu0 %v17959_v11  ;;  %v17979_v3 = vpack.c.bf16 %v3639_v21, %v3639_v21  ;;  %v15585_v21 = vld [vmem:[%s20110_s9 + $0x6ac] sm:$0xff]  }
 0x3f9   :  { %v12246_v16 = vpop.permute.xlu1 %12245  ;;  %14000 = vmatprep.subr.bf16.mxu1 %v15575_v48  ;;  %14018 = vmatprep.subr.bf16.mxu0 %v15577_v35  ;;  %v15581_v48 = vld [vmem:[%s20110_s9 + $0x67c] sm:$0xff]   ;;  %v15582_v35 = vld [vmem:[%s20110_s9 + $0x6b4] sm:$0xff]  }
 0x3fa   :  { %v17977_v39 = vsel %vm8233_vm3, %v12246_v16, %v12248_v38  ;;  %v15583_v38 = vld [vmem:[%s20110_s9 + $0x6fc] sm:$0xff]  }
 0x3fb   :  { %20146 = vst [vmem:[#allocation23_spill] sm:$0xff] %v17977_v39  ;;  %14001 = vmatpush3.bf16.msra.mxu1 %v15576_v63  ;;  %v15584_v63 = vld [vmem:[%s20110_s9 + $0x674] sm:$0xff]  }
 0x3fc   :  { %14019 = vmatpush3.bf16.msra.mxu0 %v15578_v13  ;;  %14898 = vmatprep.subr.bf16.mxu1 %v20134_v5  ;;  %v15586_v13 = vld [vmem:[%s20110_s9 + $0x6f4] sm:$0xff]  }
 0x3fd   :  { %14020 = vmatprep.subr.bf16.mxu0 %v15579_v54  ;;  %v15588_v54 = vld [vmem:[%s20110_s9 + $0x6a4] sm:$0xff]  }
 0x3fe   :  { %6126 = vmatmul.mubr.bf16.vlgmr.msra.gmra.mxu1 %v17979_v3 }
 0x3ff   :  { %14899 = vmatpush3.bf16.msra.mxu1 %v6368_v12  ;;  %14912 = vmatprep.mubr.msk.bf16.mxu1 %vm16128_vm2, %v20134_v5 }
 0x400   :  { %14021 = vmatpush3.bf16.msra.mxu0 %v15581_v48  ;;  %14900 = vmatprep.subr.bf16.mxu1 %v20134_v5 }
 0x401   :  { %14022 = vmatprep.subr.bf16.mxu0 %v15582_v35  ;;  %v15589_v35 = vld [vmem:[%s20110_s9 + $0x6ec] sm:$0xff]  }
 0x403   :  { %v4537_v12 = vpop.f32.mrf.mxu0  ;;  %14901 = vmatpush3.bf16.msra.mxu1 %v15583_v38  ;;  %v15590_v38 = vld [vmem:[%s20110_s9 + $0x664] sm:$0xff]  }
 0x404   :  { %14023 = vmatpush3.bf16.msra.mxu0 %v15584_v63  ;;  %14902 = vmatprep.subr.bf16.mxu1 %v20134_v5 }
 0x405   :  { %v14788_v16 = vpop.f32.mrf.mxu0  ;;  %14024 = vmatprep.subr.bf16.mxu0 %v15585_v21  ;;  %v15591_v21 = vld [vmem:[%s20110_s9 + $0x69c] sm:$0xff]  }
 0x407   :  { %v4540_v48 = vpop.f32.mrf.mxu0  ;;  %14903 = vmatpush3.bf16.msra.mxu1 %v15586_v13  ;;  %v15592_v13 = vld [vmem:[%s20110_s9 + $0x6e4] sm:$0xff]  }
 0x408   :  { %14025 = vmatpush3.bf16.msra.mxu0 %v15587_v40  ;;  %14904 = vmatprep.subr.bf16.mxu1 %v20134_v5  ;;  %v15593_v40 = vld [vmem:[%s20110_s9 + $0x65c] sm:$0xff]  }
 0x409   :  { %v14789_v63 = vpop.f32.mrf.mxu0  ;;  %14026 = vmatprep.subr.bf16.mxu0 %v15588_v54  ;;  %v15594_v54 = vld [vmem:[%s20110_s9 + $0x694] sm:$0xff]  }
 0x40a   :  { %v13822_v16 = vpop.f32.mrf.mxu1 }
 0x40b   :  { %14905 = vmatpush3.bf16.msra.mxu1 %v15589_v35 }
 0x40c   :  { %v13823_v48 = vpop.f32.mrf.mxu1  ;;  %14027 = vmatpush3.bf16.msra.mxu0 %v15590_v38  ;;  %14906 = vmatprep.subr.bf16.mxu1 %v20134_v5 }
 0x40d   :  { %v13824_v63 = vadd.f32 %v13823_v48, %v13822_v16  ;;  %14028 = vmatprep.subr.bf16.mxu0 %v15591_v21  ;;  %v15596_v16 = vld [vmem:[%s20110_s9 + $0x654] sm:$0xff]   ;;  %v18051_v48 = vshrl.u32 %v17979_v3, 16 }
 0x40e   :  { %v13825_v39 = vpop.f32.mrf.mxu1  ;;  %v15598_v21 = vld [vmem:[%s20110_s9 + $0x7b8] ss:$0 sps:$4 sm:$0xff]  }
 0x40f   :  { %v4538_v35 = vadd.f32 %v13824_v63, %v4537_v12  ;;  %14907 = vmatpush3.bf16.msra.mxu1 %v15592_v13  ;;  %v15597_v12 = vld [vmem:[%s20110_s9 + $0x6d4] sm:$0xff]   ;;  %v15599_v13 = vld [vmem:[%s20110_s9 + $0x780] sm:$0xff]  }
 0x410   :  { %v13826_v38 = vpop.f32.mrf.mxu1  ;;  %14029 = vmatpush3.bf16.msra.mxu0 %v15593_v40  ;;  %14908 = vmatprep.subr.bf16.mxu1 %v20134_v5  ;;  %v6643_v40 = vsel %vm167_vm4, %v15598_v21, 0  ;;  %v15602_v63 = vld [vmem:[%s20110_s9 + $0x778] sm:$0xff]   ;;  %v15606_v21 = vld [vmem:[%s20110_s9 + $0x730] sm:$0xff]  }
 0x411   :  { %14030 = vmatprep.subr.bf16.mxu0 %v15594_v54  ;;  %v4543_v39 = vadd.f32 %v4538_v35, %v17916_v4  ;;  %v15600_v4 = vld [vmem:[%s20110_s9 + $0x740] sm:$0xff]   ;;  %v6500_v54 = vrot.slane %v17847_v45, 1  ;;  %v15603_v35 = vld [vmem:[%s20110_s9 + $0x738] sm:$0xff]   ;;  %v15604_v38 = vld [vmem:[%s20110_s9 + $0x7a8] sm:$0xff]  }
 0x413   :  { %14909 = vmatpush3.bf16.msra.mxu1 %v15595_v49  ;;  %v15601_v49 = vld [vmem:[%s20110_s9 + $0x7b0] sm:$0xff]  }
 0x414   :  { %14031 = vmatpush3.bf16.msra.mxu0 %v15596_v16  ;;  %14910 = vmatprep.subr.bf16.mxu1 %v20134_v5  ;;  %v15605_v16 = vld [vmem:[%s20110_s9 + $0x770] sm:$0xff]  }
 0x415   :  { %14916 = vmatprep.subr.bf16.mxu0 %v20134_v5 }
 0x417   :  { %6403 = vmatmul.mubr.bf16.vlgmr.msra.gmra.mxu0 %v18051_v48  ;;  %14911 = vmatpush3.bf16.msra.mxu1 %v15597_v12  ;;  %v15607_v12 = vld [vmem:[%s20110_s9 + $0x7a0] sm:$0xff]  }
 0x418   :  { %14917 = vmatpush3.bf16.msra.mxu0 %v6643_v40  ;;  %14046 = vmatprep.subr.bf16.mxu1 %v15599_v13  ;;  %v15608_v13 = vld [vmem:[%s20110_s9 + $0x768] sm:$0xff]  }
 0x419   :  { %14918 = vmatprep.subr.bf16.mxu0 %v20134_v5  ;;  %14930 = vmatprep.mubr.msk.bf16.mxu0 %vm16128_vm2, %v20134_v5 }
 0x41a   :  { %14913 = vmatmul.mubr.msk.bf16.vlgmr.msra.gmra.mxu1 %vm3904_vm1, %v17260_v10 }
 0x41b   :  { %14047 = vmatpush3.bf16.msra.mxu1 %v15600_v4  ;;  %6677 = vmatprep.mubr.bf16.mxu1 %v6500_v54  ;;  %v15609_v4 = vld [vmem:[%s20110_s9 + $0x728] sm:$0xff]  }
 0x41c   :  { %14919 = vmatpush3.bf16.msra.mxu0 %v15601_v49  ;;  %14048 = vmatprep.subr.bf16.mxu1 %v15602_v63  ;;  %v15610_v49 = vld [vmem:[%s20110_s9 + $0x798] sm:$0xff]   ;;  %v15611_v63 = vld [vmem:[%s20110_s9 + $0x760] sm:$0xff]  }
 0x41d   :  { %14920 = vmatprep.subr.bf16.mxu0 %v20134_v5 }
 0x41f   :  { %14049 = vmatpush3.bf16.msra.mxu1 %v15603_v35 }
 0x420   :  { %14921 = vmatpush3.bf16.msra.mxu0 %v15604_v38  ;;  %14050 = vmatprep.subr.bf16.mxu1 %v15605_v16 }
 0x421   :  { %14922 = vmatprep.subr.bf16.mxu0 %v20134_v5 }
 0x423   :  { %v13852_v40 = vpop.f32.mrf.mxu0  ;;  %14051 = vmatpush3.bf16.msra.mxu1 %v15606_v21  ;;  %v15612_v21 = vld [vmem:[%s20110_s9 + $0x720] sm:$0xff]  }
 0x424   :  { %14923 = vmatpush3.bf16.msra.mxu0 %v15607_v12  ;;  %14052 = vmatprep.subr.bf16.mxu1 %v15608_v13 }
 0x425   :  { %v13853_v54 = vpop.f32.mrf.mxu0  ;;  %14924 = vmatprep.subr.bf16.mxu0 %v20134_v5 }
 0x426   :  { %v13854_v35 = vadd.f32 %v13853_v54, %v13852_v40  ;;  %v4809_v38 = vpop.f32.mrf.mxu1 }
 0x427   :  { %v13855_v16 = vpop.f32.mrf.mxu0  ;;  %14053 = vmatpush3.bf16.msra.mxu1 %v15609_v4 }
 0x428   :  { %v4810_v12 = vadd.f32 %v13854_v35, %v4809_v38  ;;  %v14806_v13 = vpop.f32.mrf.mxu1  ;;  %14925 = vmatpush3.bf16.msra.mxu0 %v15610_v49  ;;  %14054 = vmatprep.subr.bf16.mxu1 %v15611_v63  ;;  %v15615_v49 = vld [vmem:[%s20110_s9 + $0x718] sm:$0xff]   ;;  %v15616_v35 = vld [vmem:[%s20110_s9 + $0x788] sm:$0xff]   ;;  %v15617_v38 = vld [vmem:[%s20110_s9 + $0x750] sm:$0xff]  }
 0x429   :  { %v13856_v40 = vpop.f32.mrf.mxu0  ;;  %14926 = vmatprep.subr.bf16.mxu0 %v20134_v5  ;;  %v15621_v16 = vld [vmem:[%s20110_s9 + $0x748] sm:$0xff]   ;;  %v20147_v13 = vrot.slane %v17238_v47, 1 }
 0x42a   :  { %v18111_v4 = vadd.f32 %v4810_v12, %v4543_v39  ;;  %v4812_v54 = vpop.f32.mrf.mxu1  ;;  %v15619_v39 = vld [vmem:[%s20110_s9 + $0x834] sm:$0xff]   ;;  %v6772_v12 = vrot.slane %v17959_v11, 1  ;;  %v15622_v40 = vld [vmem:[%s20110_s9 + $0x708] sm:$0xff]  }
 0x42b   :  { %14055 = vmatpush3.bf16.msra.mxu1 %v15612_v21  ;;  %v15623_v21 = vld [vmem:[%s20110_s9 + $0x82c] sm:$0xff]  }
 0x42c   :  { %v14807_v63 = vpop.f32.mrf.mxu1  ;;  %14927 = vmatpush3.bf16.msra.mxu0 %v15613_v20  ;;  %14056 = vmatprep.subr.bf16.mxu1 %v15614_v60  ;;  %v15618_v20 = vld [vmem:[%s20110_s9 + $0x710] sm:$0xff]  }
 0x42d   :  { %14928 = vmatprep.subr.bf16.mxu0 %v20134_v5  ;;  %v15620_v60 = vld [vmem:[%s20110_s9 + $0x7f4] sm:$0xff]   ;;  %v15624_v54 = vld [vmem:[%s20110_s9 + $0x7ec] sm:$0xff]   ;;  %v15625_v63 = vld [vmem:[%s20110_s9 + $0x824] sm:$0xff]  }
 0x42f   :  { %14057 = vmatpush3.bf16.msra.mxu1 %v15615_v49  ;;  %v15626_v49 = vld [vmem:[%s20110_s9 + $0x86c] ss:$0 sps:$4 sm:$0xff]  }
 0x430   :  { %14929 = vmatpush3.bf16.msra.mxu0 %v15616_v35  ;;  %14058 = vmatprep.subr.bf16.mxu1 %v15617_v38  ;;  %v6499_v35 = vrot.slane %v17979_v3, 1  ;;  %v6915_v38 = vsel %vm167_vm4, %v15626_v49, 0  ;;  %v15634_v49 = vld [vmem:[%s20110_s9 + $0x80c] sm:$0xff]  }
 0x431   :  { %14076 = vmatprep.subr.bf16.mxu0 %v15619_v39  ;;  %v15627_v39 = vld [vmem:[%s20110_s9 + $0x7e4] sm:$0xff]  }
 0x433   :  { %14059 = vmatpush3.bf16.msra.mxu1 %v15618_v20  ;;  %14931 = vmatmul.mubr.msk.bf16.vlgmr.msra.gmra.mxu0 %vm3904_vm1, %v20147_v13  ;;  %v15628_v20 = vld [vmem:[%s20110_s9 + $0x81c] sm:$0xff]  }
 0x434   :  { %14077 = vmatpush3.bf16.msra.mxu0 %v15620_v60  ;;  %6949 = vmatprep.mubr.bf16.mxu0 %v6772_v12  ;;  %v15629_v60 = vld [vmem:[%s20110_s9 + $0x864] sm:$0xff]   ;;  %v15632_v13 = vld [vmem:[%s20110_s9 + $0x85c] sm:$0xff]  }
 0x435   :  { %14060 = vmatprep.subr.bf16.mxu1 %v15621_v16  ;;  %14078 = vmatprep.subr.bf16.mxu0 %v15623_v21  ;;  %v15630_v16 = vld [vmem:[%s20110_s9 + $0x7dc] sm:$0xff]   ;;  %v15631_v21 = vld [vmem:[%s20110_s9 + $0x814] sm:$0xff]  }
 0x437   :  { %14061 = vmatpush3.bf16.msra.mxu1 %v15622_v40  ;;  %v15633_v40 = vld [vmem:[%s20110_s9 + $0x7d4] sm:$0xff]  }
 0x438   :  { %14079 = vmatpush3.bf16.msra.mxu0 %v15624_v54  ;;  %14934 = vmatprep.subr.bf16.mxu1 %v20134_v5 }
 0x439   :  { %14080 = vmatprep.subr.bf16.mxu0 %v15625_v63 }
 0x43a   :  { %6678 = vmatmul.mubr.bf16.vlgmr.msra.gmra.mxu1 %v6499_v35  ;;  %v15635_v35 = vld [vmem:[%s20110_s9 + $0x854] sm:$0xff]  }
 0x43b   :  { %14935 = vmatpush3.bf16.msra.mxu1 %v6915_v38  ;;  %14948 = vmatprep.mubr.msk.bf16.mxu1 %vm16128_vm2, %v20134_v5  ;;  %v15636_v38 = vld [vmem:[%s20110_s9 + $0x7cc] sm:$0xff]  }
 0x43c   :  { %14081 = vmatpush3.bf16.msra.mxu0 %v15627_v39  ;;  %14936 = vmatprep.subr.bf16.mxu1 %v20134_v5 }
 0x43d   :  { %14082 = vmatprep.subr.bf16.mxu0 %v15628_v20  ;;  %v15637_v20 = vld [vmem:[%s20110_s9 + $0x804] sm:$0xff]  }
 0x43f   :  { %v5081_v12 = vpop.f32.mrf.mxu0  ;;  %14937 = vmatpush3.bf16.msra.mxu1 %v15629_v60 }
 0x440   :  { %14083 = vmatpush3.bf16.msra.mxu0 %v15630_v16  ;;  %14938 = vmatprep.subr.bf16.mxu1 %v20134_v5  ;;  %v15638_v16 = vld [vmem:[%s20110_s9 + $0x84c] sm:$0xff]  }
 0x441   :  { %v14824_v54 = vpop.f32.mrf.mxu0  ;;  %14084 = vmatprep.subr.bf16.mxu0 %v15631_v21 }
 0x442   :  { %v15640_v54 = vld [vmem:[%s20110_s9 + $0x7fc] sm:$0xff]  }
 0x443   :  { %v5084_v63 = vpop.f32.mrf.mxu0  ;;  %14939 = vmatpush3.bf16.msra.mxu1 %v15632_v13  ;;  %v15639_v13 = vld [vmem:[%s20110_s9 + $0x7c4] sm:$0xff]  }
 0x444   :  { %14085 = vmatpush3.bf16.msra.mxu0 %v15633_v40  ;;  %14940 = vmatprep.subr.bf16.mxu1 %v20134_v5 }
 0x445   :  { %v14825_v39 = vpop.f32.mrf.mxu0  ;;  %14086 = vmatprep.subr.bf16.mxu0 %v15634_v49 }
 0x446   :  { %v13882_v60 = vpop.f32.mrf.mxu1  ;;  %v15642_v39 = vld [vmem:[%s20110_s9 + $0x7bc] sm:$0xff]  }
 0x447   :  { %14941 = vmatpush3.bf16.msra.mxu1 %v15635_v35  ;;  %v15641_v35 = vld [vmem:[%s20110_s9 + $0x844] sm:$0xff]  }
 0x448   :  { %v13883_v21 = vpop.f32.mrf.mxu1  ;;  %14087 = vmatpush3.bf16.msra.mxu0 %v15636_v38  ;;  %14942 = vmatprep.subr.bf16.mxu1 %v20134_v5 }
 0x449   :  { %v13884_v40 = vadd.f32 %v13883_v21, %v13882_v60  ;;  %14088 = vmatprep.subr.bf16.mxu0 %v15637_v20  ;;  %v15644_v20 = vld [vmem:[%s20110_s9 + $0x920] ss:$0 sps:$4 sm:$0xff]   ;;  %v6771_v21 = vrot.slane %v18051_v48, 1 }
 0x44a   :  { %v13885_v49 = vpop.f32.mrf.mxu1  ;;  %v15643_v60 = vld [vmem:[%s20110_s9 + $0x83c] sm:$0xff]  }
 0x44b   :  { %v5082_v63 = vadd.f32 %v13884_v40, %v5081_v12  ;;  %14943 = vmatpush3.bf16.msra.mxu1 %v15638_v16  ;;  %v15645_v16 = vld [vmem:[%s20110_s9 + $0x8e8] sm:$0xff]   ;;  %v15647_v40 = vld [vmem:[%s20110_s9 + $0x918] sm:$0xff]   ;;  %v7044_v49 = vrot.slane %v17847_v45, 2 }
 0x44c   :  { %v13886_v38 = vpop.f32.mrf.mxu1  ;;  %14089 = vmatpush3.bf16.msra.mxu0 %v15639_v13  ;;  %14944 = vmatprep.subr.bf16.mxu1 %v20134_v5  ;;  %v7187_v13 = vsel %vm167_vm4, %v15644_v20, 0  ;;  %v15652_v20 = vld [vmem:[%s20110_s9 + $0x898] sm:$0xff]  }
 0x44d   :  { %14090 = vmatprep.subr.bf16.mxu0 %v15640_v54  ;;  %v5087_v12 = vadd.f32 %v5082_v63, %v18111_v4  ;;  %v15646_v4 = vld [vmem:[%s20110_s9 + $0x8a8] sm:$0xff]   ;;  %v15648_v54 = vld [vmem:[%s20110_s9 + $0x8e0] sm:$0xff]   ;;  %v20148_v63 = vrot.slane %v17260_v10, 1  ;;  %v15650_v38 = vld [vmem:[%s20110_s9 + $0x910] sm:$0xff]  }
 0x44f   :  { %14945 = vmatpush3.bf16.msra.mxu1 %v15641_v35  ;;  %v15649_v35 = vld [vmem:[%s20110_s9 + $0x8a0] sm:$0xff]  }
 0x450   :  { %14091 = vmatpush3.bf16.msra.mxu0 %v15642_v39  ;;  %14946 = vmatprep.subr.bf16.mxu1 %v20134_v5  ;;  %v15651_v39 = vld [vmem:[%s20110_s9 + $0x8d8] sm:$0xff]  }
 0x451   :  { %14952 = vmatprep.subr.bf16.mxu0 %v20134_v5 }
 0x453   :  { %6950 = vmatmul.mubr.bf16.vlgmr.msra.gmra.mxu0 %v6771_v21  ;;  %14947 = vmatpush3.bf16.msra.mxu1 %v15643_v60  ;;  %v15653_v60 = vld [vmem:[%s20110_s9 + $0x908] sm:$0xff]  }
 0x454   :  { %14953 = vmatpush3.bf16.msra.mxu0 %v7187_v13  ;;  %14106 = vmatprep.subr.bf16.mxu1 %v15645_v16  ;;  %v15654_v16 = vld [vmem:[%s20110_s9 + $0x8d0] sm:$0xff]  }
 0x455   :  { %14954 = vmatprep.subr.bf16.mxu0 %v20134_v5  ;;  %14966 = vmatprep.mubr.msk.bf16.mxu0 %vm16128_vm2, %v20134_v5  ;;  %v15655_v13 = vld [vmem:[%s20110_s9 + $0x890] sm:$0xff]  }
 0x456   :  { %14949 = vmatmul.mubr.msk.bf16.vlgmr.msra.gmra.mxu1 %vm3904_vm1, %v20148_v63 }
 0x457   :  { %14107 = vmatpush3.bf16.msra.mxu1 %v15646_v4  ;;  %7221 = vmatprep.mubr.bf16.mxu1 %v7044_v49  ;;  %v15656_v4 = vld [vmem:[%s20110_s9 + $0x900] sm:$0xff]  }
 0x458   :  { %14955 = vmatpush3.bf16.msra.mxu0 %v15647_v40  ;;  %14108 = vmatprep.subr.bf16.mxu1 %v15648_v54  ;;  %v15657_v40 = vld [vmem:[%s20110_s9 + $0x8c8] sm:$0xff]  }
 0x459   :  { %14956 = vmatprep.subr.bf16.mxu0 %v20134_v5 }
 0x45b   :  { %14109 = vmatpush3.bf16.msra.mxu1 %v15649_v35 }
 0x45c   :  { %14957 = vmatpush3.bf16.msra.mxu0 %v15650_v38  ;;  %14110 = vmatprep.subr.bf16.mxu1 %v15651_v39  ;;  %v15658_v38 = vld [vmem:[%s20110_s9 + $0x888] sm:$0xff]  }
 0x45d   :  { %14958 = vmatprep.subr.bf16.mxu0 %v20134_v5 }
 0x45f   :  { %v13912_v21 = vpop.f32.mrf.mxu0  ;;  %14111 = vmatpush3.bf16.msra.mxu1 %v15652_v20 }
 0x460   :  { %14959 = vmatpush3.bf16.msra.mxu0 %v15653_v60  ;;  %14112 = vmatprep.subr.bf16.mxu1 %v15654_v16  ;;  %v15659_v60 = vld [vmem:[%s20110_s9 + $0x8f8] sm:$0xff]   ;;  %v15660_v16 = vld [vmem:[%s20110_s9 + $0x8c0] sm:$0xff]  }
 0x461   :  { %v13913_v54 = vpop.f32.mrf.mxu0  ;;  %14960 = vmatprep.subr.bf16.mxu0 %v20134_v5 }
 0x462   :  { %v13914_v49 = vadd.f32 %v13913_v54, %v13912_v21  ;;  %v5353_v63 = vpop.f32.mrf.mxu1 }
 0x463   :  { %v13915_v35 = vpop.f32.mrf.mxu0  ;;  %14113 = vmatpush3.bf16.msra.mxu1 %v15655_v13 }
 0x464   :  { %v5354_v39 = vadd.f32 %v13914_v49, %v5353_v63  ;;  %v14842_v20 = vpop.f32.mrf.mxu1  ;;  %14961 = vmatpush3.bf16.msra.mxu0 %v15656_v4  ;;  %14114 = vmatprep.subr.bf16.mxu1 %v15657_v40  ;;  %v15661_v4 = vld [vmem:[%s20110_s9 + $0x880] sm:$0xff]   ;;  %v15662_v49 = vld [vmem:[%s20110_s9 + $0x8f0] sm:$0xff]   ;;  %v15663_v63 = vld [vmem:[%s20110_s9 + $0x8b8] sm:$0xff]  }
 0x465   :  { %v13916_v21 = vpop.f32.mrf.mxu0  ;;  %14962 = vmatprep.subr.bf16.mxu0 %v20134_v5  ;;  %v15664_v35 = vld [vmem:[%s20110_s9 + $0x878] sm:$0xff]  }
 0x466   :  { %v18282_v13 = vadd.f32 %v5354_v39, %v5087_v12  ;;  %v5356_v54 = vpop.f32.mrf.mxu1  ;;  %v15665_v12 = vld [vmem:[%s20110_s9 + $0x99c] sm:$0xff]   ;;  %v15667_v39 = vld [vmem:[%s20110_s9 + $0x8b0] sm:$0xff]  }
 0x467   :  { %14115 = vmatpush3.bf16.msra.mxu1 %v15658_v38  ;;  %v15666_v38 = vld [vmem:[%s20110_s9 + $0x95c] sm:$0xff]   ;;  %v15669_v20 = vld [vmem:[%s20110_s9 + $0x994] sm:$0xff]  }
 0x468   :  { %v14843_v40 = vpop.f32.mrf.mxu1  ;;  %14963 = vmatpush3.bf16.msra.mxu0 %v15659_v60  ;;  %14116 = vmatprep.subr.bf16.mxu1 %v15660_v16  ;;  %v7316_v60 = vrot.slane %v17959_v11, 2  ;;  %v20149_v16 = vrot.slane %v17238_v47, 2  ;;  %v15668_v21 = vld [vmem:[%s20110_s9 + $0x870] sm:$0xff]  }
 0x469   :  { %14964 = vmatprep.subr.bf16.mxu0 %v20134_v5  ;;  %v15670_v54 = vld [vmem:[%s20110_s9 + $0x954] sm:$0xff]   ;;  %v15671_v40 = vld [vmem:[%s20110_s9 + $0x98c] sm:$0xff]  }
 0x46b   :  { %14117 = vmatpush3.bf16.msra.mxu1 %v15661_v4  ;;  %v15672_v4 = vld [vmem:[%s20110_s9 + $0x9d4] ss:$0 sps:$4 sm:$0xff]  }
 0x46c   :  { %14965 = vmatpush3.bf16.msra.mxu0 %v15662_v49  ;;  %14118 = vmatprep.subr.bf16.mxu1 %v15663_v63  ;;  %v7043_v49 = vrot.slane %v17979_v3, 2  ;;  %v7459_v63 = vsel %vm167_vm4, %v15672_v4, 0  ;;  %v15680_v4 = vld [vmem:[%s20110_s9 + $0x974] sm:$0xff]  }
 0x46d   :  { %14136 = vmatprep.subr.bf16.mxu0 %v15665_v12  ;;  %v15673_v12 = vld [vmem:[%s20110_s9 + $0x94c] sm:$0xff]  }
 0x46f   :  { %14119 = vmatpush3.bf16.msra.mxu1 %v15664_v35  ;;  %14967 = vmatmul.mubr.msk.bf16.vlgmr.msra.gmra.mxu0 %vm3904_vm1, %v20149_v16  ;;  %v15674_v35 = vld [vmem:[%s20110_s9 + $0x984] sm:$0xff]  }
 0x470   :  { %14137 = vmatpush3.bf16.msra.mxu0 %v15666_v38  ;;  %7493 = vmatprep.mubr.bf16.mxu0 %v7316_v60  ;;  %v15675_v38 = vld [vmem:[%s20110_s9 + $0x9cc] sm:$0xff]   ;;  %v15678_v16 = vld [vmem:[%s20110_s9 + $0x9c4] sm:$0xff]  }
 0x471   :  { %14120 = vmatprep.subr.bf16.mxu1 %v15667_v39  ;;  %14138 = vmatprep.subr.bf16.mxu0 %v15669_v20  ;;  %v15676_v39 = vld [vmem:[%s20110_s9 + $0x944] sm:$0xff]   ;;  %v15677_v20 = vld [vmem:[%s20110_s9 + $0x97c] sm:$0xff]  }
 0x473   :  { %14121 = vmatpush3.bf16.msra.mxu1 %v15668_v21  ;;  %v15679_v21 = vld [vmem:[%s20110_s9 + $0x93c] sm:$0xff]  }
 0x474   :  { %14139 = vmatpush3.bf16.msra.mxu0 %v15670_v54  ;;  %14970 = vmatprep.subr.bf16.mxu1 %v20134_v5 }
 0x475   :  { %14140 = vmatprep.subr.bf16.mxu0 %v15671_v40 }
 0x476   :  { %7222 = vmatmul.mubr.bf16.vlgmr.msra.gmra.mxu1 %v7043_v49  ;;  %v15681_v49 = vld [vmem:[%s20110_s9 + $0x9bc] sm:$0xff]  }
 0x477   :  { %14971 = vmatpush3.bf16.msra.mxu1 %v7459_v63  ;;  %14984 = vmatprep.mubr.msk.bf16.mxu1 %vm16128_vm2, %v20134_v5  ;;  %v15682_v63 = vld [vmem:[%s20110_s9 + $0x934] sm:$0xff]  }
 0x478   :  { %14141 = vmatpush3.bf16.msra.mxu0 %v15673_v12  ;;  %14972 = vmatprep.subr.bf16.mxu1 %v20134_v5 }
 0x479   :  { %14142 = vmatprep.subr.bf16.mxu0 %v15674_v35  ;;  %v15683_v35 = vld [vmem:[%s20110_s9 + $0x96c] sm:$0xff]  }
 0x47b   :  { %v5625_v60 = vpop.f32.mrf.mxu0  ;;  %14973 = vmatpush3.bf16.msra.mxu1 %v15675_v38 }
 0x47c   :  { %14143 = vmatpush3.bf16.msra.mxu0 %v15676_v39  ;;  %14974 = vmatprep.subr.bf16.mxu1 %v20134_v5  ;;  %v15684_v39 = vld [vmem:[%s20110_s9 + $0x9b4] sm:$0xff]  }
 0x47d   :  { %v14860_v54 = vpop.f32.mrf.mxu0  ;;  %14144 = vmatprep.subr.bf16.mxu0 %v15677_v20 }
 0x47e   :  { %v15686_v54 = vld [vmem:[%s20110_s9 + $0x964] sm:$0xff]  }
 0x47f   :  { %v5628_v40 = vpop.f32.mrf.mxu0  ;;  %14975 = vmatpush3.bf16.msra.mxu1 %v15678_v16  ;;  %v15685_v16 = vld [vmem:[%s20110_s9 + $0x92c] sm:$0xff]  }
 0x480   :  { %14145 = vmatpush3.bf16.msra.mxu0 %v15679_v21  ;;  %14976 = vmatprep.subr.bf16.mxu1 %v20134_v5 }
 0x481   :  { %v14861_v12 = vpop.f32.mrf.mxu0  ;;  %14146 = vmatprep.subr.bf16.mxu0 %v15680_v4 }
 0x482   :  { %v13942_v38 = vpop.f32.mrf.mxu1  ;;  %v15688_v12 = vld [vmem:[%s20110_s9 + $0x924] sm:$0xff]  }
 0x483   :  { %14977 = vmatpush3.bf16.msra.mxu1 %v15681_v49  ;;  %v15687_v49 = vld [vmem:[%s20110_s9 + $0x9ac] sm:$0xff]  }
 0x484   :  { %v13943_v20 = vpop.f32.mrf.mxu1  ;;  %14147 = vmatpush3.bf16.msra.mxu0 %v15682_v63  ;;  %14978 = vmatprep.subr.bf16.mxu1 %v20134_v5 }
 0x485   :  { %v13944_v21 = vadd.f32 %v13943_v20, %v13942_v38  ;;  %14148 = vmatprep.subr.bf16.mxu0 %v15683_v35  ;;  %v15690_v35 = vld [vmem:[%s20110_s9 + $0xa88] ss:$0 sps:$4 sm:$0xff]   ;;  %v7315_v20 = vrot.slane %v18051_v48, 2 }
 0x486   :  { %v13945_v4 = vpop.f32.mrf.mxu1  ;;  %v15689_v38 = vld [vmem:[%s20110_s9 + $0x9a4] sm:$0xff]  }
 0x487   :  { %v5626_v40 = vadd.f32 %v13944_v21, %v5625_v60  ;;  %14979 = vmatpush3.bf16.msra.mxu1 %v15684_v39  ;;  %v15691_v39 = vld [vmem:[%s20110_s9 + $0xa50] sm:$0xff]   ;;  %v15693_v21 = vld [vmem:[%s20110_s9 + $0xa80] sm:$0xff]   ;;  %v7588_v4 = vrot.slane %v17847_v45, 3  ;;  %v15696_v45 = vld [vmem:[%s20110_s9 + $0xa78] sm:$0xff]  }
 0x488   :  { %v13946_v63 = vpop.f32.mrf.mxu1  ;;  %14149 = vmatpush3.bf16.msra.mxu0 %v15685_v16  ;;  %14980 = vmatprep.subr.bf16.mxu1 %v20134_v5  ;;  %v7731_v16 = vsel %vm167_vm4, %v15690_v35, 0  ;;  %v15699_v35 = vld [vmem:[%s20110_s9 + $0xa70] sm:$0xff]  }
 0x489   :  { %14150 = vmatprep.subr.bf16.mxu0 %v15686_v54  ;;  %v5631_v60 = vadd.f32 %v5626_v40, %v18282_v13  ;;  %v15692_v13 = vld [vmem:[%s20110_s9 + $0xa10] sm:$0xff]   ;;  %v15694_v54 = vld [vmem:[%s20110_s9 + $0xa48] sm:$0xff]   ;;  %v20150_v40 = vrot.slane %v17260_v10, 2  ;;  %v15697_v63 = vld [vmem:[%s20110_s9 + $0xa40] sm:$0xff]  }
 0x48b   :  { %14981 = vmatpush3.bf16.msra.mxu1 %v15687_v49  ;;  %v15695_v49 = vld [vmem:[%s20110_s9 + $0xa08] sm:$0xff]  }
 0x48c   :  { %14151 = vmatpush3.bf16.msra.mxu0 %v15688_v12  ;;  %14982 = vmatprep.subr.bf16.mxu1 %v20134_v5  ;;  %v15698_v12 = vld [vmem:[%s20110_s9 + $0xa00] sm:$0xff]  }
 0x48d   :  { %14988 = vmatprep.subr.bf16.mxu0 %v20134_v5 }
 0x48f   :  { %7494 = vmatmul.mubr.bf16.vlgmr.msra.gmra.mxu0 %v7315_v20  ;;  %14983 = vmatpush3.bf16.msra.mxu1 %v15689_v38  ;;  %v15700_v38 = vld [vmem:[%s20110_s9 + $0xa38] sm:$0xff]  }
 0x490   :  { %14989 = vmatpush3.bf16.msra.mxu0 %v7731_v16  ;;  %14166 = vmatprep.subr.bf16.mxu1 %v15691_v39  ;;  %v15701_v20 = vld [vmem:[%s20110_s9 + $0x9f8] sm:$0xff]   ;;  %v15702_v16 = vld [vmem:[%s20110_s9 + $0xa68] sm:$0xff]  }
 0x491   :  { %14990 = vmatprep.subr.bf16.mxu0 %v20134_v5  ;;  %15002 = vmatprep.mubr.msk.bf16.mxu0 %vm16128_vm2, %v20134_v5 }
 0x492   :  { %14985 = vmatmul.mubr.msk.bf16.vlgmr.msra.gmra.mxu1 %vm3904_vm1, %v20150_v40 }
 0x493   :  { %14167 = vmatpush3.bf16.msra.mxu1 %v15692_v13  ;;  %7765 = vmatprep.mubr.bf16.mxu1 %v7588_v4  ;;  %v15703_v13 = vld [vmem:[%s20110_s9 + $0xa30] sm:$0xff]  }
 0x494   :  { %14991 = vmatpush3.bf16.msra.mxu0 %v15693_v21  ;;  %14168 = vmatprep.subr.bf16.mxu1 %v15694_v54 }
 0x495   :  { %14992 = vmatprep.subr.bf16.mxu0 %v20134_v5 }
 0x497   :  { %14169 = vmatpush3.bf16.msra.mxu1 %v15695_v49  ;;  %v15704_v49 = vld [vmem:[%s20110_s9 + $0x9f0] sm:$0xff]  }
 0x498   :  { %14993 = vmatpush3.bf16.msra.mxu0 %v15696_v45  ;;  %14170 = vmatprep.subr.bf16.mxu1 %v15697_v63 }
 0x499   :  { %14994 = vmatprep.subr.bf16.mxu0 %v20134_v5 }
 0x49b   :  { %v13972_v39 = vpop.f32.mrf.mxu0  ;;  %14171 = vmatpush3.bf16.msra.mxu1 %v15698_v12  ;;  %v15705_v12 = vld [vmem:[%s20110_s9 + $0xa60] sm:$0xff]  }
 0x49c   :  { %14995 = vmatpush3.bf16.msra.mxu0 %v15699_v35  ;;  %14172 = vmatprep.subr.bf16.mxu1 %v15700_v38  ;;  %v15706_v35 = vld [vmem:[%s20110_s9 + $0xa28] sm:$0xff]  }
 0x49d   :  { %v13973_v21 = vpop.f32.mrf.mxu0  ;;  %14996 = vmatprep.subr.bf16.mxu0 %v20134_v5 }
 0x49e   :  { %v13974_v54 = vadd.f32 %v13973_v21, %v13972_v39  ;;  %v5897_v4 = vpop.f32.mrf.mxu1  ;;  %v15708_v21 = vld [vmem:[%s20110_s9 + $0xa58] sm:$0xff]  }
 0x49f   :  { %v13975_v40 = vpop.f32.mrf.mxu0  ;;  %14173 = vmatpush3.bf16.msra.mxu1 %v15701_v20 }
 0x4a0   :  { %v5898_v45 = vadd.f32 %v13974_v54, %v5897_v4  ;;  %v14878_v63 = vpop.f32.mrf.mxu1  ;;  %14997 = vmatpush3.bf16.msra.mxu0 %v15702_v16  ;;  %14174 = vmatprep.subr.bf16.mxu1 %v15703_v13  ;;  %v15707_v16 = vld [vmem:[%s20110_s9 + $0x9e8] sm:$0xff]   ;;  %v15709_v54 = vld [vmem:[%s20110_s9 + $0xa20] sm:$0xff]  }
 0x4a1   :  { %v13976_v38 = vpop.f32.mrf.mxu0  ;;  %14998 = vmatprep.subr.bf16.mxu0 %v20134_v5  ;;  %v15710_v4 = vld [vmem:[%s20110_s9 + $0x9e0] sm:$0xff]   ;;  %v7860_v63 = vrot.slane %v17959_v11, 3  ;;  %v7587_v11 = vrot.slane %v17979_v3, 3  ;;  %v15722_v3 = vld [vmem:[%s20110_s9 + $0xaac] sm:$0xff]  }
 0x4a2   :  { %v18453_v39 = vadd.f32 %v5898_v45, %v5631_v60  ;;  %v5900_v20 = vpop.f32.mrf.mxu1  ;;  %v15711_v60 = vld [vmem:[%s20110_s9 + $0xb04] sm:$0xff]   ;;  %v15715_v45 = vld [vmem:[%s20110_s9 + $0xafc] sm:$0xff]  }
 0x4a3   :  { %14175 = vmatpush3.bf16.msra.mxu1 %v15704_v49  ;;  %v15712_v40 = vld [vmem:[%s20110_s9 + $0xac4] sm:$0xff]   ;;  %v15713_v49 = vld [vmem:[%s20110_s9 + $0xa18] sm:$0xff]  }
 0x4a4   :  { %v14879_v13 = vpop.f32.mrf.mxu1  ;;  %14999 = vmatpush3.bf16.msra.mxu0 %v15705_v12  ;;  %14176 = vmatprep.subr.bf16.mxu1 %v15706_v35  ;;  %v20151_v12 = vrot.slane %v17238_v47, 3  ;;  %v15714_v35 = vld [vmem:[%s20110_s9 + $0x9d8] sm:$0xff]  }
 0x4a5   :  { %15000 = vmatprep.subr.bf16.mxu0 %v20134_v5  ;;  %v15716_v38 = vld [vmem:[%s20110_s9 + $0xabc] sm:$0xff]   ;;  %v15717_v47 = vld [vmem:[%s20110_s9 + $0xaf4] sm:$0xff]  }
 0x4a6   :  { %v15718_v20 = vld [vmem:[%s20110_s9 + $0xb3c] ss:$0 sps:$4 sm:$0xff]   ;;  %v15719_v13 = vld [vmem:[%s20110_s9 + $0xab4] sm:$0xff]  }
 0x4a7   :  { %14177 = vmatpush3.bf16.msra.mxu1 %v15707_v16  ;;  %v8003_v16 = vsel %vm167_vm4, %v15718_v20, 0 }
 0x4a8   :  { %15001 = vmatpush3.bf16.msra.mxu0 %v15708_v21  ;;  %14178 = vmatprep.subr.bf16.mxu1 %v15709_v54  ;;  %v15720_v21 = vld [vmem:[%s20110_s9 + $0xaec] sm:$0xff]   ;;  %v15721_v54 = vld [vmem:[%s20110_s9 + $0xb34] sm:$0xff]  }
 0x4a9   :  { %14196 = vmatprep.subr.bf16.mxu0 %v15711_v60  ;;  %v15723_v60 = vld [vmem:[%s20110_s9 + $0xae4] sm:$0xff]  }
 0x4ab   :  { %14179 = vmatpush3.bf16.msra.mxu1 %v15710_v4  ;;  %15003 = vmatmul.mubr.msk.bf16.vlgmr.msra.gmra.mxu0 %vm3904_vm1, %v20151_v12 }
 0x4ac   :  { %14197 = vmatpush3.bf16.msra.mxu0 %v15712_v40  ;;  %8037 = vmatprep.mubr.bf16.mxu0 %v7860_v63  ;;  %v15724_v40 = vld [vmem:[%s20110_s9 + $0xb2c] sm:$0xff]   ;;  %v15726_v63 = vld [vmem:[%s20110_s9 + $0xadc] sm:$0xff]  }
 0x4ad   :  { %14180 = vmatprep.subr.bf16.mxu1 %v15713_v49  ;;  %14198 = vmatprep.subr.bf16.mxu0 %v15715_v45  ;;  %v15725_v49 = vld [vmem:[%s20110_s9 + $0xaa4] sm:$0xff]  }
 0x4af   :  { %14181 = vmatpush3.bf16.msra.mxu1 %v15714_v35  ;;  %v15727_v35 = vld [vmem:[%s20110_s9 + $0xb24] sm:$0xff]  }
 0x4b0   :  { %14199 = vmatpush3.bf16.msra.mxu0 %v15716_v38  ;;  %15006 = vmatprep.subr.bf16.mxu1 %v20134_v5  ;;  %v15728_v38 = vld [vmem:[%s20110_s9 + $0xa9c] sm:$0xff]  }
 0x4b1   :  { %14200 = vmatprep.subr.bf16.mxu0 %v15717_v47  ;;  %v15729_v47 = vld [vmem:[%s20110_s9 + $0xad4] sm:$0xff]  }
 0x4b2   :  { %7766 = vmatmul.mubr.bf16.vlgmr.msra.gmra.mxu1 %v7587_v11 }
 0x4b3   :  { %15007 = vmatpush3.bf16.msra.mxu1 %v8003_v16  ;;  %15020 = vmatprep.mubr.msk.bf16.mxu1 %vm16128_vm2, %v20134_v5  ;;  %v15730_v16 = vld [vmem:[%s20110_s9 + $0xb1c] sm:$0xff]  }
 0x4b4   :  { %14201 = vmatpush3.bf16.msra.mxu0 %v15719_v13  ;;  %15008 = vmatprep.subr.bf16.mxu1 %v20134_v5 }
 0x4b5   :  { %14202 = vmatprep.subr.bf16.mxu0 %v15720_v21  ;;  %v15731_v21 = vld [vmem:[%s20110_s9 + $0xa94] sm:$0xff]  }
 0x4b7   :  { %v6167_v4 = vpop.f32.mrf.mxu0  ;;  %15009 = vmatpush3.bf16.msra.mxu1 %v15721_v54 }
 0x4b8   :  { %14203 = vmatpush3.bf16.msra.mxu0 %v15722_v3  ;;  %15010 = vmatprep.subr.bf16.mxu1 %v20134_v5  ;;  %v15732_v3 = vld [vmem:[%s20110_s9 + $0xacc] sm:$0xff]  }
 0x4b9   :  { %v14896_v45 = vpop.f32.mrf.mxu0  ;;  %14204 = vmatprep.subr.bf16.mxu0 %v15723_v60 }
 0x4bb   :  { %v6170_v12 = vpop.f32.mrf.mxu0  ;;  %15011 = vmatpush3.bf16.msra.mxu1 %v15724_v40 }
 0x4bc   :  { %14205 = vmatpush3.bf16.msra.mxu0 %v15725_v49  ;;  %15012 = vmatprep.subr.bf16.mxu1 %v20134_v5  ;;  %v15733_v49 = vld [vmem:[%s20110_s9 + $0xb14] sm:$0xff]  }
 0x4bd   :  { %v14897_v20 = vpop.f32.mrf.mxu0  ;;  %14206 = vmatprep.subr.bf16.mxu0 %v15726_v63  ;;  %v15734_v63 = vld [vmem:[%s20110_s9 + $0xa8c] sm:$0xff]   ;;  %v15736_v12 = vld [vmem:[%s20110_s9 + $0x78] sm:$0xff]  }
 0x4be   :  { %v14002_v11 = vpop.f32.mrf.mxu1  ;;  %v7859_v20 = vrot.slane %v18051_v48, 3  ;;  %v15740_v48 = vld [vmem:[%s20110_s9 + $0x68] sm:$0xff]  }
 0x4bf   :  { %15013 = vmatpush3.bf16.msra.mxu1 %v15727_v35  ;;  %v15735_v35 = vld [vmem:[%s20110_s9 + $0xb0c] sm:$0xff]  }
 0x4c0   :  { %v14003_v13 = vpop.f32.mrf.mxu1  ;;  %14207 = vmatpush3.bf16.msra.mxu0 %v15728_v38  ;;  %15014 = vmatprep.subr.bf16.mxu1 %v20134_v5  ;;  %v15737_v38 = vld [vmem:[%s20110_s9 + $0x38] sm:$0xff]  }
 0x4c1   :  { %v14004_v54 = vadd.f32 %v14003_v13, %v14002_v11  ;;  %14208 = vmatprep.subr.bf16.mxu0 %v15729_v47  ;;  %v15738_v47 = vld [vmem:[%s20110_s9 + $0x70] sm:$0xff]   ;;  %v15742_v13 = vld [vmem:[%s20110_s9 + $0x60] sm:$0xff]  }
 0x4c2   :  { %v14005_v60 = vpop.f32.mrf.mxu1  ;;  %v15739_v11 = vld [vmem:[%s20110_s9 + $0x30] sm:$0xff]  }
 0x4c3   :  { %v6168_v40 = vadd.f32 %v14004_v54, %v6167_v4  ;;  %15015 = vmatpush3.bf16.msra.mxu1 %v15730_v16  ;;  %v20152_v16 = vrot.slane %v17260_v10, 3  ;;  %v15743_v10 = vld [vmem:[%s20110_s9 + $0x20] sm:$0xff]  }
 0x4c4   :  { %v14006_v45 = vpop.f32.mrf.mxu1  ;;  %14209 = vmatpush3.bf16.msra.mxu0 %v15731_v21  ;;  %15016 = vmatprep.subr.bf16.mxu1 %v20134_v5  ;;  %v15744_v21 = vld [vmem:[%s20110_s9 + $0x58] sm:$0xff]  }
 0x4c5   :  { %14210 = vmatprep.subr.bf16.mxu0 %v15732_v3  ;;  %v6173_v4 = vadd.f32 %v6168_v40, %v18453_v39  ;;  %v8235_v39 = vsel %vm8233_vm3, %v17424_v34, %v17468_v41  ;;  %v15741_v41 = vld [vmem:[%s20110_s9 + $0x28] sm:$0xff]   ;;  %v15745_v3 = vld [vmem:[%s20110_s9 + $0x18] sm:$0xff]   ;;  %v15746_v40 = vld [vmem:[%s20110_s9 + $0x50] sm:$0xff]  }
 0x4c7   :  { %15017 = vmatpush3.bf16.msra.mxu1 %v15733_v49 }
 0x4c8   :  { %14211 = vmatpush3.bf16.msra.mxu0 %v15734_v63  ;;  %15018 = vmatprep.subr.bf16.mxu1 %v20134_v5 }
 0x4c9   :  { %14235 = vmatprep.subr.bf16.mxu0 %v15736_v12 }
 0x4cb   :  { %8038 = vmatmul.mubr.bf16.vlgmr.msra.gmra.mxu0 %v7859_v20  ;;  %15019 = vmatpush3.bf16.msra.mxu1 %v15735_v35 }
 0x4cc   :  { %14236 = vmatpush3.bf16.msra.mxu0 %v15737_v38  ;;  %8412 = vmatprep.mubr.bf16.mxu0 %v8235_v39  ;;  %v15747_v38 = vld [vmem:[%s20110_s9 + $0x10] sm:$0xff]  }
 0x4cd   :  { %14237 = vmatprep.subr.bf16.mxu0 %v15738_v47  ;;  %15024 = vmatprep.subr.mxu1 %v20134_v5  ;;  %v15748_v47 = vld [vmem:[%s20110_s9 + $0x48] sm:$0xff]  }
 0x4ce   :  { %15021 = vmatmul.mubr.msk.bf16.vlgmr.msra.gmra.mxu1 %vm3904_vm1, %v20152_v16  ;;  %v15749_v16 = vld [vmem:[%s20110_s9 + $0x8] sm:$0xff]  }
 0x4cf   :  { %15040 = vmatprep.mubr.msk.f32.mxu1 %vm16128_vm2, %v20134_v5 }
 0x4d0   :  { %14238 = vmatpush3.bf16.msra.mxu0 %v15739_v11 }
 0x4d1   :  { %14239 = vmatprep.subr.bf16.mxu0 %v15740_v48 }
 0x4d4   :  { %14240 = vmatpush3.bf16.msra.mxu0 %v15741_v41  ;;  %v15750_v41 = vld [vmem:[%s20110_s9 + $0x40] sm:$0xff]  }
 0x4d5   :  { %14241 = vmatprep.subr.bf16.mxu0 %v15742_v13  ;;  %v15751_v13 = vld [vmem:[%s20110_s9] sm:$0xff]  }
 0x4d7   :  { %v14032_v54 = vpop.f32.mrf.mxu0 }
 0x4d8   :  { %14242 = vmatpush3.bf16.msra.mxu0 %v15743_v10  ;;  %v15753_v10 = vld [vmem:[%s20110_s9 + $0xec] sm:$0xff]  }
 0x4d9   :  { %v14033_v60 = vpop.f32.mrf.mxu0  ;;  %14243 = vmatprep.subr.bf16.mxu0 %v15744_v21  ;;  %v15754_v21 = vld [vmem:[%s20110_s9 + $0x124] sm:$0xff]  }
 0x4da   :  { %v14034_v49 = vadd.f32 %v14033_v60, %v14032_v54  ;;  %v6444_v45 = vpop.f32.mrf.mxu1  ;;  %v8234_v54 = vsel %vm8233_vm3, %v17439_v44, %v17424_v34  ;;  %v15755_v60 = vld [vmem:[%s20110_s9 + $0xe4] sm:$0xff]   ;;  %v15757_v34 = vld [vmem:[%s20110_s9 + $0xdc] sm:$0xff]   ;;  %v15758_v44 = vld [vmem:[%s20110_s9 + $0x114] sm:$0xff]  }
 0x4db   :  { %v14035_v63 = vpop.f32.mrf.mxu0 }
 0x4dc   :  { %v6445_v12 = vadd.f32 %v14034_v49, %v6444_v45  ;;  %v14914_v35 = vpop.f32.mrf.mxu1  ;;  %14244 = vmatpush3.bf16.msra.mxu0 %v15745_v3  ;;  %v8527_v3 = vsel %vm8233_vm3, %v17464_v8, %v17511_v0  ;;  %v15759_v49 = vld [vmem:[%s20110_s9 + $0xd4] sm:$0xff]   ;;  %v15760_v63 = vld [vmem:[%s20110_s9 + $0x10c] sm:$0xff]  }
 0x4dd   :  { %v14036_v20 = vpop.f32.mrf.mxu0  ;;  %14245 = vmatprep.subr.bf16.mxu0 %v15746_v40  ;;  %v15756_v40 = vld [vmem:[%s20110_s9 + $0x11c] sm:$0xff]   ;;  %v15761_v35 = vld [vmem:[%s20110_s9 + $0xcc] sm:$0xff]  }
 0x4de   :  { %v6450_v39 = vadd.f32 %v6445_v12, %v6173_v4  ;;  %v6447_v11 = vpop.f32.mrf.mxu1  ;;  %v15752_v4 = vld [vmem:[%s20110_s9 + $0x12c] sm:$0xff]   ;;  %v15762_v20 = vld [vmem:[%s20110_s9 + $0x104] sm:$0xff]  }
 0x4e0   :  { %v14915_v48 = vpop.f32.mrf.mxu1  ;;  %14246 = vmatpush3.bf16.msra.mxu0 %v15747_v38 }
 0x4e1   :  { %14247 = vmatprep.subr.bf16.mxu0 %v15748_v47  ;;  %v15763_v48 = vld [vmem:[%s20110_s9 + $0xc4] sm:$0xff]  }
 0x4e4   :  { %14248 = vmatpush3.bf16.msra.mxu0 %v15749_v16 }
 0x4e5   :  { %14249 = vmatprep.subr.bf16.mxu0 %v15750_v41  ;;  %v15764_v41 = vld [vmem:[%s20110_s9 + $0xfc] sm:$0xff]  }
 0x4e8   :  { %14250 = vmatpush3.bf16.msra.mxu0 %v15751_v13 }
 0x4e9   :  { %14265 = vmatprep.subr.bf16.mxu0 %v15752_v4 }
 0x4eb   :  { %8413 = vmatmul.mubr.bf16.vlgmr.msra.gmra.mxu0 %v8234_v54  ;;  %v15766_v54 = vld [vmem:[%s20110_s9 + $0xf4] sm:$0xff]  }
 0x4ec   :  { %14266 = vmatpush3.bf16.msra.mxu0 %v15753_v10  ;;  %8704 = vmatprep.mubr.bf16.mxu0 %v8527_v3 }
 0x4ed   :  { %14267 = vmatprep.subr.bf16.mxu0 %v15754_v21  ;;  %v15765_v21 = vld [vmem:[%s20110_s9 + $0xbc] sm:$0xff]  }
 0x4f0   :  { %14268 = vmatpush3.bf16.msra.mxu0 %v15755_v60  ;;  %v15767_v60 = vld [vmem:[%s20110_s9 + $0xb4] sm:$0xff]  }
 0x4f1   :  { %14269 = vmatprep.subr.bf16.mxu0 %v15756_v40  ;;  %v15768_v40 = vld [vmem:[%s20110_s9 + $0x1e0] sm:$0xff]  }
 0x4f3   :  { %v6719_v0 = vpop.f32.mrf.mxu0 }
 0x4f4   :  { %14270 = vmatpush3.bf16.msra.mxu0 %v15757_v34  ;;  %v8096_v34 = vld [vmem:[%s20112_s11 + $0x38] sm:$0xff] }
 0x4f5   :  { %v14932_v45 = vpop.f32.mrf.mxu0  ;;  %14271 = vmatprep.subr.bf16.mxu0 %v15758_v44  ;;  %v15769_v44 = vld [vmem:[%s20110_s9 + $0x1a0] sm:$0xff]   ;;  %15025 = vmatpush3.msra.mxu1 %v8096_v34 }
 0x4f6   :  { %15026 = vmatprep.subr.mxu1 %v20134_v5  ;;  %v8813_v45 = vsel %vm8233_vm3, %v17505_v37, %v17543_v59  ;;  %v15774_v59 = vld [vmem:[%s20110_s9 + $0x1c8] sm:$0xff]  }
 0x4f7   :  { %v6722_v12 = vpop.f32.mrf.mxu0 }
 0x4f8   :  { %14272 = vmatpush3.bf16.msra.mxu0 %v15759_v49  ;;  %v8526_v49 = vsel %vm8233_vm3, %v17483_v43, %v17464_v8  ;;  %v15771_v12 = vld [vmem:[%s20110_s9 + $0x198] sm:$0xff]   ;;  %v15772_v8 = vld [vmem:[%s20110_s9 + $0x1d0] sm:$0xff]  }
 0x4f9   :  { %v14933_v38 = vpop.f32.mrf.mxu0  ;;  %14273 = vmatprep.subr.bf16.mxu0 %v15760_v63  ;;  %v8094_v63 = vld [vmem:[%s20112_s11 + $0x28] sm:$0xff]  ;;  %v15773_v43 = vld [vmem:[%s20110_s9 + $0x190] sm:$0xff]  }
 0x4fa   :  { %v14062_v47 = vpop.f32.mrf.mxu1  ;;  %v15775_v38 = vld [vmem:[%s20110_s9 + $0x188] sm:$0xff]  }
 0x4fc   :  { %v14063_v11 = vpop.f32.mrf.mxu1  ;;  %14274 = vmatpush3.bf16.msra.mxu0 %v15761_v35 }
 0x4fd   :  { %v14064_v16 = vadd.f32 %v14063_v11, %v14062_v47  ;;  %14275 = vmatprep.subr.bf16.mxu0 %v15762_v20  ;;  %v15776_v47 = vld [vmem:[%s20110_s9 + $0x1c0] sm:$0xff]  }
 0x4fe   :  { %v14065_v13 = vpop.f32.mrf.mxu1 }
 0x4ff   :  { %v6720_v4 = vadd.f32 %v14064_v16, %v6719_v0  ;;  %v15770_v0 = vld [vmem:[%s20110_s9 + $0x1d8] sm:$0xff]   ;;  %v8093_v16 = vld [vmem:[%s20112_s11 + $0x20] sm:$0xff] }
 0x500   :  { %v14066_v10 = vpop.f32.mrf.mxu1  ;;  %14276 = vmatpush3.bf16.msra.mxu0 %v15763_v48 }
 0x501   :  { %14277 = vmatprep.subr.bf16.mxu0 %v15764_v41  ;;  %v6725_v3 = vadd.f32 %v6720_v4, %v6450_v39  ;;  %v8095_v39 = vld [vmem:[%s20112_s11 + $0x30] sm:$0xff]  ;;  %v8092_v41 = vld [vmem:[%s20112_s11 + $0x18] sm:$0xff] }
 0x502   :  { %15027 = vmatpush3.msra.mxu1 %v8095_v39  ;;  %v8090_v39 = vld [vmem:[%s20112_s11 + $0x8] sm:$0xff] }
 0x503   :  { %15028 = vmatprep.subr.mxu1 %v20134_v5 }
 0x504   :  { %14278 = vmatpush3.bf16.msra.mxu0 %v15765_v21  ;;  %15029 = vmatpush3.msra.mxu1 %v8094_v63  ;;  %v15777_v21 = vld [vmem:[%s20110_s9 + $0x180] sm:$0xff]   ;;  %v15781_v63 = vld [vmem:[%s20110_s9 + $0x170] sm:$0xff]  }
 0x505   :  { %14279 = vmatprep.subr.bf16.mxu0 %v15766_v54  ;;  %15030 = vmatprep.subr.mxu1 %v20134_v5  ;;  %v8091_v54 = vld [vmem:[%s20112_s11 + $0x10] sm:$0xff] }
 0x506   :  { %15031 = vmatpush3.msra.mxu1 %v8093_v16 }
 0x507   :  { %15032 = vmatprep.subr.mxu1 %v20134_v5 }
 0x508   :  { %14280 = vmatpush3.bf16.msra.mxu0 %v15767_v60  ;;  %15033 = vmatpush3.msra.mxu1 %v8092_v41  ;;  %v15791_v41 = vld [vmem:[%s20110_s9 + $0x23c] sm:$0xff]  }
 0x509   :  { %14295 = vmatprep.subr.bf16.mxu0 %v15768_v40  ;;  %v15778_v40 = vld [vmem:[%s20110_s9 + $0x1b8] sm:$0xff]   ;;  %15034 = vmatprep.subr.mxu1 %v20134_v5 }
 0x50a   :  { %15035 = vmatpush3.msra.mxu1 %v8091_v54  ;;  %v15793_v54 = vld [vmem:[%s20110_s9 + $0x234] sm:$0xff]  }
 0x50b   :  { %8705 = vmatmul.mubr.bf16.vlgmr.msra.gmra.mxu0 %v8526_v49  ;;  %v15779_v49 = vld [vmem:[%s20110_s9 + $0x178] sm:$0xff]   ;;  %15036 = vmatprep.subr.mxu1 %v20134_v5 }
 0x50c   :  { %14296 = vmatpush3.bf16.msra.mxu0 %v15769_v44  ;;  %8990 = vmatprep.mubr.bf16.mxu0 %v8813_v45  ;;  %v15780_v45 = vld [vmem:[%s20110_s9 + $0x1b0] sm:$0xff]  }
 0x50d   :  { %14297 = vmatprep.subr.bf16.mxu0 %v15770_v0  ;;  %15037 = vmatpush3.msra.mxu1 %v8090_v39 }
 0x50e   :  { %15038 = vmatprep.subr.mxu1 %v20134_v5 }
 0x510   :  { %14298 = vmatpush3.bf16.msra.mxu0 %v15771_v12  ;;  %v15782_v12 = vld [vmem:[%s20110_s9 + $0x1a8] sm:$0xff]  }
 0x511   :  { %14299 = vmatprep.subr.bf16.mxu0 %v15772_v8  ;;  %v15783_v8 = vld [vmem:[%s20110_s9 + $0x168] sm:$0xff]  }
 0x513   :  { %v14092_v35 = vpop.f32.mrf.mxu0 }
 0x514   :  { %14300 = vmatpush3.bf16.msra.mxu0 %v15773_v43  ;;  %v15784_v43 = vld [vmem:[%s20110_s9 + $0x294] sm:$0xff]  }
 0x515   :  { %v14093_v20 = vpop.f32.mrf.mxu0  ;;  %14301 = vmatprep.subr.bf16.mxu0 %v15774_v59  ;;  %v15785_v59 = vld [vmem:[%s20110_s9 + $0x254] sm:$0xff]  }
 0x516   :  { %v14094_v11 = vadd.f32 %v14093_v20, %v14092_v35  ;;  %v6991_v48 = vpop.f32.mrf.mxu1  ;;  %v15786_v35 = vld [vmem:[%s20110_s9 + $0x28c] sm:$0xff]   ;;  %v9099_v20 = vsel %vm8233_vm3, %v17538_v31, %v17573_v18  ;;  %v15790_v18 = vld [vmem:[%s20110_s9 + $0x27c] sm:$0xff]  }
 0x517   :  { %v14095_v13 = vpop.f32.mrf.mxu0 }
 0x518   :  { %v6992_v4 = vadd.f32 %v14094_v11, %v6991_v48  ;;  %v14950_v10 = vpop.f32.mrf.mxu1  ;;  %14302 = vmatpush3.bf16.msra.mxu0 %v15775_v38  ;;  %v8812_v38 = vsel %vm8233_vm3, %v17521_v14, %v17505_v37  ;;  %v15788_v11 = vld [vmem:[%s20110_s9 + $0x284] sm:$0xff]  }
 0x519   :  { %v14096_v60 = vpop.f32.mrf.mxu0  ;;  %14303 = vmatprep.subr.bf16.mxu0 %v15776_v47  ;;  %v15787_v47 = vld [vmem:[%s20110_s9 + $0x24c] sm:$0xff]   ;;  %v15789_v37 = vld [vmem:[%s20110_s9 + $0x244] sm:$0xff]  }
 0x51a   :  { %v6997_v34 = vadd.f32 %v6992_v4, %v6725_v3  ;;  %v6994_v44 = vpop.f32.mrf.mxu1  ;;  %v8089_v3 = vld [vmem:[%s20112_s11] sm:$0xff]  ;;  %v15792_v4 = vld [vmem:[%s20110_s9 + $0x274] sm:$0xff]  }
 0x51b   :  { %15039 = vmatpush3.msra.mxu1 %v8089_v3  ;;  %v15796_v3 = vld [vmem:[%s20110_s9 + $0x264] sm:$0xff]  }
 0x51c   :  { %v14951_v0 = vpop.f32.mrf.mxu1  ;;  %14304 = vmatpush3.bf16.msra.mxu0 %v15777_v21  ;;  %15043 = vmatprep.subr.bf16.mxu1 %v20134_v5 }
 0x51d   :  { %14305 = vmatprep.subr.bf16.mxu0 %v15778_v40  ;;  %v15794_v40 = vld [vmem:[%s20110_s9 + $0x26c] sm:$0xff]  }
 0x520   :  { %14306 = vmatpush3.bf16.msra.mxu0 %v15779_v49  ;;  %v15795_v49 = vld [vmem:[%s20110_s9 + $0x22c] sm:$0xff]  }
 0x521   :  { %14307 = vmatprep.subr.bf16.mxu0 %v15780_v45 }
 0x524   :  { %14308 = vmatpush3.bf16.msra.mxu0 %v15781_v63  ;;  %v15797_v63 = vld [vmem:[%s20110_s9 + $0x224] sm:$0xff]  }
 0x525   :  { %14309 = vmatprep.subr.bf16.mxu0 %v15782_v12  ;;  %v15798_v12 = vld [vmem:[%s20110_s9 + $0x25c] sm:$0xff]  }
 0x528   :  { %14310 = vmatpush3.bf16.msra.mxu0 %v15783_v8  ;;  %v15799_v8 = vld [vmem:[%s20110_s9 + $0x21c] sm:$0xff]  }
 0x529   :  { %14325 = vmatprep.subr.bf16.mxu0 %v15784_v43 }
 0x52b   :  { %8991 = vmatmul.mubr.bf16.vlgmr.msra.gmra.mxu0 %v8812_v38 }
 0x52c   :  { %14326 = vmatpush3.bf16.msra.mxu0 %v15785_v59  ;;  %9276 = vmatprep.mubr.bf16.mxu0 %v9099_v20  ;;  %v9098_v59 = vsel %vm8233_vm3, %v17552_v53, %v17538_v31  ;;  %v15802_v20 = vld [vmem:[%s20110_s9 + $0x370] sm:$0xff]  }
 0x52d   :  { %14327 = vmatprep.subr.bf16.mxu0 %v15786_v35  ;;  %v15801_v35 = vld [vmem:[%s20110_s9 + $0x378] sm:$0xff]  }
 0x52f   :  { %v7263_v48 = vpop.f32.mrf.mxu0 }
 0x530   :  { %14328 = vmatpush3.bf16.msra.mxu0 %v15787_v47 }
 0x531   :  { %v14968_v14 = vpop.f32.mrf.mxu0  ;;  %14329 = vmatprep.subr.bf16.mxu0 %v15788_v11 }
 0x533   :  { %v7266_v16 = vpop.f32.mrf.mxu0 }
 0x534   :  { %14330 = vmatpush3.bf16.msra.mxu0 %v15789_v37  ;;  %v15804_v16 = vld [vmem:[%s20110_s9 + $0x360] sm:$0xff]  }
 0x535   :  { %v14969_v13 = vpop.f32.mrf.mxu0  ;;  %14331 = vmatprep.subr.bf16.mxu0 %v15790_v18 }
 0x536   :  { %v14122_v10 = vpop.f32.mrf.mxu1  ;;  %v15806_v13 = vld [vmem:[%s20110_s9 + $0x350] sm:$0xff]  }
 0x538   :  { %v14123_v21 = vpop.f32.mrf.mxu1  ;;  %14332 = vmatpush3.bf16.msra.mxu0 %v15791_v41  ;;  %v15805_v41 = vld [vmem:[%s20110_s9 + $0x358] sm:$0xff]  }
 0x539   :  { %v14124_v60 = vadd.f32 %v14123_v21, %v14122_v10  ;;  %14333 = vmatprep.subr.bf16.mxu0 %v15792_v4  ;;  %v15807_v4 = vld [vmem:[%s20110_s9 + $0x3fc] sm:$0xff]   ;;  %v15809_v21 = vld [vmem:[%s20110_s9 + $0x3f4] sm:$0xff]  }
 0x53a   :  { %v14125_v44 = vpop.f32.mrf.mxu1  ;;  %v15808_v10 = vld [vmem:[%s20110_s9 + $0x3bc] sm:$0xff]  }
 0x53b   :  { %v7264_v39 = vadd.f32 %v14124_v60, %v7263_v48  ;;  %v15803_v48 = vld [vmem:[%s20110_s9 + $0x368] sm:$0xff]   ;;  %v9671_v60 = vsel %vm8233_vm3, %v17606_v17, %v17640_v27 }
 0x53c   :  { %v14126_v0 = vpop.f32.mrf.mxu1  ;;  %14334 = vmatpush3.bf16.msra.mxu0 %v15793_v54  ;;  %v9386_v54 = vsel %vm8233_vm3, %v17568_v61, %v17611_v1  ;;  %v15811_v44 = vld [vmem:[%s20110_s9 + $0x3ec] sm:$0xff]   ;;  %v15813_v27 = vld [vmem:[%s20110_s9 + $0x3e4] sm:$0xff]  }
 0x53d   :  { %14335 = vmatprep.subr.bf16.mxu0 %v15794_v40  ;;  %v18802_v45 = vadd.f32 %v7264_v39, %v6997_v34  ;;  %v15800_v34 = vld [vmem:[%s20110_s9 + $0x380] ss:$0 sps:$4 sm:$0xff]   ;;  %v15810_v40 = vld [vmem:[%s20110_s9 + $0x3b4] sm:$0xff]   ;;  %v15812_v61 = vld [vmem:[%s20110_s9 + $0x3ac] sm:$0xff]  }
 0x53e   :  { %v9528_v43 = vsel %vm167_vm4, %v15800_v34, 0  ;;  %v15816_v34 = vld [vmem:[%s20110_s9 + $0x39c] sm:$0xff]  }
 0x540   :  { %14336 = vmatpush3.bf16.msra.mxu0 %v15795_v49  ;;  %v15814_v49 = vld [vmem:[%s20110_s9 + $0x3a4] sm:$0xff]  }
 0x541   :  { %14337 = vmatprep.subr.bf16.mxu0 %v15796_v3 }
 0x544   :  { %14338 = vmatpush3.bf16.msra.mxu0 %v15797_v63  ;;  %v15815_v63 = vld [vmem:[%s20110_s9 + $0x3dc] sm:$0xff]  }
 0x545   :  { %14339 = vmatprep.subr.bf16.mxu0 %v15798_v12 }
 0x548   :  { %14340 = vmatpush3.bf16.msra.mxu0 %v15799_v8 }
 0x549   :  { %15115 = vmatprep.subr.bf16.mxu0 %v20134_v5 }
 0x54b   :  { %9277 = vmatmul.mubr.bf16.vlgmr.msra.gmra.mxu0 %v9098_v59 }
 0x54c   :  { %15116 = vmatpush3.bf16.msra.mxu0 %v9528_v43  ;;  %15129 = vmatprep.mubr.msk.bf16.mxu0 %vm16128_vm2, %v20134_v5  ;;  %v15817_v43 = vld [vmem:[%s20110_s9 + $0x3d4] sm:$0xff]  }
 0x54d   :  { %15117 = vmatprep.subr.bf16.mxu0 %v20134_v5 }
 0x54f   :  { %v18827_v38 = vpop.f32.mrf.mxu0 }
 0x550   :  { %15118 = vmatpush3.bf16.msra.mxu0 %v15801_v35 }
 0x551   :  { %v18832_v47 = vpop.f32.mrf.mxu0  ;;  %15119 = vmatprep.subr.bf16.mxu0 %v20134_v5 }
 0x552   :  { %v18835_v31 = vpop.f32.mrf.mxu1 }
 0x553   :  { %v14155_v53 = vpop.f32.mrf.mxu0 }
 0x554   :  { %v14986_v11 = vpop.f32.mrf.mxu1  ;;  %15120 = vmatpush3.bf16.msra.mxu0 %v15802_v20  ;;  %v15818_v20 = vld [vmem:[%s20110_s9 + $0x394] sm:$0xff]   ;;  %v15819_v53 = vld [vmem:[%s20110_s9 + $0x3cc] sm:$0xff]  }
 0x555   :  { %v14156_v37 = vpop.f32.mrf.mxu0  ;;  %15121 = vmatprep.subr.bf16.mxu0 %v20134_v5  ;;  %v15820_v11 = vld [vmem:[%s20110_s9 + $0x38c] sm:$0xff]  }
 0x556   :  { %v7538_v14 = vpop.f32.mrf.mxu1  ;;  %v15822_v37 = vld [vmem:[%s20110_s9 + $0x384] sm:$0xff]  }
 0x557   :  { %v15823_v14 = vld [vmem:[%s20110_s9 + $0x4e8] ss:$0 sps:$4 sm:$0xff]  }
 0x558   :  { %v14987_v18 = vpop.f32.mrf.mxu1  ;;  %15122 = vmatpush3.bf16.msra.mxu0 %v15803_v48  ;;  %v15821_v48 = vld [vmem:[%s20110_s9 + $0x3c4] sm:$0xff]  }
 0x559   :  { %15123 = vmatprep.subr.bf16.mxu0 %v20134_v5  ;;  %v10100_v18 = vsel %vm167_vm4, %v15823_v14, 0  ;;  %v9958_v14 = vsel %vm8233_vm3, %v17635_v24, %v17672_v46  ;;  %v15837_v24 = vld [vmem:[%s20110_s9 + $0x90] sm:$0xff]  }
 0x55a   :  { %v15839_v46 = vld [vmem:[%s20110_s9 + $0x554] sm:$0xff]  }
 0x55c   :  { %15124 = vmatpush3.bf16.msra.mxu0 %v15804_v16  ;;  %v9670_v16 = vsel %vm8233_vm3, %v17620_v7, %v17606_v17  ;;  %v15825_v17 = vld [vmem:[%s20110_s9 + $0x4d8] sm:$0xff]  }
 0x55d   :  { %15125 = vmatprep.subr.bf16.mxu0 %v20134_v5 }
 0x560   :  { %15126 = vmatpush3.bf16.msra.mxu0 %v15805_v41  ;;  %v14154_v41 = vadd.f32 %v18832_v47, %v18827_v38 }
 0x561   :  { %15127 = vmatprep.subr.bf16.mxu0 %v20134_v5 }
 0x564   :  { %15128 = vmatpush3.bf16.msra.mxu0 %v15806_v13 }
 0x565   :  { %14385 = vmatprep.subr.bf16.mxu0 %v15807_v4  ;;  %v15824_v4 = vld [vmem:[%s20110_s9 + $0x4e0] sm:$0xff]  }
 0x567   :  { %15130 = vmatmul.mubr.msk.bf16.vlgmr.msra.gmra.mxu0 %vm3904_vm1, %v9386_v54 }
 0x568   :  { %14386 = vmatpush3.bf16.msra.mxu0 %v15808_v10  ;;  %9848 = vmatprep.mubr.bf16.mxu0 %v9671_v60  ;;  %v7536_v10 = vadd.f32 %v14154_v41, %v18835_v31  ;;  %v15826_v31 = vld [vmem:[%s20110_s9 + $0x4d0] sm:$0xff]   ;;  %v15840_v41 = vld [vmem:[%s20110_s9 + $0x88] sm:$0xff]  }
 0x569   :  { %14387 = vmatprep.subr.bf16.mxu0 %v15809_v21 }
 0x56a   :  { %v7541_v38 = vadd.f32 %v7536_v10, %v18802_v45  ;;  %v15844_v10 = vld [vmem:[%s20110_s9 + $0x50c] sm:$0xff]  }
 0x56b   :  { %v7807_v39 = vpop.f32.mrf.mxu0 }
 0x56c   :  { %14388 = vmatpush3.bf16.msra.mxu0 %v15810_v40 }
 0x56d   :  { %v15004_v1 = vpop.f32.mrf.mxu0  ;;  %14389 = vmatprep.subr.bf16.mxu0 %v15811_v44 }
 0x56f   :  { %v7810_v0 = vpop.f32.mrf.mxu0 }
 0x570   :  { %14390 = vmatpush3.bf16.msra.mxu0 %v15812_v61 }
 0x571   :  { %v15005_v3 = vpop.f32.mrf.mxu0  ;;  %14391 = vmatprep.subr.bf16.mxu0 %v15813_v27 }
 0x572   :  { %v14182_v12 = vpop.f32.mrf.mxu1 }
 0x574   :  { %v14183_v8 = vpop.f32.mrf.mxu1  ;;  %14392 = vmatpush3.bf16.msra.mxu0 %v15814_v49  ;;  %v15827_v49 = vld [vmem:[%s20110_s9 + $0xb0] ss:$0 sps:$4 sm:$0xff]  }
 0x575   :  { %14393 = vmatprep.subr.bf16.mxu0 %v15815_v63  ;;  %v14184_v13 = vadd.f32 %v14183_v8, %v14182_v12  ;;  %v15828_v12 = vld [vmem:[%s20110_s9 + $0x4c8] sm:$0xff]  }
 0x576   :  { %v14185_v59 = vpop.f32.mrf.mxu1 }
 0x577   :  { %v7808_v54 = vadd.f32 %v14184_v13, %v7807_v39  ;;  %v8086_v39 = vld [vmem:[%s20111_s10] sm:$0x1]  ;;  %v15829_v59 = vld [vmem:[%s20110_s9 + $0xa8] sm:$0xff]  }
 0x578   :  { %v14186_v35 = vpop.f32.mrf.mxu1  ;;  %14394 = vmatpush3.bf16.msra.mxu0 %v15816_v34  ;;  %v8378_v34 = vsel %vm167_vm4, %v15827_v49, 0  ;;  %v15842_v13 = vld [vmem:[%s20110_s9 + $0x54c] sm:$0xff]  }
 0x579   :  { %14395 = vmatprep.subr.bf16.mxu0 %v15817_v43  ;;  %v7813_v44 = vadd.f32 %v7808_v54, %v7541_v38  ;;  %v15830_v43 = vld [vmem:[%s20110_s9 + $0x4c0] sm:$0xff]   ;;  %v15832_v35 = vld [vmem:[%s20110_s9 + $0x4b8] sm:$0xff]   ;;  %v15855_v49 = vld [vmem:[%s20110_s9 + $0x14c] sm:$0xff]  }
 0x57a   :  { %v15843_v54 = vld [vmem:[%s20110_s9 + $0x80] sm:$0xff]  }
 0x57b   :  { %v15846_v38 = vld [vmem:[%s20110_s9 + $0x164] ss:$0 sps:$4 sm:$0xff]  }
 0x57c   :  { %14396 = vmatpush3.bf16.msra.mxu0 %v15818_v20  ;;  %v15831_v20 = vld [vmem:[%s20110_s9 + $0xa0] sm:$0xff]  }
 0x57d   :  { %14397 = vmatprep.subr.bf16.mxu0 %v15819_v53  ;;  %v15833_v53 = vld [vmem:[%s20110_s9 + $0x564] sm:$0xff]  }
 0x580   :  { %14398 = vmatpush3.bf16.msra.mxu0 %v15820_v11  ;;  %v15835_v11 = vld [vmem:[%s20110_s9 + $0x524] sm:$0xff]  }
 0x581   :  { %14399 = vmatprep.subr.bf16.mxu0 %v15821_v48  ;;  %v15834_v48 = vld [vmem:[%s20110_s9 + $0x98] sm:$0xff]  }
 0x584   :  { %14400 = vmatpush3.bf16.msra.mxu0 %v15822_v37  ;;  %v15836_v37 = vld [vmem:[%s20110_s9 + $0x55c] sm:$0xff]  }
 0x585   :  { %15151 = vmatprep.subr.bf16.mxu0 %v20134_v5 }
 0x587   :  { %9849 = vmatmul.mubr.bf16.vlgmr.msra.gmra.mxu0 %v9670_v16  ;;  %v15838_v16 = vld [vmem:[%s20110_s9 + $0x51c] sm:$0xff]  }
 0x588   :  { %15152 = vmatpush3.bf16.msra.mxu0 %v10100_v18  ;;  %15165 = vmatprep.mubr.msk.bf16.mxu0 %vm16128_vm2, %v20134_v5  ;;  %v10243_v18 = vsel %vm8233_vm3, %v17667_v22, %v17710_v29  ;;  %v15841_v29 = vld [vmem:[%s20110_s9 + $0x514] sm:$0xff]  }
 0x589   :  { %15153 = vmatprep.subr.bf16.mxu0 %v20134_v5 }
 0x58b   :  { %v14212_v21 = vpop.f32.mrf.mxu0 }
 0x58c   :  { %15154 = vmatpush3.bf16.msra.mxu0 %v15824_v4 }
 0x58d   :  { %v14213_v7 = vpop.f32.mrf.mxu0  ;;  %15155 = vmatprep.subr.bf16.mxu0 %v20134_v5 }
 0x58e   :  { %v14214_v47 = vadd.f32 %v14213_v7, %v14212_v21  ;;  %v8079_v60 = vpop.f32.mrf.mxu1 }
 0x58f   :  { %v14215_v40 = vpop.f32.mrf.mxu0 }
 0x590   :  { %v8080_v61 = vadd.f32 %v14214_v47, %v8079_v60  ;;  %v15022_v1 = vpop.f32.mrf.mxu1  ;;  %15156 = vmatpush3.bf16.msra.mxu0 %v15825_v17  ;;  %v15845_v17 = vld [vmem:[%s20110_s9 + $0x544] sm:$0xff]  }
 0x591   :  { %v14216_v27 = vpop.f32.mrf.mxu0  ;;  %15157 = vmatprep.subr.bf16.mxu0 %v20134_v5  ;;  %v15847_v60 = vld [vmem:[%s20110_s9 + $0x504] sm:$0xff]   ;;  %v15850_v1 = vld [vmem:[%s20110_s9 + $0x4fc] sm:$0xff]  }
 0x592   :  { %v8085_v0 = vadd.f32 %v8080_v61, %v7813_v44  ;;  %v8082_v45 = vpop.f32.mrf.mxu1  ;;  %v15848_v44 = vld [vmem:[%s20110_s9 + $0x53c] sm:$0xff]   ;;  %v8670_v61 = vsel %vm167_vm4, %v15846_v38, 0  ;;  %v15852_v27 = vld [vmem:[%s20110_s9 + $0x154] sm:$0xff]   ;;  %v15878_v38 = vld [vmem:[%s20110_s9 + $0x1e8] sm:$0xff]  }
 0x593   :  { %v15856_v45 = vld [vmem:[%s20110_s9 + $0x4ec] sm:$0xff]  }
 0x594   :  { %v8087_v3 = vadd.f32 %v8086_v39, %v8085_v0  ;;  %v15023_v63 = vpop.f32.mrf.mxu1  ;;  %15158 = vmatpush3.bf16.msra.mxu0 %v15826_v31  ;;  %v15849_v31 = vld [vmem:[%s20110_s9 + $0x15c] sm:$0xff]   ;;  %v15851_v39 = vld [vmem:[%s20110_s9 + $0x534] sm:$0xff]   ;;  %v15854_v0 = vld [vmem:[%s20110_s9 + $0x52c] sm:$0xff]  }
 0x595   :  { %15159 = vmatprep.subr.bf16.mxu0 %v20134_v5  ;;  %v15857_v63 = vld [vmem:[%s20110_s9 + $0x144] sm:$0xff]  }
 0x596   :  { %v8088_v8 = vmax.f32 %v8087_v3, 0.0  ;;  %v15858_v3 = vld [vmem:[%s20110_s9 + $0x650] ss:$0 sps:$4 sm:$0xff]  }
 0x598   :  { %15041 = vmatmul.mubr.msk.f32.vlgmr.msra.gmra.mxu1 %vm8098_vm5, %v8088_v8  ;;  %15160 = vmatpush3.bf16.msra.mxu0 %v15828_v12  ;;  %v10675_v12 = vsel %vm167_vm4, %v15858_v3, 0  ;;  %v10242_v8 = vsel %vm8233_vm3, %v17684_v51, %v17667_v22  ;;  %v15862_v22 = vld [vmem:[%s20110_s9 + $0x640] sm:$0xff]   ;;  %v15861_v51 = vld [vmem:[%s20110_s9 + $0x134] sm:$0xff]  }
 0x599   :  { %15044 = vmatpush3.bf16.msra.mxu1 %v8378_v34  ;;  %15161 = vmatprep.subr.bf16.mxu0 %v20134_v5  ;;  %v15860_v34 = vld [vmem:[%s20110_s9 + $0x648] sm:$0xff]   ;;  %v15887_v3 = vld [vmem:[%s20110_s9 + $0x2bc] sm:$0xff]  }
 0x59a   :  { %15045 = vmatprep.subr.bf16.mxu1 %v20134_v5  ;;  %15057 = vmatprep.mubr.msk.bf16.mxu1 %vm16128_vm2, %v20134_v5 }
 0x59c   :  { %15162 = vmatpush3.bf16.msra.mxu0 %v15830_v43  ;;  %v15859_v43 = vld [vmem:[%s20110_s9 + $0x13c] sm:$0xff]  }
 0x59d   :  { %15046 = vmatpush3.bf16.msra.mxu1 %v15829_v59  ;;  %15163 = vmatprep.subr.bf16.mxu0 %v20134_v5  ;;  %v15863_v59 = vld [vmem:[%s20110_s9 + $0x218] ss:$0 sps:$4 sm:$0xff]  }
 0x59e   :  { %15047 = vmatprep.subr.bf16.mxu1 %v20134_v5 }
 0x5a0   :  { %15164 = vmatpush3.bf16.msra.mxu0 %v15832_v35 }
 0x5a1   :  { %15048 = vmatpush3.bf16.msra.mxu1 %v15831_v20  ;;  %14445 = vmatprep.subr.bf16.mxu0 %v15833_v53  ;;  %v15864_v20 = vld [vmem:[%s20110_s9 + $0x638] sm:$0xff]  }
 0x5a2   :  { %15049 = vmatprep.subr.bf16.mxu1 %v20134_v5 }
 0x5a3   :  { %15166 = vmatmul.mubr.msk.bf16.vlgmr.msra.gmra.mxu0 %vm3904_vm1, %v9958_v14  ;;  %v15866_v14 = vld [vmem:[%s20110_s9 + $0x630] sm:$0xff]  }
 0x5a4   :  { %14446 = vmatpush3.bf16.msra.mxu0 %v15835_v11  ;;  %10420 = vmatprep.mubr.bf16.mxu0 %v10243_v18 }
 0x5a5   :  { %15050 = vmatpush3.bf16.msra.mxu1 %v15834_v48  ;;  %14447 = vmatprep.subr.bf16.mxu0 %v15836_v37  ;;  %v8956_v48 = vsel %vm167_vm4, %v15863_v59, 0  ;;  %v15895_v59 = vld [vmem:[%s20110_s9 + $0x2a4] sm:$0xff]  }
 0x5a6   :  { %15051 = vmatprep.subr.bf16.mxu1 %v20134_v5 }
 0x5a8   :  { %14448 = vmatpush3.bf16.msra.mxu0 %v15838_v16  ;;  %v15865_v16 = vld [vmem:[%s20110_s9 + $0x210] sm:$0xff]  }
 0x5a9   :  { %15052 = vmatpush3.bf16.msra.mxu1 %v15837_v24  ;;  %14449 = vmatprep.subr.bf16.mxu0 %v15839_v46  ;;  %v15867_v24 = vld [vmem:[%s20110_s9 + $0x208] sm:$0xff]   ;;  %v15870_v46 = vld [vmem:[%s20110_s9 + $0x620] sm:$0xff]  }
 0x5aa   :  { %15053 = vmatprep.subr.bf16.mxu1 %v20134_v5 }
 0x5ab   :  { %v14251_v4 = vpop.f32.mrf.mxu0 }
 0x5ac   :  { %14450 = vmatpush3.bf16.msra.mxu0 %v15841_v29  ;;  %v15869_v29 = vld [vmem:[%s20110_s9 + $0x200] sm:$0xff]  }
 0x5ad   :  { %15054 = vmatpush3.bf16.msra.mxu1 %v15840_v41  ;;  %v14252_v21 = vpop.f32.mrf.mxu0  ;;  %14451 = vmatprep.subr.bf16.mxu0 %v15842_v13  ;;  %v15871_v41 = vld [vmem:[%s20110_s9 + $0x6cc] sm:$0xff]  }
 0x5ae   :  { %v19013_v7 = vadd.f32 %v14252_v21, %v14251_v4  ;;  %15055 = vmatprep.subr.bf16.mxu1 %v20134_v5  ;;  %v15873_v13 = vld [vmem:[%s20110_s9 + $0x68c] sm:$0xff]   ;;  %v15872_v4 = vld [vmem:[%s20110_s9 + $0x1f8] sm:$0xff]   ;;  %v10533_v21 = vsel %vm8233_vm3, %v17705_v9, %v17745_v57 }
 0x5af   :  { %v14254_v47 = vpop.f32.mrf.mxu0  ;;  %v15875_v9 = vld [vmem:[%s20110_s9 + $0x1f0] sm:$0xff]   ;;  %v15877_v57 = vld [vmem:[%s20110_s9 + $0x6bc] sm:$0xff]  }
 0x5b0   :  { %14452 = vmatpush3.bf16.msra.mxu0 %v15844_v10  ;;  %v15874_v10 = vld [vmem:[%s20110_s9 + $0x6c4] sm:$0xff]   ;;  %v15880_v47 = vld [vmem:[%s20110_s9 + $0x6b4] sm:$0xff]  }
 0x5b1   :  { %15056 = vmatpush3.bf16.msra.mxu1 %v15843_v54  ;;  %v14255_v40 = vpop.f32.mrf.mxu0  ;;  %14453 = vmatprep.subr.bf16.mxu0 %v15845_v17  ;;  %v10824_v54 = vsel %vm8233_vm3, %v17738_v28, %v17774_v33  ;;  %v15876_v17 = vld [vmem:[%s20110_s9 + $0x684] sm:$0xff]   ;;  %v15879_v33 = vld [vmem:[%s20110_s9 + $0x67c] sm:$0xff]  }
 0x5b2   :  { %15061 = vmatprep.subr.bf16.mxu1 %v20134_v5  ;;  %v15882_v40 = vld [vmem:[%s20110_s9 + $0x674] sm:$0xff]  }
 0x5b4   :  { %15058 = vmatmul.mubr.msk.bf16.vlgmr.msra.gmra.mxu1 %vm3904_vm1, %v17500_v42  ;;  %14454 = vmatpush3.bf16.msra.mxu0 %v15847_v60  ;;  %v15853_v42 = vld [vmem:[%s20110_s9 + $0x4f4] sm:$0xff]   ;;  %v15881_v60 = vld [vmem:[%s20110_s9 + $0x2cc] ss:$0 sps:$4 sm:$0xff]  }
 0x5b5   :  { %15062 = vmatpush3.bf16.msra.mxu1 %v8670_v61  ;;  %14455 = vmatprep.subr.bf16.mxu0 %v15848_v44  ;;  %v15883_v44 = vld [vmem:[%s20110_s9 + $0x6ac] sm:$0xff]   ;;  %v9242_v61 = vsel %vm167_vm4, %v15881_v60, 0 }
 0x5b6   :  { %15063 = vmatprep.subr.bf16.mxu1 %v20134_v5  ;;  %15075 = vmatprep.mubr.msk.bf16.mxu1 %vm16128_vm2, %v20134_v5  ;;  %v15919_v60 = vld [vmem:[%s20110_s9 + $0x82c] sm:$0xff]  }
 0x5b8   :  { %14456 = vmatpush3.bf16.msra.mxu0 %v15850_v1 }
 0x5b9   :  { %15064 = vmatpush3.bf16.msra.mxu1 %v15849_v31  ;;  %14457 = vmatprep.subr.bf16.mxu0 %v15851_v39  ;;  %v15885_v31 = vld [vmem:[%s20110_s9 + $0x66c] sm:$0xff]  }
 0x5ba   :  { %15065 = vmatprep.subr.bf16.mxu1 %v20134_v5 }
 0x5bc   :  { %14458 = vmatpush3.bf16.msra.mxu0 %v15853_v42  ;;  %v15884_v42 = vld [vmem:[%s20110_s9 + $0x2c4] sm:$0xff]  }
 0x5bd   :  { %15066 = vmatpush3.bf16.msra.mxu1 %v15852_v27  ;;  %14459 = vmatprep.subr.bf16.mxu0 %v15854_v0  ;;  %v15886_v27 = vld [vmem:[%s20110_s9 + $0x6a4] sm:$0xff]  }
 0x5be   :  { %15067 = vmatprep.subr.bf16.mxu1 %v20134_v5 }
 0x5c0   :  { %14460 = vmatpush3.bf16.msra.mxu0 %v15856_v45  ;;  %v15888_v45 = vld [vmem:[%s20110_s9 + $0x664] sm:$0xff]  }
 0x5c1   :  { %15068 = vmatpush3.bf16.msra.mxu1 %v15855_v49  ;;  %15187 = vmatprep.subr.bf16.mxu0 %v20134_v5 }
 0x5c2   :  { %15069 = vmatprep.subr.bf16.mxu1 %v20134_v5 }
 0x5c3   :  { %10421 = vmatmul.mubr.bf16.vlgmr.msra.gmra.mxu0 %v10242_v8  ;;  %v15890_v8 = vld [vmem:[%s20110_s9 + $0x2b4] sm:$0xff]  }
 0x5c4   :  { %15188 = vmatpush3.bf16.msra.mxu0 %v10675_v12  ;;  %15201 = vmatprep.mubr.msk.bf16.mxu0 %vm16128_vm2, %v20134_v5  ;;  %v15891_v12 = vld [vmem:[%s20110_s9 + $0x65c] sm:$0xff]  }
 0x5c5   :  { %15070 = vmatpush3.bf16.msra.mxu1 %v15857_v63  ;;  %15189 = vmatprep.subr.bf16.mxu0 %v20134_v5  ;;  %v15889_v63 = vld [vmem:[%s20110_s9 + $0x69c] sm:$0xff]  }
 0x5c6   :  { %15071 = vmatprep.subr.bf16.mxu1 %v20134_v5 }
 0x5c8   :  { %15190 = vmatpush3.bf16.msra.mxu0 %v15860_v34  ;;  %v15892_v34 = vld [vmem:[%s20110_s9 + $0x694] sm:$0xff]  }
 0x5c9   :  { %15072 = vmatpush3.bf16.msra.mxu1 %v15859_v43  ;;  %15191 = vmatprep.subr.bf16.mxu0 %v20134_v5  ;;  %v15894_v43 = vld [vmem:[%s20110_s9 + $0x654] sm:$0xff]  }
 0x5ca   :  { %15073 = vmatprep.subr.bf16.mxu1 %v20134_v5 }
 0x5cb   :  { %v14281_v35 = vpop.f32.mrf.mxu0 }
 0x5cc   :  { %15192 = vmatpush3.bf16.msra.mxu0 %v15862_v22  ;;  %v15893_v22 = vld [vmem:[%s20110_s9 + $0x2ac] sm:$0xff]  }
 0x5cd   :  { %15074 = vmatpush3.bf16.msra.mxu1 %v15861_v51  ;;  %v14282_v53 = vpop.f32.mrf.mxu0  ;;  %15193 = vmatprep.subr.bf16.mxu0 %v20134_v5  ;;  %v15896_v51 = vld [vmem:[%s20110_s9 + $0x7b8] ss:$0 sps:$4 sm:$0xff]  }
 0x5ce   :  { %v19095_v11 = vadd.f32 %v14282_v53, %v14281_v35  ;;  %15079 = vmatprep.subr.bf16.mxu1 %v20134_v5  ;;  %v11253_v35 = vsel %vm167_vm4, %v15896_v51, 0  ;;  %v15898_v53 = vld [vmem:[%s20110_s9 + $0x7b0] sm:$0xff]   ;;  %v15933_v51 = vld [vmem:[%s20110_s9 + $0x424] sm:$0xff]  }
 0x5cf   :  { %v14284_v37 = vpop.f32.mrf.mxu0 }
 0x5d0   :  { %15076 = vmatmul.mubr.msk.bf16.vlgmr.msra.gmra.mxu1 %vm3904_vm1, %v17533_v58  ;;  %15194 = vmatpush3.bf16.msra.mxu0 %v15864_v20  ;;  %v15868_v58 = vld [vmem:[%s20110_s9 + $0x628] sm:$0xff]   ;;  %v10823_v20 = vsel %vm8233_vm3, %v17754_v55, %v17738_v28 }
 0x5d1   :  { %15080 = vmatpush3.bf16.msra.mxu1 %v8956_v48  ;;  %v14285_v18 = vpop.f32.mrf.mxu0  ;;  %15195 = vmatprep.subr.bf16.mxu0 %v20134_v5  ;;  %v15897_v48 = vld [vmem:[%s20110_s9 + $0x29c] sm:$0xff]   ;;  %v15899_v28 = vld [vmem:[%s20110_s9 + $0x348] sm:$0xff]  }
 0x5d2   :  { %15081 = vmatprep.subr.bf16.mxu1 %v20134_v5  ;;  %15093 = vmatprep.mubr.msk.bf16.mxu1 %vm16128_vm2, %v20134_v5  ;;  %v15901_v55 = vld [vmem:[%s20110_s9 + $0x7a8] sm:$0xff]   ;;  %v15904_v18 = vld [vmem:[%s20110_s9 + $0x7a0] sm:$0xff]  }
 0x5d3   :  { %v15900_v37 = vld [vmem:[%s20110_s9 + $0x308] sm:$0xff]  }
 0x5d4   :  { %15196 = vmatpush3.bf16.msra.mxu0 %v15866_v14  ;;  %v15902_v14 = vld [vmem:[%s20110_s9 + $0x340] sm:$0xff]  }
 0x5d5   :  { %15082 = vmatpush3.bf16.msra.mxu1 %v15865_v16  ;;  %15197 = vmatprep.subr.bf16.mxu0 %v20134_v5  ;;  %v15903_v16 = vld [vmem:[%s20110_s9 + $0x300] sm:$0xff]  }
 0x5d6   :  { %15083 = vmatprep.subr.bf16.mxu1 %v20134_v5 }
 0x5d8   :  { %15198 = vmatpush3.bf16.msra.mxu0 %v15868_v58  ;;  %v15905_v58 = vld [vmem:[%s20110_s9 + $0x338] sm:$0xff]  }
 0x5d9   :  { %15084 = vmatpush3.bf16.msra.mxu1 %v15867_v24  ;;  %15199 = vmatprep.subr.bf16.mxu0 %v20134_v5  ;;  %v15907_v24 = vld [vmem:[%s20110_s9 + $0x798] sm:$0xff]  }
 0x5da   :  { %15085 = vmatprep.subr.bf16.mxu1 %v20134_v5 }
 0x5dc   :  { %15200 = vmatpush3.bf16.msra.mxu0 %v15870_v46 }
 0x5dd   :  { %15086 = vmatpush3.bf16.msra.mxu1 %v15869_v29  ;;  %14505 = vmatprep.subr.bf16.mxu0 %v15871_v41  ;;  %v15908_v41 = vld [vmem:[%s20110_s9 + $0x330] sm:$0xff]  }
 0x5de   :  { %15087 = vmatprep.subr.bf16.mxu1 %v20134_v5 }
 0x5df   :  { %15202 = vmatmul.mubr.msk.bf16.vlgmr.msra.gmra.mxu0 %vm3904_vm1, %v10533_v21  ;;  %v15909_v21 = vld [vmem:[%s20110_s9 + $0x2f0] sm:$0xff]  }
 0x5e0   :  { %14506 = vmatpush3.bf16.msra.mxu0 %v15873_v13  ;;  %11001 = vmatprep.mubr.bf16.mxu0 %v10824_v54  ;;  %v15911_v54 = vld [vmem:[%s20110_s9 + $0x328] sm:$0xff]  }
 0x5e1   :  { %15088 = vmatpush3.bf16.msra.mxu1 %v15872_v4  ;;  %14507 = vmatprep.subr.bf16.mxu0 %v15874_v10  ;;  %v15910_v4 = vld [vmem:[%s20110_s9 + $0x790] sm:$0xff]  }
 0x5e2   :  { %15089 = vmatprep.subr.bf16.mxu1 %v20134_v5 }
 0x5e4   :  { %14508 = vmatpush3.bf16.msra.mxu0 %v15876_v17  ;;  %v15913_v17 = vld [vmem:[%s20110_s9 + $0x788] sm:$0xff]  }
 0x5e5   :  { %15090 = vmatpush3.bf16.msra.mxu1 %v15875_v9  ;;  %14509 = vmatprep.subr.bf16.mxu0 %v15877_v57  ;;  %v15912_v9 = vld [vmem:[%s20110_s9 + $0x2e8] sm:$0xff]   ;;  %v15915_v57 = vld [vmem:[%s20110_s9 + $0x834] sm:$0xff]  }
 0x5e6   :  { %15091 = vmatprep.subr.bf16.mxu1 %v20134_v5 }
 0x5e8   :  { %14510 = vmatpush3.bf16.msra.mxu0 %v15879_v33  ;;  %v15914_v33 = vld [vmem:[%s20110_s9 + $0x320] sm:$0xff]  }
 0x5e9   :  { %15092 = vmatpush3.bf16.msra.mxu1 %v15878_v38  ;;  %14511 = vmatprep.subr.bf16.mxu0 %v15880_v47  ;;  %v15917_v38 = vld [vmem:[%s20110_s9 + $0x7f4] sm:$0xff]   ;;  %v15916_v47 = vld [vmem:[%s20110_s9 + $0x2e0] sm:$0xff]  }
 0x5ea   :  { %15097 = vmatprep.subr.bf16.mxu1 %v20134_v5 }
 0x5eb   :  { %v14311_v1 = vpop.f32.mrf.mxu0 }
 0x5ec   :  { %15094 = vmatmul.mubr.msk.bf16.vlgmr.msra.gmra.mxu1 %vm3904_vm1, %v17563_v56  ;;  %14512 = vmatpush3.bf16.msra.mxu0 %v15882_v40  ;;  %v11111_v40 = vsel %vm8233_vm3, %v17769_v50, %v17808_v26  ;;  %v15920_v50 = vld [vmem:[%s20110_s9 + $0x2d8] sm:$0xff]   ;;  %v15923_v26 = vld [vmem:[%s20110_s9 + $0x824] sm:$0xff]  }
 0x5ed   :  { %15098 = vmatpush3.bf16.msra.mxu1 %v9242_v61  ;;  %v14312_v39 = vpop.f32.mrf.mxu0  ;;  %14513 = vmatprep.subr.bf16.mxu0 %v15883_v44  ;;  %v15918_v44 = vld [vmem:[%s20110_s9 + $0x318] sm:$0xff]   ;;  %v11396_v61 = vsel %vm8233_vm3, %v17803_v23, %v17839_v36  ;;  %v15922_v36 = vld [vmem:[%s20110_s9 + $0x310] sm:$0xff]  }
 0x5ee   :  { %v19189_v0 = vadd.f32 %v14312_v39, %v14311_v1  ;;  %15099 = vmatprep.subr.bf16.mxu1 %v20134_v5  ;;  %15111 = vmatprep.mubr.msk.bf16.mxu1 %vm16128_vm2, %v20134_v5  ;;  %v15921_v1 = vld [vmem:[%s20110_s9 + $0x7ec] sm:$0xff]  }
 0x5ef   :  { %v14314_v56 = vpop.f32.mrf.mxu0  ;;  %v15924_v39 = vld [vmem:[%s20110_s9 + $0x2d0] sm:$0xff]  }
 0x5f0   :  { %14514 = vmatpush3.bf16.msra.mxu0 %v15885_v31  ;;  %v15925_v31 = vld [vmem:[%s20110_s9 + $0x7e4] sm:$0xff]   ;;  %v15928_v56 = vld [vmem:[%s20110_s9 + $0x7dc] sm:$0xff]  }
 0x5f1   :  { %15100 = vmatpush3.bf16.msra.mxu1 %v15884_v42  ;;  %v14315_v49 = vpop.f32.mrf.mxu0  ;;  %14515 = vmatprep.subr.bf16.mxu0 %v15886_v27  ;;  %v15926_v42 = vld [vmem:[%s20110_s9 + $0x81c] sm:$0xff]   ;;  %v15927_v27 = vld [vmem:[%s20110_s9 + $0x434] ss:$0 sps:$4 sm:$0xff]  }
 0x5f2   :  { %15101 = vmatprep.subr.bf16.mxu1 %v20134_v5  ;;  %v9814_v49 = vsel %vm167_vm4, %v15927_v27, 0 }
 0x5f4   :  { %14516 = vmatpush3.bf16.msra.mxu0 %v15888_v45  ;;  %v15929_v45 = vld [vmem:[%s20110_s9 + $0x814] sm:$0xff]  }
 0x5f5   :  { %15102 = vmatpush3.bf16.msra.mxu1 %v15887_v3  ;;  %14517 = vmatprep.subr.bf16.mxu0 %v15889_v63  ;;  %v15931_v63 = vld [vmem:[%s20110_s9 + $0x7d4] sm:$0xff]  }
 0x5f6   :  { %15103 = vmatprep.subr.bf16.mxu1 %v20134_v5 }
 0x5f8   :  { %14518 = vmatpush3.bf16.msra.mxu0 %v15891_v12 }
 0x5f9   :  { %15104 = vmatpush3.bf16.msra.mxu1 %v15890_v8  ;;  %14519 = vmatprep.subr.bf16.mxu0 %v15892_v34  ;;  %v15930_v8 = vld [vmem:[%s20110_s9 + $0x42c] sm:$0xff]  }
 0x5fa   :  { %15105 = vmatprep.subr.bf16.mxu1 %v20134_v5  ;;  %v15932_v34 = vld [vmem:[%s20110_s9 + $0x80c] sm:$0xff]  }
 0x5fc   :  { %14520 = vmatpush3.bf16.msra.mxu0 %v15894_v43  ;;  %v15934_v43 = vld [vmem:[%s20110_s9 + $0x7cc] sm:$0xff]  }
 0x5fd   :  { %15106 = vmatpush3.bf16.msra.mxu1 %v15893_v22  ;;  %15223 = vmatprep.subr.bf16.mxu0 %v20134_v5 }
 0x5fe   :  { %15107 = vmatprep.subr.bf16.mxu1 %v20134_v5 }
 0x5ff   :  { %11002 = vmatmul.mubr.bf16.vlgmr.msra.gmra.mxu0 %v10823_v20  ;;  %v15936_v20 = vld [vmem:[%s20110_s9 + $0x41c] sm:$0xff]  }
 0x600   :  { %15224 = vmatpush3.bf16.msra.mxu0 %v11253_v35  ;;  %15237 = vmatprep.mubr.msk.bf16.mxu0 %vm16128_vm2, %v20134_v5  ;;  %v15937_v35 = vld [vmem:[%s20110_s9 + $0x7c4] sm:$0xff]  }
 0x601   :  { %15108 = vmatpush3.bf16.msra.mxu1 %v15895_v59  ;;  %15225 = vmatprep.subr.bf16.mxu0 %v20134_v5  ;;  %v15935_v59 = vld [vmem:[%s20110_s9 + $0x804] sm:$0xff]  }
 0x602   :  { %15109 = vmatprep.subr.bf16.mxu1 %v20134_v5 }
 0x604   :  { %15226 = vmatpush3.bf16.msra.mxu0 %v15898_v53  ;;  %v15938_v53 = vld [vmem:[%s20110_s9 + $0x7fc] sm:$0xff]  }
 0x605   :  { %15110 = vmatpush3.bf16.msra.mxu1 %v15897_v48  ;;  %15227 = vmatprep.subr.bf16.mxu0 %v20134_v5  ;;  %v15940_v48 = vld [vmem:[%s20110_s9 + $0x7bc] sm:$0xff]  }
 0x606   :  { %14355 = vmatprep.subr.bf16.mxu1 %v15899_v28  ;;  %v15939_v28 = vld [vmem:[%s20110_s9 + $0x414] sm:$0xff]  }
 0x608   :  { %15112 = vmatmul.mubr.msk.bf16.vlgmr.msra.gmra.mxu1 %vm3904_vm1, %v17597_v52  ;;  %15228 = vmatpush3.bf16.msra.mxu0 %v15901_v55  ;;  %v15942_v55 = vld [vmem:[%s20110_s9 + $0x920] ss:$0 sps:$4 sm:$0xff]  }
 0x609   :  { %14356 = vmatpush3.bf16.msra.mxu1 %v15900_v37  ;;  %9562 = vmatprep.mubr.bf16.mxu1 %v17587_v15  ;;  %v15906_v15 = vld [vmem:[%s20110_s9 + $0x2f8] sm:$0xff]   ;;  %v15941_v37 = vld [vmem:[%s20110_s9 + $0x40c] sm:$0xff]  }
 0x60a   :  { %14357 = vmatprep.subr.bf16.mxu1 %v15902_v14  ;;  %15229 = vmatprep.subr.bf16.mxu0 %v20134_v5  ;;  %v11825_v14 = vsel %vm167_vm4, %v15942_v55, 0  ;;  %v15976_v55 = vld [vmem:[%s20110_s9 + $0x594] sm:$0xff]  }
 0x60b   :  { %v14341_v52 = vpop.f32.mrf.mxu0 }
 0x60c   :  { %15230 = vmatpush3.bf16.msra.mxu0 %v15904_v18  ;;  %v11395_v18 = vsel %vm8233_vm3, %v17819_v2, %v17803_v23  ;;  %v15945_v23 = vld [vmem:[%s20110_s9 + $0x4b0] sm:$0xff]  }
 0x60d   :  { %14358 = vmatpush3.bf16.msra.mxu1 %v15903_v16  ;;  %v14342_v46 = vpop.f32.mrf.mxu0  ;;  %15231 = vmatprep.subr.bf16.mxu0 %v20134_v5  ;;  %v15944_v16 = vld [vmem:[%s20110_s9 + $0x918] sm:$0xff]   ;;  %v15947_v2 = vld [vmem:[%s20110_s9 + $0x910] sm:$0xff]  }
 0x60e   :  { %v19276_v29 = vadd.f32 %v14342_v46, %v14341_v52  ;;  %14359 = vmatprep.subr.bf16.mxu1 %v15905_v58  ;;  %v15943_v58 = vld [vmem:[%s20110_s9 + $0x404] sm:$0xff]   ;;  %v15946_v52 = vld [vmem:[%s20110_s9 + $0x470] sm:$0xff]  }
 0x60f   :  { %v14344_v13 = vpop.f32.mrf.mxu0  ;;  %v15950_v46 = vld [vmem:[%s20110_s9 + $0x908] sm:$0xff]  }
 0x610   :  { %15232 = vmatpush3.bf16.msra.mxu0 %v15907_v24  ;;  %v15948_v24 = vld [vmem:[%s20110_s9 + $0x4a8] sm:$0xff]   ;;  %v15953_v13 = vld [vmem:[%s20110_s9 + $0x900] sm:$0xff]  }
 0x611   :  { %14360 = vmatpush3.bf16.msra.mxu1 %v15906_v15  ;;  %v14345_v10 = vpop.f32.mrf.mxu0  ;;  %15233 = vmatprep.subr.bf16.mxu0 %v20134_v5  ;;  %v15949_v15 = vld [vmem:[%s20110_s9 + $0x468] sm:$0xff]  }
 0x612   :  { %14361 = vmatprep.subr.bf16.mxu1 %v15908_v41  ;;  %v15951_v41 = vld [vmem:[%s20110_s9 + $0x4a0] sm:$0xff]  }
 0x614   :  { %15234 = vmatpush3.bf16.msra.mxu0 %v15910_v4 }
 0x615   :  { %14362 = vmatpush3.bf16.msra.mxu1 %v15909_v21  ;;  %15235 = vmatprep.subr.bf16.mxu0 %v20134_v5  ;;  %v15954_v21 = vld [vmem:[%s20110_s9 + $0x498] sm:$0xff]  }
 0x616   :  { %14363 = vmatprep.subr.bf16.mxu1 %v15911_v54 }
 0x618   :  { %15236 = vmatpush3.bf16.msra.mxu0 %v15913_v17  ;;  %v15956_v17 = vld [vmem:[%s20110_s9 + $0x8f8] sm:$0xff]  }
 0x619   :  { %14364 = vmatpush3.bf16.msra.mxu1 %v15912_v9  ;;  %14565 = vmatprep.subr.bf16.mxu0 %v15915_v57  ;;  %v15955_v57 = vld [vmem:[%s20110_s9 + $0x458] sm:$0xff]  }
 0x61a   :  { %14365 = vmatprep.subr.bf16.mxu1 %v15914_v33  ;;  %v15957_v33 = vld [vmem:[%s20110_s9 + $0x490] sm:$0xff]  }
 0x61b   :  { %15238 = vmatmul.mubr.msk.bf16.vlgmr.msra.gmra.mxu0 %vm3904_vm1, %v11111_v40  ;;  %v15960_v40 = vld [vmem:[%s20110_s9 + $0x488] sm:$0xff]  }
 0x61c   :  { %14566 = vmatpush3.bf16.msra.mxu0 %v15917_v38  ;;  %11573 = vmatprep.mubr.bf16.mxu0 %v11396_v61  ;;  %v15959_v38 = vld [vmem:[%s20110_s9 + $0x8f0] sm:$0xff]   ;;  %v15962_v61 = vld [vmem:[%s20110_s9 + $0x448] sm:$0xff]  }
 0x61d   :  { %14366 = vmatpush3.bf16.msra.mxu1 %v15916_v47  ;;  %14567 = vmatprep.subr.bf16.mxu0 %v15919_v60  ;;  %v15958_v47 = vld [vmem:[%s20110_s9 + $0x450] sm:$0xff]   ;;  %v15961_v60 = vld [vmem:[%s20110_s9 + $0x99c] sm:$0xff]  }
 0x61e   :  { %14367 = vmatprep.subr.bf16.mxu1 %v15918_v44  ;;  %v15963_v44 = vld [vmem:[%s20110_s9 + $0x95c] sm:$0xff]  }
 0x620   :  { %14568 = vmatpush3.bf16.msra.mxu0 %v15921_v1  ;;  %v15965_v1 = vld [vmem:[%s20110_s9 + $0x994] sm:$0xff]  }
 0x621   :  { %14368 = vmatpush3.bf16.msra.mxu1 %v15920_v50  ;;  %14569 = vmatprep.subr.bf16.mxu0 %v15923_v26  ;;  %v20153_v50 = vld [vmem:[#allocation18_spill] sm:$0xff] }
 0x622   :  { %14369 = vmatprep.subr.bf16.mxu1 %v15922_v36  ;;  %v20154_v26 = vld [vmem:[#allocation14_spill] sm:$0xff] }
 0x623   :  { %v11683_v36 = vsel %vm8233_vm3, %v20154_v26, %v20153_v50  ;;  %v15995_v50 = vld [vmem:[%s20110_s9 + $0x5d0] sm:$0xff]   ;;  %v15997_v26 = vld [vmem:[%s20110_s9 + $0x608] sm:$0xff]  }
 0x624   :  { %14570 = vmatpush3.bf16.msra.mxu0 %v15925_v31  ;;  %v8097_v31 = vld [vmem:[%s20113_s12] sm:$0x1] }
 0x625   :  { %14370 = vmatpush3.bf16.msra.mxu1 %v15924_v39  ;;  %14571 = vmatprep.subr.bf16.mxu0 %v15926_v42  ;;  %v15964_v39 = vld [vmem:[%s20110_s9 + $0x480] sm:$0xff]   ;;  %v20155_v42 = vld [vmem:[#allocation17_spill] sm:$0xff] }
 0x626   :  { %15133 = vmatprep.subr.bf16.mxu1 %v20134_v5  ;;  %v11968_v27 = vsel %vm8233_vm3, %v20155_v42, %v17918_v19 }
 0x627   :  { %v19355_v3 = vpop.f32.mrf.mxu0 }
 0x628   :  { %9563 = vmatmul.mubr.bf16.vlgmr.msra.gmra.mxu1 %v17632_v25  ;;  %14572 = vmatpush3.bf16.msra.mxu0 %v15928_v56 }
 0x629   :  { %15134 = vmatpush3.bf16.msra.mxu1 %v9814_v49  ;;  %v15131_v12 = vpop.f32.mrf.mxu0  ;;  %14573 = vmatprep.subr.bf16.mxu0 %v15929_v45  ;;  %v15967_v45 = vld [vmem:[%s20110_s9 + $0x954] sm:$0xff]  }
 0x62a   :  { %15135 = vmatprep.subr.bf16.mxu1 %v20134_v5  ;;  %15147 = vmatprep.mubr.msk.bf16.mxu1 %vm16128_vm2, %v20134_v5  ;;  %v15969_v12 = vld [vmem:[%s20110_s9 + $0x98c] sm:$0xff]  }
 0x62b   :  { %v9607_v25 = vpop.f32.mrf.mxu0 }
 0x62c   :  { %14574 = vmatpush3.bf16.msra.mxu0 %v15931_v63  ;;  %v15966_v63 = vld [vmem:[%s20110_s9 + $0x440] sm:$0xff]   ;;  %v15970_v25 = vld [vmem:[%s20110_s9 + $0x438] sm:$0xff]  }
 0x62d   :  { %15136 = vmatpush3.bf16.msra.mxu1 %v15930_v8  ;;  %v15132_v22 = vpop.f32.mrf.mxu0  ;;  %14575 = vmatprep.subr.bf16.mxu0 %v15932_v34  ;;  %v15968_v8 = vld [vmem:[%s20110_s9 + $0x478] sm:$0xff]   ;;  %v15971_v34 = vld [vmem:[%s20110_s9 + $0x94c] sm:$0xff]  }
 0x62e   :  { %15137 = vmatprep.subr.bf16.mxu1 %v20134_v5  ;;  %v15973_v22 = vld [vmem:[%s20110_s9 + $0x59c] ss:$0 sps:$4 sm:$0xff]  }
 0x630   :  { %14576 = vmatpush3.bf16.msra.mxu0 %v15934_v43  ;;  %v15972_v43 = vld [vmem:[%s20110_s9 + $0x984] sm:$0xff]  }
 0x631   :  { %15138 = vmatpush3.bf16.msra.mxu1 %v15933_v51  ;;  %14577 = vmatprep.subr.bf16.mxu0 %v15935_v59  ;;  %v15974_v51 = vld [vmem:[%s20110_s9 + $0x944] sm:$0xff]   ;;  %v15975_v59 = vld [vmem:[%s20110_s9 + $0x97c] sm:$0xff]  }
 0x632   :  { %15139 = vmatprep.subr.bf16.mxu1 %v20134_v5 }
 0x634   :  { %14578 = vmatpush3.bf16.msra.mxu0 %v15937_v35  ;;  %v10386_v35 = vsel %vm167_vm4, %v15973_v22, 0 }
 0x635   :  { %15140 = vmatpush3.bf16.msra.mxu1 %v15936_v20  ;;  %14579 = vmatprep.subr.bf16.mxu0 %v15938_v53  ;;  %v20156_v53 = vld [vmem:[#allocation7_spill] sm:$0xff] }
 0x636   :  { %15141 = vmatprep.subr.bf16.mxu1 %v20134_v5 }
 0x638   :  { %14580 = vmatpush3.bf16.msra.mxu0 %v15940_v48  ;;  %v15977_v48 = vld [vmem:[%s20110_s9 + $0x93c] sm:$0xff]  }
 0x639   :  { %15142 = vmatpush3.bf16.msra.mxu1 %v15939_v28  ;;  %15259 = vmatprep.subr.bf16.mxu0 %v20134_v5 }
 0x63a   :  { %15143 = vmatprep.subr.bf16.mxu1 %v20134_v5 }
 0x63b   :  { %11574 = vmatmul.mubr.bf16.vlgmr.msra.gmra.mxu0 %v11395_v18  ;;  %v15980_v18 = vld [vmem:[%s20110_s9 + $0x934] sm:$0xff]  }
 0x63c   :  { %15260 = vmatpush3.bf16.msra.mxu0 %v11825_v14  ;;  %15273 = vmatprep.mubr.msk.bf16.mxu0 %vm16128_vm2, %v20134_v5 }
 0x63d   :  { %15144 = vmatpush3.bf16.msra.mxu1 %v15941_v37  ;;  %15261 = vmatprep.subr.bf16.mxu0 %v20134_v5  ;;  %v15978_v37 = vld [vmem:[%s20110_s9 + $0x974] sm:$0xff]  }
 0x63e   :  { %15145 = vmatprep.subr.bf16.mxu1 %v20134_v5 }
 0x640   :  { %15262 = vmatpush3.bf16.msra.mxu0 %v15944_v16 }
 0x641   :  { %15146 = vmatpush3.bf16.msra.mxu1 %v15943_v58  ;;  %15263 = vmatprep.subr.bf16.mxu0 %v20134_v5  ;;  %v15979_v58 = vld [vmem:[%s20110_s9 + $0x58c] sm:$0xff]  }
 0x642   :  { %14415 = vmatprep.subr.bf16.mxu1 %v15945_v23  ;;  %v15981_v23 = vld [vmem:[%s20110_s9 + $0x96c] sm:$0xff]  }
 0x644   :  { %15148 = vmatmul.mubr.msk.bf16.vlgmr.msra.gmra.mxu1 %vm3904_vm1, %v17664_v30  ;;  %15264 = vmatpush3.bf16.msra.mxu0 %v15947_v2  ;;  %v15983_v2 = vld [vmem:[%s20110_s9 + $0x92c] sm:$0xff]  }
 0x645   :  { %14416 = vmatpush3.bf16.msra.mxu1 %v15946_v52  ;;  %10134 = vmatprep.mubr.bf16.mxu1 %v17654_v32  ;;  %v15952_v32 = vld [vmem:[%s20110_s9 + $0x460] sm:$0xff]  }
 0x646   :  { %14417 = vmatprep.subr.bf16.mxu1 %v15948_v24  ;;  %15265 = vmatprep.subr.bf16.mxu0 %v20134_v5  ;;  %v15982_v52 = vld [vmem:[%s20110_s9 + $0x584] sm:$0xff]  }
 0x647   :  { %v14401_v30 = vpop.f32.mrf.mxu0  ;;  %v15984_v24 = vld [vmem:[%s20110_s9 + $0x964] sm:$0xff]  }
 0x648   :  { %15266 = vmatpush3.bf16.msra.mxu0 %v15950_v46  ;;  %v15986_v46 = vld [vmem:[%s20110_s9 + $0x924] sm:$0xff]  }
 0x649   :  { %14418 = vmatpush3.bf16.msra.mxu1 %v15949_v15  ;;  %v14402_v4 = vpop.f32.mrf.mxu0  ;;  %15267 = vmatprep.subr.bf16.mxu0 %v20134_v5  ;;  %v15985_v15 = vld [vmem:[%s20110_s9 + $0x57c] sm:$0xff]  }
 0x64a   :  { %v19452_v10 = vadd.f32 %v14402_v4, %v14401_v30  ;;  %14419 = vmatprep.subr.bf16.mxu1 %v15951_v41  ;;  %v15988_v41 = vld [vmem:[%s20110_s9 + $0xa88] ss:$0 sps:$4 sm:$0xff]   ;;  %v15987_v4 = vld [vmem:[%s20110_s9 + $0x574] sm:$0xff]  }
 0x64b   :  { %v14404_v54 = vpop.f32.mrf.mxu0 }
 0x64c   :  { %15268 = vmatpush3.bf16.msra.mxu0 %v15953_v13 }
 0x64d   :  { %14420 = vmatpush3.bf16.msra.mxu1 %v15952_v32  ;;  %v14405_v9 = vpop.f32.mrf.mxu0  ;;  %15269 = vmatprep.subr.bf16.mxu0 %v20134_v5  ;;  %v12397_v32 = vsel %vm167_vm4, %v15988_v41, 0  ;;  %v16017_v41 = vld [vmem:[%s20110_s9 + $0xab4] sm:$0xff]  }
 0x64e   :  { %14421 = vmatprep.subr.bf16.mxu1 %v15954_v21  ;;  %v20157_v21 = vld [vmem:[#allocation19_spill] sm:$0xff] }
 0x64f   :  { %v11967_v54 = vsel %vm8233_vm3, %v20157_v21, %v20155_v42  ;;  %v15998_v42 = vld [vmem:[%s20110_s9 + $0x5c8] sm:$0xff]  }
 0x650   :  { %15270 = vmatpush3.bf16.msra.mxu0 %v15956_v17  ;;  %v16021_v21 = vld [vmem:[%s20110_s9 + $0xae4] sm:$0xff]  }
 0x651   :  { %14422 = vmatpush3.bf16.msra.mxu1 %v15955_v57  ;;  %15271 = vmatprep.subr.bf16.mxu0 %v20134_v5  ;;  %v15989_v57 = vld [vmem:[%s20110_s9 + $0x56c] sm:$0xff]  }
 0x652   :  { %14423 = vmatprep.subr.bf16.mxu1 %v15957_v33 }
 0x654   :  { %15272 = vmatpush3.bf16.msra.mxu0 %v15959_v38  ;;  %v15991_v38 = vld [vmem:[%s20110_s9 + $0x618] sm:$0xff]  }
 0x655   :  { %14424 = vmatpush3.bf16.msra.mxu1 %v15958_v47  ;;  %14625 = vmatprep.subr.bf16.mxu0 %v15961_v60  ;;  %v15993_v47 = vld [vmem:[%s20110_s9 + $0xa78] sm:$0xff]  }
 0x656   :  { %14425 = vmatprep.subr.bf16.mxu1 %v15960_v40  ;;  %v15992_v60 = vld [vmem:[%s20110_s9 + $0x5d8] sm:$0xff]   ;;  %v15994_v40 = vld [vmem:[%s20110_s9 + $0x610] sm:$0xff]  }
 0x657   :  { %15274 = vmatmul.mubr.msk.bf16.vlgmr.msra.gmra.mxu0 %vm3904_vm1, %v11683_v36 }
 0x658   :  { %v8168_v56 = vpop.f32.mrf.mxu1  ;;  %14626 = vmatpush3.bf16.msra.mxu0 %v15963_v44  ;;  %12145 = vmatprep.mubr.bf16.mxu0 %v11968_v27  ;;  %v20158_v44 = vld [vmem:[#allocation9_spill] sm:$0xff] }
 0x659   :  { %v8169_v49 = vadd.f32 %v8168_v56, %v8097_v31  ;;  %14426 = vmatpush3.bf16.msra.mxu1 %v15962_v61  ;;  %14627 = vmatprep.subr.bf16.mxu0 %v15965_v1  ;;  %v15996_v61 = vld [vmem:[%s20110_s9 + $0xa70] sm:$0xff]   ;;  %v20159_v1 = vld [vmem:[#allocation8_spill] sm:$0xff] }
 0x65a   :  { %v15042_v19 = vpop.f32.mrf.mxu1  ;;  %14427 = vmatprep.subr.bf16.mxu1 %v15964_v39  ;;  %v15999_v31 = vld [vmem:[%s20110_s9 + $0xa68] sm:$0xff]   ;;  %v16000_v56 = vld [vmem:[%s20110_s9 + $0x600] sm:$0xff]  }
 0x65b   :  { %8173 = vst.msk [vmem:[#allocation3] sm:$0x1] %vm8172_vm6, %v8169_v49  ;;  %v16002_v49 = vld [vmem:[%s20110_s9 + $0xa60] sm:$0xff]   ;;  %v16003_v19 = vld [vmem:[%s20110_s9 + $0x5f8] sm:$0xff]  }
 0x65c   :  { %14628 = vmatpush3.bf16.msra.mxu0 %v15967_v45 }
 0x65d   :  { %14428 = vmatpush3.bf16.msra.mxu1 %v15966_v63  ;;  %14629 = vmatprep.subr.bf16.mxu0 %v15969_v12  ;;  %v16001_v12 = vld [vmem:[%s20110_s9 + $0x5c0] sm:$0xff]  }
 0x65e   :  { %14429 = vmatprep.subr.bf16.mxu1 %v15968_v8  ;;  %v16005_v8 = vld [vmem:[%s20110_s9 + $0xa58] sm:$0xff]  }
 0x660   :  { %14630 = vmatpush3.bf16.msra.mxu0 %v15971_v34  ;;  %v16004_v34 = vld [vmem:[%s20110_s9 + $0x5b8] sm:$0xff]  }
 0x661   :  { %14430 = vmatpush3.bf16.msra.mxu1 %v15970_v25  ;;  %14631 = vmatprep.subr.bf16.mxu0 %v15972_v43  ;;  %v16007_v25 = vld [vmem:[%s20110_s9 + $0xb04] sm:$0xff]   ;;  %v16006_v43 = vld [vmem:[%s20110_s9 + $0x5f0] sm:$0xff]  }
 0x662   :  { %15169 = vmatprep.subr.bf16.mxu1 %v20134_v5 }
 0x663   :  { %v19535_v20 = vpop.f32.mrf.mxu0 }
 0x664   :  { %10135 = vmatmul.mubr.bf16.vlgmr.msra.gmra.mxu1 %v20156_v53  ;;  %14632 = vmatpush3.bf16.msra.mxu0 %v15974_v51  ;;  %v19664_v51 = vpop.permute.xlu1 %12535 }
 0x665   :  { %15170 = vmatpush3.bf16.msra.mxu1 %v10386_v35  ;;  %v15167_v28 = vpop.f32.mrf.mxu0  ;;  %14633 = vmatprep.subr.bf16.mxu0 %v15975_v59  ;;  %v16009_v35 = vld [vmem:[%s20110_s9 + $0xac4] sm:$0xff]  }
 0x666   :  { %15171 = vmatprep.subr.bf16.mxu1 %v20134_v5  ;;  %15183 = vmatprep.mubr.msk.bf16.mxu1 %vm16128_vm2, %v20134_v5  ;;  %v16011_v28 = vld [vmem:[%s20110_s9 + $0xafc] sm:$0xff]  }
 0x667   :  { %v10179_v14 = vpop.f32.mrf.mxu0 }
 0x668   :  { %14634 = vmatpush3.bf16.msra.mxu0 %v15977_v48  ;;  %v16008_v48 = vld [vmem:[%s20110_s9 + $0x5b0] sm:$0xff]  }
 0x669   :  { %15172 = vmatpush3.bf16.msra.mxu1 %v15976_v55  ;;  %v15168_v16 = vpop.f32.mrf.mxu0  ;;  %14635 = vmatprep.subr.bf16.mxu0 %v15978_v37  ;;  %v19676_v55 = vpop.permute.xlu0 %12533  ;;  %v12255_v37 = vsel %vm8233_vm3, %v17905_v6, %v17950_v62  ;;  %v16013_v6 = vld [vmem:[%s20110_s9 + $0xabc] sm:$0xff]  }
 0x66a   :  { %15173 = vmatprep.subr.bf16.mxu1 %v20134_v5 }
 0x66c   :  { %14636 = vmatpush3.bf16.msra.mxu0 %v15980_v18  ;;  %v20160_v18 = vld [vmem:[#allocation6_spill] sm:$0xff] }
 0x66d   :  { %15174 = vmatpush3.bf16.msra.mxu1 %v15979_v58  ;;  %14637 = vmatprep.subr.bf16.mxu0 %v15981_v23  ;;  %v12540_v23 = vsel %vm8233_vm3, %v19676_v55, %v19664_v51 }
 0x66e   :  { %15175 = vmatprep.subr.bf16.mxu1 %v20134_v5 }
 0x670   :  { %14638 = vmatpush3.bf16.msra.mxu0 %v15983_v2 }
 0x671   :  { %15176 = vmatpush3.bf16.msra.mxu1 %v15982_v52  ;;  %14639 = vmatprep.subr.bf16.mxu0 %v15984_v24  ;;  %v16012_v52 = vld [vmem:[%s20110_s9 + $0x5a8] sm:$0xff]   ;;  %v16015_v24 = vld [vmem:[%s20110_s9 + $0xaf4] sm:$0xff]  }
 0x672   :  { %15177 = vmatprep.subr.bf16.mxu1 %v20134_v5 }
 0x674   :  { %v8454_v30 = vpop.f32.mrf.mxu1  ;;  %14640 = vmatpush3.bf16.msra.mxu0 %v15986_v46 }
 0x675   :  { %v19581_v13 = vadd.f32 %v19013_v7, %v8454_v30  ;;  %15178 = vmatpush3.bf16.msra.mxu1 %v15985_v15  ;;  %15295 = vmatprep.subr.bf16.mxu0 %v20134_v5  ;;  %v15990_v7 = vld [vmem:[%s20110_s9 + $0xa80] sm:$0xff]  }
 0x676   :  { %v15059_v17 = vpop.f32.mrf.mxu1  ;;  %15179 = vmatprep.subr.bf16.mxu1 %v20134_v5  ;;  %v16014_v15 = vld [vmem:[%s20110_s9 + $0x5e0] sm:$0xff]  }
 0x677   :  { %12146 = vmatmul.mubr.bf16.vlgmr.msra.gmra.mxu0 %v11967_v54  ;;  %v8461_v22 = vrot.slane %v19581_v13, 7  ;;  %v16016_v30 = vld [vmem:[%s20110_s9 + $0x5a0] sm:$0xff]   ;;  %v16018_v13 = vld [vmem:[%s20110_s9 + $0xaec] sm:$0xff]  }
 0x678   :  { %v8457_v9 = vpop.f32.mrf.mxu1  ;;  %15296 = vmatpush3.bf16.msra.mxu0 %v12397_v32  ;;  %15309 = vmatprep.mubr.msk.bf16.mxu0 %vm16128_vm2, %v20134_v5  ;;  %v16020_v32 = vld [vmem:[%s20110_s9 + $0xaac] sm:$0xff]  }
 0x679   :  { %15180 = vmatpush3.bf16.msra.mxu1 %v15987_v4  ;;  %15297 = vmatprep.subr.bf16.mxu0 %v20134_v5  ;;  %v8463_v16 = vadd.f32 %v8461_v22, %v20160_v18  ;;  %v16019_v4 = vld [vmem:[%s20110_s9 + $0x704] ss:$0 sps:$4 sm:$0xff]   ;;  %v20161_v9 = vld [vmem:[#allocation10_spill] sm:$0xff] }
 0x67a   :  { %v15060_v33 = vpop.f32.mrf.mxu1  ;;  %15181 = vmatprep.subr.bf16.mxu1 %v20134_v5  ;;  %v10967_v54 = vsel %vm167_vm4, %v16019_v4, 0  ;;  %v16037_v22 = vld [vmem:[%s20110_s9 + $0x778] sm:$0xff]   ;;  %v16048_v4 = vld [vmem:[%s20110_s9 + $0x710] sm:$0xff]  }
 0x67b   :  { %v16022_v33 = vld [vmem:[%s20110_s9 + $0x6fc] sm:$0xff]  }
 0x67c   :  { %15298 = vmatpush3.bf16.msra.mxu0 %v15990_v7  ;;  %v16023_v7 = vld [vmem:[%s20110_s9 + $0xaa4] sm:$0xff]  }
 0x67d   :  { %15182 = vmatpush3.bf16.msra.mxu1 %v15989_v57  ;;  %15299 = vmatprep.subr.bf16.mxu0 %v20134_v5 }
 0x67e   :  { %14475 = vmatprep.subr.bf16.mxu1 %v15991_v38  ;;  %v16024_v38 = vld [vmem:[%s20110_s9 + $0xadc] sm:$0xff]  }
 0x680   :  { %15184 = vmatmul.mubr.msk.bf16.vlgmr.msra.gmra.mxu1 %vm3904_vm1, %v20158_v44  ;;  %15300 = vmatpush3.bf16.msra.mxu0 %v15993_v47  ;;  %v16025_v44 = vld [vmem:[%s20110_s9 + $0x6f4] sm:$0xff]  }
 0x681   :  { %14476 = vmatpush3.bf16.msra.mxu1 %v15992_v60  ;;  %10709 = vmatprep.mubr.bf16.mxu1 %v20159_v1  ;;  %v16026_v60 = vld [vmem:[%s20110_s9 + $0xa9c] sm:$0xff]   ;;  %v16029_v1 = vld [vmem:[%s20110_s9 + $0xa94] sm:$0xff]  }
 0x682   :  { %14477 = vmatprep.subr.bf16.mxu1 %v15994_v40  ;;  %15301 = vmatprep.subr.bf16.mxu0 %v20134_v5 }
 0x683   :  { %v14461_v36 = vpop.f32.mrf.mxu0 }
 0x684   :  { %15302 = vmatpush3.bf16.msra.mxu0 %v15996_v61  ;;  %v16027_v61 = vld [vmem:[%s20110_s9 + $0xad4] sm:$0xff]  }
 0x685   :  { %14478 = vmatpush3.bf16.msra.mxu1 %v15995_v50  ;;  %v14462_v39 = vpop.f32.mrf.mxu0  ;;  %15303 = vmatprep.subr.bf16.mxu0 %v20134_v5  ;;  %v16028_v50 = vld [vmem:[%s20110_s9 + $0x6ec] sm:$0xff]  }
 0x686   :  { %v19635_v27 = vadd.f32 %v14462_v39, %v14461_v36  ;;  %14479 = vmatprep.subr.bf16.mxu1 %v15997_v26  ;;  %v16030_v26 = vld [vmem:[%s20110_s9 + $0xacc] sm:$0xff]  }
 0x687   :  { %v14464_v45 = vpop.f32.mrf.mxu0 }
 0x688   :  { %15304 = vmatpush3.bf16.msra.mxu0 %v15999_v31  ;;  %v16032_v31 = vld [vmem:[%s20110_s9 + $0xa8c] sm:$0xff]   ;;  %v12532_v45 = vpop.permute.xlu0 %12531 }
 0x689   :  { %14480 = vmatpush3.bf16.msra.mxu1 %v15998_v42  ;;  %v14465_v63 = vpop.f32.mrf.mxu0  ;;  %15305 = vmatprep.subr.bf16.mxu0 %v20134_v5  ;;  %v16031_v42 = vld [vmem:[%s20110_s9 + $0x6e4] sm:$0xff]  }
 0x68a   :  { %14481 = vmatprep.subr.bf16.mxu1 %v16000_v56 }
 0x68c   :  { %15306 = vmatpush3.bf16.msra.mxu0 %v16002_v49 }
 0x68d   :  { %14482 = vmatpush3.bf16.msra.mxu1 %v16001_v12  ;;  %15307 = vmatprep.subr.bf16.mxu0 %v20134_v5 }
 0x68e   :  { %14483 = vmatprep.subr.bf16.mxu1 %v16003_v19  ;;  %v12539_v19 = vsel %vm8233_vm3, %v12532_v45, %v19676_v55  ;;  %v16057_v45 = vld [vmem:[%s20110_s9 + $0x83c] sm:$0xff]  }
 0x690   :  { %v8746_v59 = vpop.f32.mrf.mxu1  ;;  %15308 = vmatpush3.bf16.msra.mxu0 %v16005_v8 }
 0x691   :  { %v8747_v53 = vadd.f32 %v19095_v11, %v8746_v59  ;;  %14484 = vmatpush3.bf16.msra.mxu1 %v16004_v34  ;;  %14685 = vmatprep.subr.bf16.mxu0 %v16007_v25  ;;  %v16010_v11 = vld [vmem:[%s20110_s9 + $0x5e8] sm:$0xff]   ;;  %v16034_v34 = vld [vmem:[%s20110_s9 + $0x6d4] sm:$0xff]   ;;  %v16035_v25 = vld [vmem:[%s20110_s9 + $0x780] sm:$0xff]  }
 0x692   :  { %v15077_v14 = vpop.f32.mrf.mxu1  ;;  %14485 = vmatprep.subr.bf16.mxu1 %v16006_v43  ;;  %v16036_v43 = vld [vmem:[%s20110_s9 + $0x740] sm:$0xff]  }
 0x693   :  { %v8753_v58 = vrot.slane %v8747_v53, 7  ;;  %15310 = vmatmul.mubr.msk.bf16.vlgmr.msra.gmra.mxu0 %vm3904_vm1, %v12255_v37  ;;  %v20162_v59 = vld [vmem:[#allocation12_spill] sm:$0xff]  ;;  %v16038_v53 = vld [vmem:[%s20110_s9 + $0x738] sm:$0xff]   ;;  %v16040_v37 = vld [vmem:[%s20110_s9 + $0x730] sm:$0xff]  }
 0x694   :  { %v8749_v2 = vpop.f32.mrf.mxu1  ;;  %14686 = vmatpush3.bf16.msra.mxu0 %v16009_v35  ;;  %12717 = vmatprep.mubr.bf16.mxu0 %v12540_v23  ;;  %v20163_v35 = vld [vmem:[#allocation11_spill] sm:$0xff] }
 0x695   :  { %v19692_v62 = vadd.f32 %v8753_v58, %v8463_v16  ;;  %14486 = vmatpush3.bf16.msra.mxu1 %v16008_v48  ;;  %14687 = vmatprep.subr.bf16.mxu0 %v16011_v28  ;;  %v16039_v48 = vld [vmem:[%s20110_s9 + $0x770] sm:$0xff]   ;;  %v16042_v58 = vld [vmem:[%s20110_s9 + $0x728] sm:$0xff]   ;;  %v16043_v23 = vld [vmem:[%s20110_s9 + $0x760] sm:$0xff]  }
 0x696   :  { %v15078_v46 = vpop.f32.mrf.mxu1  ;;  %14487 = vmatprep.subr.bf16.mxu1 %v16010_v11  ;;  %v16041_v11 = vld [vmem:[%s20110_s9 + $0x768] sm:$0xff]  }
 0x698   :  { %14688 = vmatpush3.bf16.msra.mxu0 %v16013_v6 }
 0x699   :  { %14488 = vmatpush3.bf16.msra.mxu1 %v16012_v52  ;;  %14689 = vmatprep.subr.bf16.mxu0 %v16015_v24  ;;  %v16045_v24 = vld [vmem:[%s20110_s9 + $0x758] sm:$0xff]  }
 0x69a   :  { %14489 = vmatprep.subr.bf16.mxu1 %v16014_v15 }
 0x69c   :  { %14690 = vmatpush3.bf16.msra.mxu0 %v16017_v41 }
 0x69d   :  { %14490 = vmatpush3.bf16.msra.mxu1 %v16016_v30  ;;  %14691 = vmatprep.subr.bf16.mxu0 %v16018_v13  ;;  %v16046_v30 = vld [vmem:[%s20110_s9 + $0x718] sm:$0xff]   ;;  %v16047_v13 = vld [vmem:[%s20110_s9 + $0x750] sm:$0xff]  }
 0x69e   :  { %15205 = vmatprep.subr.bf16.mxu1 %v20134_v5 }
 0x69f   :  { %v19723_v17 = vpop.f32.mrf.mxu0 }
 0x6a0   :  { %10710 = vmatmul.mubr.bf16.vlgmr.msra.gmra.mxu1 %v20161_v9  ;;  %14692 = vmatpush3.bf16.msra.mxu0 %v16020_v32  ;;  %v16049_v32 = vld [vmem:[%s20110_s9 + $0x748] sm:$0xff]  }
 0x6a1   :  { %15206 = vmatpush3.bf16.msra.mxu1 %v10967_v54  ;;  %v15203_v57 = vpop.f32.mrf.mxu0  ;;  %14693 = vmatprep.subr.bf16.mxu0 %v16021_v21  ;;  %v16050_v21 = vld [vmem:[%s20110_s9 + $0x708] sm:$0xff]  }
 0x6a2   :  { %15207 = vmatprep.subr.bf16.mxu1 %v20134_v5  ;;  %15219 = vmatprep.mubr.msk.bf16.mxu1 %vm16128_vm2, %v20134_v5  ;;  %v16051_v54 = vld [vmem:[%s20110_s9 + $0x86c] ss:$0 sps:$4 sm:$0xff]  }
 0x6a3   :  { %v10754_v47 = vpop.f32.mrf.mxu0  ;;  %v11539_v9 = vsel %vm167_vm4, %v16051_v54, 0  ;;  %v20164_v57 = vld [vmem:[#allocation13_spill] sm:$0xff] }
 0x6a4   :  { %14694 = vmatpush3.bf16.msra.mxu0 %v16023_v7 }
 0x6a5   :  { %15208 = vmatpush3.bf16.msra.mxu1 %v16022_v33  ;;  %v15204_v40 = vpop.f32.mrf.mxu0  ;;  %14695 = vmatprep.subr.bf16.mxu0 %v16024_v38  ;;  %v16052_v38 = vld [vmem:[%s20110_s9 + $0x864] sm:$0xff]  }
 0x6a6   :  { %15209 = vmatprep.subr.bf16.mxu1 %v20134_v5  ;;  %v16053_v40 = vld [vmem:[%s20110_s9 + $0x85c] sm:$0xff]  }
 0x6a8   :  { %14696 = vmatpush3.bf16.msra.mxu0 %v16026_v60 }
 0x6a9   :  { %15210 = vmatpush3.bf16.msra.mxu1 %v16025_v44  ;;  %14697 = vmatprep.subr.bf16.mxu0 %v16027_v61  ;;  %v16054_v44 = vld [vmem:[%s20110_s9 + $0x854] sm:$0xff]  }
 0x6aa   :  { %15211 = vmatprep.subr.bf16.mxu1 %v20134_v5 }
 0x6ac   :  { %v9032_v36 = vpop.f32.mrf.mxu1  ;;  %14698 = vmatpush3.bf16.msra.mxu0 %v16029_v1  ;;  %v16055_v1 = vld [vmem:[%s20110_s9 + $0x84c] sm:$0xff]  }
 0x6ad   :  { %v9033_v39 = vadd.f32 %v19189_v0, %v9032_v36  ;;  %15212 = vmatpush3.bf16.msra.mxu1 %v16028_v50  ;;  %14699 = vmatprep.subr.bf16.mxu0 %v16030_v26  ;;  %v16033_v0 = vld [vmem:[%s20110_s9 + $0x6dc] sm:$0xff]  }
 0x6ae   :  { %v15095_v56 = vpop.f32.mrf.mxu1  ;;  %15213 = vmatprep.subr.bf16.mxu1 %v20134_v5 }
 0x6af   :  { %v9039_v49 = vrot.slane %v9033_v39, 7  ;;  %v16056_v39 = vld [vmem:[%s20110_s9 + $0x844] sm:$0xff]  }
 0x6b0   :  { %v9035_v63 = vpop.f32.mrf.mxu1  ;;  %14700 = vmatpush3.bf16.msra.mxu0 %v16032_v31 }
 0x6b1   :  { %v9041_v12 = vadd.f32 %v9039_v49, %v19692_v62  ;;  %15214 = vmatpush3.bf16.msra.mxu1 %v16031_v42  ;;  %v16044_v62 = vld [vmem:[%s20110_s9 + $0x720] sm:$0xff]   ;;  %v16059_v63 = vld [vmem:[%s20110_s9 + $0x8a8] sm:$0xff]  }
 0x6b2   :  { %v15096_v8 = vpop.f32.mrf.mxu1  ;;  %15215 = vmatprep.subr.bf16.mxu1 %v20134_v5 }
 0x6b3   :  { %12718 = vmatmul.mubr.bf16.vlgmr.msra.gmra.mxu0 %v12539_v19  ;;  %v20166_v19 = vld [vmem:[#allocation15_spill] sm:$0xff] }
 0x6b4   :  { %v16061_v8 = vld [vmem:[%s20110_s9 + $0x8a0] sm:$0xff]  }
 0x6b5   :  { %15216 = vmatpush3.bf16.msra.mxu1 %v16033_v0  ;;  %v20165_v0 = vld [vmem:[#allocation16_spill] sm:$0xff] }
 0x6b6   :  { %15217 = vmatprep.subr.bf16.mxu1 %v20134_v5 }
 0x6b9   :  { %15218 = vmatpush3.bf16.msra.mxu1 %v16034_v34  ;;  %v16062_v34 = vld [vmem:[%s20110_s9 + $0x8d8] sm:$0xff]  }
 0x6ba   :  { %14535 = vmatprep.subr.bf16.mxu1 %v16035_v25 }
 0x6bc   :  { %15220 = vmatmul.mubr.msk.bf16.vlgmr.msra.gmra.mxu1 %vm3904_vm1, %v20162_v59 }
 0x6bd   :  { %14536 = vmatpush3.bf16.msra.mxu1 %v16036_v43  ;;  %11287 = vmatprep.mubr.bf16.mxu1 %v20163_v35  ;;  %v16064_v35 = vld [vmem:[%s20110_s9 + $0x8d0] sm:$0xff]  }
 0x6be   :  { %14537 = vmatprep.subr.bf16.mxu1 %v16037_v22  ;;  %v16063_v22 = vld [vmem:[%s20110_s9 + $0x898] sm:$0xff]  }
 0x6bf   :  { %v14521_v28 = vpop.f32.mrf.mxu0 }
 0x6c1   :  { %14538 = vmatpush3.bf16.msra.mxu1 %v16038_v53  ;;  %v14522_v55 = vpop.f32.mrf.mxu0 }
 0x6c2   :  { %v19798_v14 = vadd.f32 %v14522_v55, %v14521_v28  ;;  %14539 = vmatprep.subr.bf16.mxu1 %v16039_v48  ;;  %v16065_v28 = vld [vmem:[%s20110_s9 + $0x890] sm:$0xff]   ;;  %v16066_v55 = vld [vmem:[%s20110_s9 + $0x8c8] sm:$0xff]  }
 0x6c3   :  { %v14524_v18 = vpop.f32.mrf.mxu0 }
 0x6c4   :  { %v16067_v18 = vld [vmem:[%s20110_s9 + $0x888] sm:$0xff]  }
 0x6c5   :  { %14540 = vmatpush3.bf16.msra.mxu1 %v16040_v37  ;;  %v14525_v16 = vpop.f32.mrf.mxu0 }
 0x6c6   :  { %14541 = vmatprep.subr.bf16.mxu1 %v16041_v11 }
 0x6c8   :  { %v9318_v2 = vpop.f32.mrf.mxu1 }
 0x6c9   :  { %v9319_v6 = vadd.f32 %v19276_v29, %v9318_v2  ;;  %14542 = vmatpush3.bf16.msra.mxu1 %v16042_v58  ;;  %v16068_v58 = vld [vmem:[%s20110_s9 + $0x8c0] sm:$0xff]  }
 0x6ca   :  { %v15113_v52 = vpop.f32.mrf.mxu1  ;;  %14543 = vmatprep.subr.bf16.mxu1 %v16043_v23 }
 0x6cb   :  { %v9325_v46 = vrot.slane %v9319_v6, 7  ;;  %v16070_v52 = vld [vmem:[%s20110_s9 + $0x8b8] sm:$0xff]  }
 0x6cc   :  { %v9321_v15 = vpop.f32.mrf.mxu1 }
 0x6cd   :  { %v9327_v41 = vadd.f32 %v9325_v46, %v9041_v12  ;;  %14544 = vmatpush3.bf16.msra.mxu1 %v16044_v62  ;;  %v16060_v12 = vld [vmem:[%s20110_s9 + $0x8e0] sm:$0xff]   ;;  %v16072_v46 = vld [vmem:[%s20110_s9 + $0x8b0] sm:$0xff]  }
 0x6ce   :  { %v15114_v29 = vpop.f32.mrf.mxu1  ;;  %14545 = vmatprep.subr.bf16.mxu1 %v16045_v24  ;;  %v16069_v62 = vld [vmem:[%s20110_s9 + $0x880] sm:$0xff]   ;;  %v16071_v24 = vld [vmem:[%s20110_s9 + $0x878] sm:$0xff]   ;;  %v16073_v15 = vld [vmem:[%s20110_s9 + $0x870] sm:$0xff]  }
 0x6d1   :  { %14546 = vmatpush3.bf16.msra.mxu1 %v16046_v30 }
 0x6d2   :  { %14547 = vmatprep.subr.bf16.mxu1 %v16047_v13  ;;  %v20167_v13 = vld [vmem:[#allocation20_spill] sm:$0xff] }
 0x6d5   :  { %14548 = vmatpush3.bf16.msra.mxu1 %v16048_v4 }
 0x6d6   :  { %14549 = vmatprep.subr.bf16.mxu1 %v16049_v32  ;;  %v16075_v32 = vld [vmem:[%s20110_s9 + $0x9cc] sm:$0xff]  }
 0x6d9   :  { %14550 = vmatpush3.bf16.msra.mxu1 %v16050_v21 }
 0x6da   :  { %15241 = vmatprep.subr.bf16.mxu1 %v20134_v5 }
 0x6db   :  { %v19836_v7 = vpop.f32.mrf.mxu0 }
 0x6dc   :  { %11288 = vmatmul.mubr.bf16.vlgmr.msra.gmra.mxu1 %v20164_v57  ;;  %v16077_v57 = vld [vmem:[%s20110_s9 + $0x9bc] sm:$0xff]  }
 0x6dd   :  { %15242 = vmatpush3.bf16.msra.mxu1 %v11539_v9  ;;  %v15239_v33 = vpop.f32.mrf.mxu0  ;;  %15255 = vmatprep.mubr.msk.bf16.mxu1 %vm16128_vm2, %v20134_v5  ;;  %v16076_v9 = vld [vmem:[%s20110_s9 + $0x9c4] sm:$0xff]  }
 0x6de   :  { %15243 = vmatprep.subr.bf16.mxu1 %v20134_v5 }
 0x6df   :  { %v11332_v47 = vpop.f32.mrf.mxu0 }
 0x6e1   :  { %15244 = vmatpush3.bf16.msra.mxu1 %v16052_v38  ;;  %v15240_v60 = vpop.f32.mrf.mxu0  ;;  %v16078_v38 = vld [vmem:[%s20110_s9 + $0x9b4] sm:$0xff]  }
 0x6e2   :  { %15245 = vmatprep.subr.bf16.mxu1 %v20134_v5 }
 0x6e5   :  { %15246 = vmatpush3.bf16.msra.mxu1 %v16053_v40 }
 0x6e6   :  { %15247 = vmatprep.subr.bf16.mxu1 %v20134_v5 }
 0x6e8   :  { %v14371_v61 = vpop.f32.mrf.mxu1 }
 0x6e9   :  { %15248 = vmatpush3.bf16.msra.mxu1 %v16054_v44 }
 0x6ea   :  { %v14372_v50 = vpop.f32.mrf.mxu1  ;;  %15249 = vmatprep.subr.bf16.mxu1 %v20134_v5 }
 0x6eb   :  { %v14373_v26 = vadd.f32 %v14372_v50, %v14371_v61  ;;  %v16079_v61 = vld [vmem:[%s20110_s9 + $0x9ac] sm:$0xff]  }
 0x6ec   :  { %v14374_v36 = vpop.f32.mrf.mxu1 }
 0x6ed   :  { %v9605_v31 = vadd.f32 %v14373_v26, %v19355_v3  ;;  %15250 = vmatpush3.bf16.msra.mxu1 %v16055_v1  ;;  %v16058_v3 = vld [vmem:[%s20110_s9 + $0x8e8] sm:$0xff]  }
 0x6ee   :  { %v14375_v42 = vpop.f32.mrf.mxu1  ;;  %15251 = vmatprep.subr.bf16.mxu1 %v20134_v5  ;;  %v16080_v26 = vld [vmem:[%s20110_s9 + $0x9a4] sm:$0xff]  }
 0x6ef   :  { %v9611_v56 = vrot.slane %v9605_v31, 7  ;;  %v16082_v31 = vld [vmem:[%s20110_s9 + $0xa10] sm:$0xff]  }
 0x6f0   :  { %v20168_v42 = vld [vmem:[#allocation22_spill] sm:$0xff] }
 0x6f1   :  { %15252 = vmatpush3.bf16.msra.mxu1 %v16056_v39  ;;  %v9613_v49 = vadd.f32 %v9611_v56, %v9327_v41  ;;  %v16074_v41 = vld [vmem:[%s20110_s9 + $0x9d4] ss:$0 sps:$4 sm:$0xff]   ;;  %v16083_v39 = vld [vmem:[%s20110_s9 + $0xa48] sm:$0xff]  }
 0x6f2   :  { %15253 = vmatprep.subr.bf16.mxu1 %v20134_v5  ;;  %v12111_v30 = vsel %vm167_vm4, %v16074_v41, 0  ;;  %v20169_v56 = vld [vmem:[#allocation21_spill] sm:$0xff] }
 0x6f5   :  { %15254 = vmatpush3.bf16.msra.mxu1 %v16057_v45  ;;  %v16084_v45 = vld [vmem:[%s20110_s9 + $0xa08] sm:$0xff]  }
 0x6f6   :  { %14595 = vmatprep.subr.bf16.mxu1 %v16058_v3 }
 0x6f8   :  { %15256 = vmatmul.mubr.msk.bf16.vlgmr.msra.gmra.mxu1 %vm3904_vm1, %v20165_v0 }
 0x6f9   :  { %14596 = vmatpush3.bf16.msra.mxu1 %v16059_v63  ;;  %11859 = vmatprep.mubr.bf16.mxu1 %v20166_v19  ;;  %v16087_v19 = vld [vmem:[%s20110_s9 + $0xa38] sm:$0xff]  }
 0x6fa   :  { %14597 = vmatprep.subr.bf16.mxu1 %v16060_v12  ;;  %v16086_v12 = vld [vmem:[%s20110_s9 + $0xa00] sm:$0xff]  }
 0x6fb   :  { %v14581_v25 = vpop.f32.mrf.mxu0 }
 0x6fd   :  { %14598 = vmatpush3.bf16.msra.mxu1 %v16061_v8  ;;  %v14582_v43 = vpop.f32.mrf.mxu0 }
 0x6fe   :  { %v19887_v59 = vadd.f32 %v14582_v43, %v14581_v25  ;;  %14599 = vmatprep.subr.bf16.mxu1 %v16062_v34  ;;  %v16088_v25 = vld [vmem:[%s20110_s9 + $0x9f8] sm:$0xff]   ;;  %v16089_v43 = vld [vmem:[%s20110_s9 + $0xa30] sm:$0xff]  }
 0x6ff   :  { %v14584_v53 = vpop.f32.mrf.mxu0 }
 0x700   :  { %v16090_v53 = vld [vmem:[%s20110_s9 + $0x9f0] sm:$0xff]  }
 0x701   :  { %14600 = vmatpush3.bf16.msra.mxu1 %v16063_v22  ;;  %v14585_v48 = vpop.f32.mrf.mxu0 }
 0x702   :  { %14601 = vmatprep.subr.bf16.mxu1 %v16064_v35 }
 0x704   :  { %v9890_v37 = vpop.f32.mrf.mxu1 }
 0x705   :  { %v9891_v11 = vadd.f32 %v19452_v10, %v9890_v37  ;;  %14602 = vmatpush3.bf16.msra.mxu1 %v16065_v28  ;;  %v16091_v28 = vld [vmem:[%s20110_s9 + $0xa28] sm:$0xff]  }
 0x706   :  { %v15149_v16 = vpop.f32.mrf.mxu1  ;;  %14603 = vmatprep.subr.bf16.mxu1 %v16066_v55 }
 0x707   :  { %v9897_v23 = vrot.slane %v9891_v11, 7  ;;  %v16093_v16 = vld [vmem:[%s20110_s9 + $0xa20] sm:$0xff]  }
 0x708   :  { %v9893_v2 = vpop.f32.mrf.mxu1 }
 0x709   :  { %v9899_v6 = vadd.f32 %v9897_v23, %v9613_v49  ;;  %14604 = vmatpush3.bf16.msra.mxu1 %v16067_v18  ;;  %v16085_v49 = vld [vmem:[%s20110_s9 + $0xa40] sm:$0xff]   ;;  %v16092_v18 = vld [vmem:[%s20110_s9 + $0x9e8] sm:$0xff]   ;;  %v16095_v23 = vld [vmem:[%s20110_s9 + $0xa18] sm:$0xff]  }
 0x70a   :  { %v15150_v10 = vpop.f32.mrf.mxu1  ;;  %14605 = vmatprep.subr.bf16.mxu1 %v16068_v58  ;;  %v16094_v58 = vld [vmem:[%s20110_s9 + $0x9e0] sm:$0xff]   ;;  %v16096_v2 = vld [vmem:[%s20110_s9 + $0x9d8] sm:$0xff]  }
 0x70d   :  { %14606 = vmatpush3.bf16.msra.mxu1 %v16069_v62 }
 0x70e   :  { %14607 = vmatprep.subr.bf16.mxu1 %v16070_v52  ;;  %v20170_v52 = vld [vmem:[#allocation23_spill] sm:$0xff] }
 0x711   :  { %14608 = vmatpush3.bf16.msra.mxu1 %v16071_v24 }
 0x712   :  { %14609 = vmatprep.subr.bf16.mxu1 %v16072_v46  ;;  %v16098_v46 = vld [vmem:[%s20110_s9 + $0xb34] sm:$0xff]  }
 0x715   :  { %14610 = vmatpush3.bf16.msra.mxu1 %v16073_v15 }
 0x716   :  { %15277 = vmatprep.subr.bf16.mxu1 %v20134_v5 }
 0x717   :  { %v19925_v29 = vpop.f32.mrf.mxu0 }
 0x718   :  { %11860 = vmatmul.mubr.bf16.vlgmr.msra.gmra.mxu1 %v20167_v13  ;;  %v16100_v13 = vld [vmem:[%s20110_s9 + $0xb24] sm:$0xff]  }
 0x719   :  { %15278 = vmatpush3.bf16.msra.mxu1 %v12111_v30  ;;  %v15275_v4 = vpop.f32.mrf.mxu0  ;;  %15291 = vmatprep.mubr.msk.bf16.mxu1 %vm16128_vm2, %v20134_v5  ;;  %v16099_v30 = vld [vmem:[%s20110_s9 + $0xb2c] sm:$0xff]  }
 0x71a   :  { %15279 = vmatprep.subr.bf16.mxu1 %v20134_v5 }
 0x71b   :  { %v11904_v21 = vpop.f32.mrf.mxu0 }
 0x71d   :  { %15280 = vmatpush3.bf16.msra.mxu1 %v16075_v32  ;;  %v15276_v54 = vpop.f32.mrf.mxu0  ;;  %v16101_v32 = vld [vmem:[%s20110_s9 + $0xb1c] sm:$0xff]  }
 0x71e   :  { %15281 = vmatprep.subr.bf16.mxu1 %v20134_v5 }
 0x721   :  { %15282 = vmatpush3.bf16.msra.mxu1 %v16076_v9 }
 0x722   :  { %15283 = vmatprep.subr.bf16.mxu1 %v20134_v5 }
 0x724   :  { %v14431_v33 = vpop.f32.mrf.mxu1 }
 0x725   :  { %15284 = vmatpush3.bf16.msra.mxu1 %v16077_v57 }
 0x726   :  { %v14432_v47 = vpop.f32.mrf.mxu1  ;;  %15285 = vmatprep.subr.bf16.mxu1 %v20134_v5 }
 0x727   :  { %v14433_v60 = vadd.f32 %v14432_v47, %v14431_v33  ;;  %v16102_v33 = vld [vmem:[%s20110_s9 + $0xb14] sm:$0xff]  }
 0x728   :  { %v14434_v40 = vpop.f32.mrf.mxu1 }
 0x729   :  { %v10177_v44 = vadd.f32 %v14433_v60, %v19535_v20  ;;  %15286 = vmatpush3.bf16.msra.mxu1 %v16078_v38  ;;  %v16081_v20 = vld [vmem:[%s20110_s9 + $0xa50] sm:$0xff]  }
 0x72a   :  { %v14435_v1 = vpop.f32.mrf.mxu1  ;;  %15287 = vmatprep.subr.bf16.mxu1 %v20134_v5  ;;  %v16103_v60 = vld [vmem:[%s20110_s9 + $0xb0c] sm:$0xff]  }
 0x72b   :  { %v10183_v50 = vrot.slane %v10177_v44, 7  ;;  %v12538_v44 = vpop.permute.xlu1 %12537 }
 0x72d   :  { %15288 = vmatpush3.bf16.msra.mxu1 %v16079_v61  ;;  %v10185_v36 = vadd.f32 %v10183_v50, %v9899_v6  ;;  %v16097_v6 = vld [vmem:[%s20110_s9 + $0xb3c] ss:$0 sps:$4 sm:$0xff]  }
 0x72e   :  { %15289 = vmatprep.subr.bf16.mxu1 %v20134_v5  ;;  %v12683_v62 = vsel %vm167_vm4, %v16097_v6, 0 }
 0x731   :  { %15290 = vmatpush3.bf16.msra.mxu1 %v16080_v26 }
 0x732   :  { %14655 = vmatprep.subr.bf16.mxu1 %v16081_v20 }
 0x734   :  { %15292 = vmatmul.mubr.msk.bf16.vlgmr.msra.gmra.mxu1 %vm3904_vm1, %v20168_v42 }
 0x735   :  { %14656 = vmatpush3.bf16.msra.mxu1 %v16082_v31  ;;  %12431 = vmatprep.mubr.bf16.mxu1 %v20169_v56 }
 0x736   :  { %14657 = vmatprep.subr.bf16.mxu1 %v16083_v39 }
 0x737   :  { %v14641_v3 = vpop.f32.mrf.mxu0 }
 0x739   :  { %14658 = vmatpush3.bf16.msra.mxu1 %v16084_v45  ;;  %v14642_v63 = vpop.f32.mrf.mxu0 }
 0x73a   :  { %v19976_v0 = vadd.f32 %v14642_v63, %v14641_v3  ;;  %14659 = vmatprep.subr.bf16.mxu1 %v16085_v49 }
 0x73b   :  { %v14644_v8 = vpop.f32.mrf.mxu0 }
 0x73d   :  { %14660 = vmatpush3.bf16.msra.mxu1 %v16086_v12  ;;  %v14645_v34 = vpop.f32.mrf.mxu0 }
 0x73e   :  { %14661 = vmatprep.subr.bf16.mxu1 %v16087_v19 }
 0x740   :  { %v10462_v22 = vpop.f32.mrf.mxu1 }
 0x741   :  { %v10463_v35 = vadd.f32 %v19635_v27, %v10462_v22  ;;  %14662 = vmatpush3.bf16.msra.mxu1 %v16088_v25 }
 0x742   :  { %v15185_v48 = vpop.f32.mrf.mxu1  ;;  %14663 = vmatprep.subr.bf16.mxu1 %v16089_v43 }
 0x743   :  { %v10469_v55 = vrot.slane %v10463_v35, 7  ;;  %v12784_v48 = vld [vmem:[%s20112_s11 + $0x30] sm:$0xff] }
 0x744   :  { %v10465_v37 = vpop.f32.mrf.mxu1 }
 0x745   :  { %v10471_v11 = vadd.f32 %v10469_v55, %v10185_v36  ;;  %14664 = vmatpush3.bf16.msra.mxu1 %v16090_v53 }
 0x746   :  { %v15186_v27 = vpop.f32.mrf.mxu1  ;;  %14665 = vmatprep.subr.bf16.mxu1 %v16091_v28  ;;  %v12783_v28 = vld [vmem:[%s20112_s11 + $0x28] sm:$0xff] }
 0x747   :  { %v12779_v27 = vld [vmem:[%s20112_s11 + $0x8] sm:$0xff] }
 0x749   :  { %14666 = vmatpush3.bf16.msra.mxu1 %v16092_v18  ;;  %v12780_v18 = vld [vmem:[%s20112_s11 + $0x10] sm:$0xff] }
 0x74a   :  { %14667 = vmatprep.subr.bf16.mxu1 %v16093_v16  ;;  %v12778_v16 = vld [vmem:[%s20112_s11] sm:$0xff] }
 0x74d   :  { %14668 = vmatpush3.bf16.msra.mxu1 %v16094_v58 }
 0x74e   :  { %14669 = vmatprep.subr.bf16.mxu1 %v16095_v23 }
 0x751   :  { %14670 = vmatpush3.bf16.msra.mxu1 %v16096_v2 }
 0x752   :  { %15313 = vmatprep.subr.bf16.mxu1 %v20134_v5 }
 0x753   :  { %v20014_v10 = vpop.f32.mrf.mxu0 }
 0x754   :  { %12432 = vmatmul.mubr.bf16.vlgmr.msra.gmra.mxu1 %v20170_v52 }
 0x755   :  { %15314 = vmatpush3.bf16.msra.mxu1 %v12683_v62  ;;  %v15311_v24 = vpop.f32.mrf.mxu0  ;;  %15327 = vmatprep.mubr.msk.bf16.mxu1 %vm16128_vm2, %v20134_v5 }
 0x756   :  { %15315 = vmatprep.subr.bf16.mxu1 %v20134_v5 }
 0x757   :  { %v12476_v15 = vpop.f32.mrf.mxu0 }
 0x759   :  { %15316 = vmatpush3.bf16.msra.mxu1 %v16098_v46  ;;  %v15312_v41 = vpop.f32.mrf.mxu0 }
 0x75a   :  { %15317 = vmatprep.subr.bf16.mxu1 %v20134_v5 }
 0x75d   :  { %15318 = vmatpush3.bf16.msra.mxu1 %v16099_v30 }
 0x75e   :  { %15319 = vmatprep.subr.bf16.mxu1 %v20134_v5 }
 0x760   :  { %v14491_v4 = vpop.f32.mrf.mxu1 }
 0x761   :  { %15320 = vmatpush3.bf16.msra.mxu1 %v16100_v13 }
 0x762   :  { %v14492_v21 = vpop.f32.mrf.mxu1  ;;  %15321 = vmatprep.subr.bf16.mxu1 %v20134_v5 }
 0x763   :  { %v14493_v54 = vadd.f32 %v14492_v21, %v14491_v4 }
 0x764   :  { %v14494_v9 = vpop.f32.mrf.mxu1 }
 0x765   :  { %v10752_v57 = vadd.f32 %v14493_v54, %v19723_v17  ;;  %15322 = vmatpush3.bf16.msra.mxu1 %v16101_v32  ;;  %v12541_v17 = vsel %vm8233_vm3, %v19664_v51, %v12538_v44  ;;  %v12785_v51 = vld [vmem:[%s20112_s11 + $0x38] sm:$0xff] }
 0x766   :  { %v14495_v38 = vpop.f32.mrf.mxu1  ;;  %15323 = vmatprep.subr.bf16.mxu1 %v20134_v5 }
 0x767   :  { %v10758_v47 = vrot.slane %v10752_v57, 7 }
 0x769   :  { %15324 = vmatpush3.bf16.msra.mxu1 %v16102_v33  ;;  %v10760_v40 = vadd.f32 %v10758_v47, %v10471_v11  ;;  %v12781_v11 = vld [vmem:[%s20112_s11 + $0x18] sm:$0xff] }
 0x76a   :  { %15325 = vmatprep.subr.bf16.mxu1 %v20134_v5 }
 0x76d   :  { %15326 = vmatpush3.bf16.msra.mxu1 %v16103_v60 }
 0x76e   :  { %15331 = vmatprep.subr.mxu1 %v20134_v5 }
 0x770   :  { %15328 = vmatmul.mubr.msk.bf16.vlgmr.msra.gmra.mxu1 %vm3904_vm1, %v12541_v17 }
 0x771   :  { %15347 = vmatprep.mubr.msk.f32.mxu1 %vm16128_vm2, %v20134_v5  ;;  %15332 = vmatpush3.msra.mxu1 %v12785_v51 }
 0x772   :  { %15333 = vmatprep.subr.mxu1 %v20134_v5 }
 0x773   :  { %v14701_v61 = vpop.f32.mrf.mxu0  ;;  %15334 = vmatpush3.msra.mxu1 %v12784_v48 }
 0x774   :  { %15335 = vmatprep.subr.mxu1 %v20134_v5 }
 0x775   :  { %v14702_v1 = vpop.f32.mrf.mxu0  ;;  %15336 = vmatpush3.msra.mxu1 %v12783_v28 }
 0x776   :  { %v20050_v50 = vadd.f32 %v14702_v1, %v14701_v61  ;;  %15337 = vmatprep.subr.mxu1 %v20134_v5 }
 0x777   :  { %v14704_v26 = vpop.f32.mrf.mxu0 }
 0x779   :  { %v14705_v36 = vpop.f32.mrf.mxu0 }
 0x77c   :  { %v11043_v20 = vpop.f32.mrf.mxu1 }
 0x77d   :  { %v11044_v31 = vadd.f32 %v19798_v14, %v11043_v20 }
 0x77e   :  { %v15221_v39 = vpop.f32.mrf.mxu1 }
 0x77f   :  { %v11050_v42 = vrot.slane %v11044_v31, 7 }
 0x780   :  { %v11046_v56 = vpop.f32.mrf.mxu1 }
 0x781   :  { %v11052_v45 = vadd.f32 %v11050_v42, %v10760_v40 }
 0x782   :  { %v15222_v49 = vpop.f32.mrf.mxu1 }
 0x79c   :  { %v14551_v3 = vpop.f32.mrf.mxu1 }
 0x79e   :  { %v14552_v63 = vpop.f32.mrf.mxu1 }
 0x79f   :  { %v14553_v12 = vadd.f32 %v14552_v63, %v14551_v3 }
 0x7a0   :  { %v14554_v19 = vpop.f32.mrf.mxu1 }
 0x7a1   :  { %v11330_v8 = vadd.f32 %v14553_v12, %v19836_v7  ;;  %v12782_v7 = vld [vmem:[%s20112_s11 + $0x20] sm:$0xff] }
 0x7a2   :  { %v14555_v34 = vpop.f32.mrf.mxu1  ;;  %15338 = vmatpush3.msra.mxu1 %v12782_v7 }
 0x7a3   :  { %v11336_v14 = vrot.slane %v11330_v8, 7  ;;  %15339 = vmatprep.subr.mxu1 %v20134_v5 }
 0x7a4   :  { %15340 = vmatpush3.msra.mxu1 %v12781_v11 }
 0x7a5   :  { %v11338_v25 = vadd.f32 %v11336_v14, %v11052_v45  ;;  %15341 = vmatprep.subr.mxu1 %v20134_v5 }
 0x7a6   :  { %15342 = vmatpush3.msra.mxu1 %v12780_v18 }
 0x7a7   :  { %15343 = vmatprep.subr.mxu1 %v20134_v5 }
 0x7a8   :  { %15344 = vmatpush3.msra.mxu1 %v12779_v27 }
 0x7a9   :  { %15345 = vmatprep.subr.mxu1 %v20134_v5 }
 0x7aa   :  { %15346 = vmatpush3.msra.mxu1 %v12778_v16 }
 0x7b8   :  { %v11615_v43 = vpop.f32.mrf.mxu1 }
 0x7b9   :  { %v11616_v22 = vadd.f32 %v19887_v59, %v11615_v43 }
 0x7ba   :  { %v15257_v35 = vpop.f32.mrf.mxu1 }
 0x7bb   :  { %v11622_v53 = vrot.slane %v11616_v22, 7 }
 0x7bc   :  { %v11618_v55 = vpop.f32.mrf.mxu1 }
 0x7bd   :  { %v11624_v37 = vadd.f32 %v11622_v53, %v11338_v25 }
 0x7be   :  { %v15258_v59 = vpop.f32.mrf.mxu1 }
 0x7d8   :  { %v14611_v58 = vpop.f32.mrf.mxu1 }
 0x7da   :  { %v14612_v23 = vpop.f32.mrf.mxu1 }
 0x7db   :  { %v14613_v2 = vadd.f32 %v14612_v23, %v14611_v58 }
 0x7dc   :  { %v14614_v6 = vpop.f32.mrf.mxu1 }
 0x7dd   :  { %v11902_v62 = vadd.f32 %v14613_v2, %v19925_v29 }
 0x7de   :  { %v14615_v52 = vpop.f32.mrf.mxu1 }
 0x7df   :  { %v11908_v24 = vrot.slane %v11902_v62, 7 }
 0x7e1   :  { %v11910_v46 = vadd.f32 %v11908_v24, %v11624_v37 }
 0x7f4   :  { %v12187_v15 = vpop.f32.mrf.mxu1 }
 0x7f5   :  { %v12188_v41 = vadd.f32 %v19976_v0, %v12187_v15  ;;  %v13739_v0 = vld [vmem:[%s20111_s10] ss:$0 sm:$0xff]  ;;  %s16104_s10 = scalar_lea.vmem %s12869_s30, 32 }
 0x7f6   :  { %v15293_v30 = vpop.f32.mrf.mxu1  ;;  %p16105_p0 = scmp.ne.s32.totalorder %s12869_s30, %s16104_s10  ;;  %p16110_p2 = scmp.lt.s32.totalorder %s16104_s10, %s16104_s10 }
 0x7f7   :  { %v12194_v13 = vrot.slane %v12188_v41, 7 }
 0x7f8   :  { %v12190_v4 = vpop.f32.mrf.mxu1  ;;  %p16111_p3 = por %p16110_p2, %p16109_p1 }
 0x7f9   :  { %v12196_v32 = vadd.f32 %v12194_v13, %v11910_v46 }
 0x7fa   :  { %v15294_v21 = vpop.f32.mrf.mxu1  ;;  %p16112_p4 = pnand %p16111_p3, %p16105_p0 }
 0x814   :  { %v14671_v54 = vpop.f32.mrf.mxu1 }
 0x816   :  { %v14672_v5 = vpop.f32.mrf.mxu1 }
 0x817   :  { %v14673_v33 = vadd.f32 %v14672_v5, %v14671_v54 }
 0x818   :  { %v14674_v9 = vpop.f32.mrf.mxu1 }
 0x819   :  { %v12474_v38 = vadd.f32 %v14673_v33, %v20014_v10  ;;  %v12786_v10 = vld [vmem:[%s20113_s12] sm:$0x1] }
 0x81a   :  { %v14675_v57 = vpop.f32.mrf.mxu1 }
 0x81b   :  { %v12480_v47 = vrot.slane %v12474_v38, 7 }
 0x81d   :  { %v12482_v44 = vadd.f32 %v12480_v47, %v12196_v32 }
 0x830   :  { %v12759_v29 = vpop.f32.mrf.mxu1 }
 0x831   :  { %v12760_v60 = vadd.f32 %v20050_v50, %v12759_v29 }
 0x832   :  { %v15329_v40 = vpop.f32.mrf.mxu1 }
 0x833   :  { %v12766_v17 = vrot.slane %v12760_v60, 7 }
 0x834   :  { %v12762_v61 = vpop.f32.mrf.mxu1 }
 0x835   :  { %v12768_v1 = vadd.f32 %v12766_v17, %v12482_v44 }
 0x836   :  { %v15330_v26 = vpop.f32.mrf.mxu1 }
 0x837   :  { %v12776_v36 = vadd.f32 %v13739_v0, %v12768_v1 }
 0x839   :  { %v12777_v20 = vmax.f32 %v12776_v36, 0.0 }
 0x83b   :  { %v12788_v31 = vrot.slane %v12777_v20, 1 }
 0x83d   :  { %15348 = vmatmul.mubr.msk.f32.vlgmr.msra.gmra.mxu1 %vm8098_vm5, %v12788_v31 }
 0x8fd   :  { %v12857_v50 = vpop.f32.mrf.mxu1 }
 0x8fe   :  { %v12858_v39 = vadd.f32 %v12857_v50, %v12786_v10 }
 0x8ff   :  { %v15349_v42 = vpop.f32.mrf.mxu1 }
 0x900   :  { %12861 = vst.msk [vmem:[#allocation3 + $0x1] sm:$0x1] %vm8172_vm6, %v12858_v39 }
 0x901   :  { %16115 = shalt.err (!%p16112_p4)
}
 0x902   :  { %12871 = dma.vmem_to_hbm [thread:$0]  %s12869_s30, 32, %s20114_s13, [#allocation4]  }
 0x903   :  { %16124 = dma.done.wait [#allocation4], 32  }
 0x904   :  { %16125 = vsyncadd [#allocation4], 4294967264 }
 0x905   :  { %12875 = vsyncpa [#allocation4], 1 }

</bundles_post_ra>
